<compile_context>
chip_gen: v5e
topology: v5e:2x2
jax: 0.10.0
libtpu: 0.0.40
codegen_flags: <defaults>
</compile_context>

<pallas_src>
import math
import numpy as np
import jax
import jax.numpy as jnp
from jax.experimental import pallas as pl
from jax.experimental.pallas import tpu as pltpu


# ---------------- deterministic parameter construction (host-side NumPy) -------

def dct_mat(size):
    m = [[(np.sqrt(1.0 / size) if i == 0 else np.sqrt(2.0 / size))
          * np.cos((j + 0.5) * np.pi * i / size)
          for j in range(size)] for i in range(size)]
    return np.asarray(m, dtype=np.float32)


def generate_filter(start, end, size):
    return np.asarray(
        [[0.0 if i + j > end or i + j <= start else 1.0 for j in range(size)]
         for i in range(size)],
        dtype=np.float32)


# ---------------- fused Pallas kernel -------------------------------------------

def f3net_fused_kernel(x_ref, kdct_ref, kidct_ref, rep_ref, filt_ref,
                       w1t_ref, w2t_ref, b2_ref, o_ref):
    """FAD_Head + backbone stand-in + _norm_fea + fc for one batch element.

    Every image plane is kept flattened to P = S*S = 256 lanes, so all matmuls
    are lane-dense and the 12-channel FAD features stay in VMEM.

    x_ref:     (1, C, P)    input planes, row-major flattened          (f32)
    kdct_ref:  (P, P)       kron(D^T, D^T): row-vec form of  D @ X @ D^T  (f32)
    kidct_ref: (P, P)       kron(D,   D)  : row-vec form of  D^T @ X @ D  (f32)
    rep_ref:   (4C, C)      0/1 channel-replication matrix (4x identity stack)
    filt_ref:  (4C, P)      per-output-channel frequency filters        (f32)
    w1t_ref:   (F, 4C)      stand-in per-pixel projection, transposed   (bf16)
    w2t_ref:   (nc, F)      fc weight, transposed                       (f32)
    b2_ref:    (nc, 1)      fc bias (column)                            (f32)
    o_ref:     (1, nc, 1)   logits
    """
    # ---- FAD head: 2-D DCT sandwich + 4 frequency bands (kept in f32) ----
    x = x_ref[0]                                                     # (C, P)
    x_freq = jnp.dot(x, kdct_ref[...],
                     preferred_element_type=jnp.float32)             # (C, P)
    # Replicate the C frequency planes 4x (one copy per filter branch) with a
    # tiny 0/1 matmul; resulting row order is filter-major / channel-minor,
    # identical to torch.cat(y_list, dim=1).
    x_freq12 = jnp.dot(rep_ref[...], x_freq,
                       preferred_element_type=jnp.float32)           # (12, P)
    x_pass = x_freq12 * filt_ref[...]                                # (12, P)
    fea = jnp.dot(x_pass, kidct_ref[...],
                  preferred_element_type=jnp.float32)                # (12, P)

    # ---- backbone stand-in: per-pixel 12 -> F projection (bf16 on the MXU) ----
    # TODO(synk): Xception backbone (FAD_xcep.features) unavailable; see header.
    h = jnp.dot(w1t_ref[...], fea.astype(jnp.bfloat16),
                preferred_element_type=jnp.float32)                  # (F, P) f32

    # ---- _norm_fea: ReLU + global average pool (lane-axis reduce) ----
    h = jnp.maximum(h, 0.0)
    pooled = jnp.mean(h, axis=1, keepdims=True)                      # (F, 1)

    # ---- fc  (Dropout(p=0.2) is the identity at inference) ----
    logits = jnp.dot(w2t_ref[...], pooled,
                     preferred_element_type=jnp.float32) + b2_ref[...]   # (nc,1)
    o_ref[0] = logits


# ---------------- wrapper --------------------------------------------------------

def f3net_fad_forward(x, params):
    N, C, S, _ = x.shape
    P = S * S
    nc, fdim = params["w2t"].shape
    x_flat = x.reshape(N, C, P)          # pure row-major flatten: no transpose

    out = pl.pallas_call(
        f3net_fused_kernel,
        out_shape=jax.ShapeDtypeStruct((N, nc, 1), jnp.float32),
        grid=(N,),
        in_specs=[
            pl.BlockSpec((1, C, P), lambda n: (n, 0, 0)),     # x (per batch)
            pl.BlockSpec((P, P), lambda n: (0, 0)),           # k_dct
            pl.BlockSpec((P, P), lambda n: (0, 0)),           # k_idct
            pl.BlockSpec((4 * C, C), lambda n: (0, 0)),       # rep
            pl.BlockSpec((4 * C, P), lambda n: (0, 0)),       # filt
            pl.BlockSpec((fdim, 4 * C), lambda n: (0, 0)),    # w1^T (bf16)
            pl.BlockSpec((nc, fdim), lambda n: (0, 0)),       # w2^T
            pl.BlockSpec((nc, 1), lambda n: (0, 0)),          # b2
        ],
        out_specs=pl.BlockSpec((1, nc, 1), lambda n: (n, 0, 0)),
        compiler_params=pltpu.CompilerParams(
            dimension_semantics=("parallel",)),               # both v7x TCs busy
    )(x_flat, params["k_dct"], params["k_idct"], params["rep"],
      params["filt12"], params["w1t"], params["w2t"], params["b2c"])
    return out.reshape(N, nc)


# ---------------- driver ----------------------------------------------------------

if __name__ == "__main__":
    N, C, S = 2, 3, 16            # FAD_Head requires 3 input channels
    num_classes = 2
    feat_dim = 2048               # fc = Linear(2048, 2) in 'FAD' mode
    P = S * S

    key = jax.random.PRNGKey(0)
    kx, kl, kw1, kw2, kb2 = jax.random.split(key, 5)

    x = jax.random.normal(kx, (N, C, S, S), dtype=jnp.float32)

    # --- FAD_Head parameters (deterministic) ---
    d = dct_mat(S)                                                   # (S, S)
    bands = [(0, S // 16), (S // 16, S // 8), (S // 8, S), (0, S * 2)]
    base = np.stack([generate_filter(s, e, S) for s, e in bands])    # (4, S, S)
    learnable = 0.1 * jax.random.normal(kl, (4, S, S), dtype=jnp.float32)
    # Filter.forward: base + norm_sigma(learnable)   (norm=False for FAD)
    filt = jnp.asarray(base) + (2.0 * jax.nn.sigmoid(learnable) - 1.0)
    filt12 = jnp.repeat(filt.reshape(4, P), C, axis=0)               # (12, P)

    # Row-vector Kronecker forms of the 2-D DCT sandwich (f32):
    #   rows @ k_dct  == vec(D @ X @ D^T)   ;   rows @ k_idct == vec(D^T @ X @ D)
    k_dct = jnp.asarray(np.kron(d.T, d.T))                           # (P, P)
    k_idct = jnp.asarray(np.kron(d, d))                              # (P, P)
    rep = jnp.asarray(np.tile(np.eye(C, dtype=np.float32), (4, 1)))  # (12, C)

    # --- backbone stand-in + fc parameters (deterministic) ---
    # TODO(synk): Xception class / pretrained weights unavailable; see header.
    w1 = (1.0 / math.sqrt(4 * C)) * jax.random.normal(
        kw1, (4 * C, feat_dim), dtype=jnp.float32)
    bound = 1.0 / math.sqrt(feat_dim)
    w2 = jax.random.uniform(kw2, (feat_dim, num_classes), jnp.float32, -bound, bound)
    b2 = jax.random.uniform(kb2, (num_classes,), jnp.float32, -bound, bound)

    params = {
        "k_dct": k_dct, "k_idct": k_idct, "rep": rep, "filt12": filt12,
        "w1t": w1.T.astype(jnp.bfloat16),     # bf16 operand for the MXU
        "w2t": w2.T,
        "b2c": b2.reshape(num_classes, 1),
    }

    logits = f3net_fad_forward(x, params)
    logits = jax.block_until_ready(logits)
    assert logits.shape == (N, num_classes)
    assert bool(jnp.all(jnp.isfinite(logits)))

    # --- pure-JAX f32 reference mirroring the PyTorch math ---
    dct = jnp.asarray(d)
    x_freq = jnp.einsum('ij,ncjk,lk->ncil', dct, x, dct)             # D x D^T
    ys = [jnp.einsum('ji,ncjk,kl->ncil', dct, x_freq * filt[i], dct)  # D^T . D
          for i in range(4)]
    fea_ref = jnp.concatenate(ys, axis=1)                            # (N,12,S,S)
    fea_ref = fea_ref.transpose(0, 2, 3, 1).reshape(N, P, 4 * C)
    h_ref = jnp.maximum(fea_ref @ w1, 0.0).mean(axis=1)              # (N, 2048)
    ref = h_ref @ w2 + b2                                            # (N, nc)
    np.testing.assert_allclose(np.asarray(logits), np.asarray(ref),
                               rtol=5e-2, atol=2e-2)

    print("KERNEL_OK")
</pallas_src>

<mosaic_0001>
module attributes {stable_mosaic.version = 11 : i64} {
  func.func @f3net_fused_kernel(%arg0: i32, %arg1: memref<1x3x256xf32, #tpu.memory_space<vmem>>, %arg2: memref<256x256xf32, #tpu.memory_space<vmem>>, %arg3: memref<256x256xf32, #tpu.memory_space<vmem>>, %arg4: memref<12x3xf32, #tpu.memory_space<vmem>>, %arg5: memref<12x256xf32, #tpu.memory_space<vmem>>, %arg6: memref<2048x12xbf16, #tpu.memory_space<vmem>>, %arg7: memref<2x2048xf32, #tpu.memory_space<vmem>>, %arg8: memref<2x1xf32, #tpu.memory_space<vmem>>, %arg9: memref<1x2x1xf32, #tpu.memory_space<vmem>>) attributes {dimension_semantics = [#tpu.dimension_semantics<parallel>], iteration_bounds = array<i64: 2>, scalar_prefetch = 0 : i64, scratch_operands = 0 : i64, tpu.core_type = #tpu.core_type<tc>, window_params = [{transform_indices = @transform_0, window_bounds = array<i64: 1, 3, 256>}, {pipeline_mode = #tpu.pipeline_mode<synchronous>, transform_indices = @transform_1, window_bounds = array<i64: 256, 256>}, {pipeline_mode = #tpu.pipeline_mode<synchronous>, transform_indices = @transform_2, window_bounds = array<i64: 256, 256>}, {pipeline_mode = #tpu.pipeline_mode<synchronous>, transform_indices = @transform_3, window_bounds = array<i64: 12, 3>}, {pipeline_mode = #tpu.pipeline_mode<synchronous>, transform_indices = @transform_4, window_bounds = array<i64: 12, 256>}, {pipeline_mode = #tpu.pipeline_mode<synchronous>, transform_indices = @transform_5, window_bounds = array<i64: 2048, 12>}, {pipeline_mode = #tpu.pipeline_mode<synchronous>, transform_indices = @transform_6, window_bounds = array<i64: 2, 2048>}, {pipeline_mode = #tpu.pipeline_mode<synchronous>, transform_indices = @transform_7, window_bounds = array<i64: 2, 1>}, {transform_indices = @transform_8, window_bounds = array<i64: 1, 2, 1>}]} {
    %c0 = arith.constant 0 : index
    %c0_0 = arith.constant 0 : index
    %c0_1 = arith.constant 0 : index
    %0 = vector.load %arg1[%c0, %c0_0, %c0_1] : memref<1x3x256xf32, #tpu.memory_space<vmem>>, vector<1x3x256xf32>
    %1 = vector.shape_cast %0 : vector<1x3x256xf32> to vector<3x256xf32>
    %c0_2 = arith.constant 0 : index
    %c0_3 = arith.constant 0 : index
    %2 = vector.load %arg2[%c0_2, %c0_3] : memref<256x256xf32, #tpu.memory_space<vmem>>, vector<256x256xf32>
    %cst = arith.constant dense<0.000000e+00> : vector<3x256xf32>
    %3 = tpu.matmul %1, %2, %cst {dimension_numbers = #tpu.dot_dimension_numbers<[1], [0], [0], [1], [0, 0, 1, 1], [], []>} : vector<3x256xf32>, vector<256x256xf32>, vector<3x256xf32> -> vector<3x256xf32>
    %c0_4 = arith.constant 0 : index
    %c0_5 = arith.constant 0 : index
    %4 = vector.load %arg4[%c0_4, %c0_5] : memref<12x3xf32, #tpu.memory_space<vmem>>, vector<12x3xf32>
    %cst_6 = arith.constant dense<0.000000e+00> : vector<12x256xf32>
    %5 = tpu.matmul %4, %3, %cst_6 {dimension_numbers = #tpu.dot_dimension_numbers<[1], [0], [0], [1], [0, 0, 1, 1], [], []>} : vector<12x3xf32>, vector<3x256xf32>, vector<12x256xf32> -> vector<12x256xf32>
    %c0_7 = arith.constant 0 : index
    %c0_8 = arith.constant 0 : index
    %6 = vector.load %arg5[%c0_7, %c0_8] : memref<12x256xf32, #tpu.memory_space<vmem>>, vector<12x256xf32>
    %7 = arith.mulf %5, %6 : vector<12x256xf32>
    %c0_9 = arith.constant 0 : index
    %c0_10 = arith.constant 0 : index
    %8 = vector.load %arg3[%c0_9, %c0_10] : memref<256x256xf32, #tpu.memory_space<vmem>>, vector<256x256xf32>
    %cst_11 = arith.constant dense<0.000000e+00> : vector<12x256xf32>
    %9 = tpu.matmul %7, %8, %cst_11 {dimension_numbers = #tpu.dot_dimension_numbers<[1], [0], [0], [1], [0, 0, 1, 1], [], []>} : vector<12x256xf32>, vector<256x256xf32>, vector<12x256xf32> -> vector<12x256xf32>
    %c0_12 = arith.constant 0 : index
    %c0_13 = arith.constant 0 : index
    %10 = vector.load %arg6[%c0_12, %c0_13] : memref<2048x12xbf16, #tpu.memory_space<vmem>>, vector<2048x12xbf16>
    %11 = arith.truncf %9 : vector<12x256xf32> to vector<12x256xbf16>
    %cst_14 = arith.constant dense<0.000000e+00> : vector<2048x256xf32>
    %12 = tpu.matmul %10, %11, %cst_14 {dimension_numbers = #tpu.dot_dimension_numbers<[1], [0], [0], [1], [0, 0, 1, 1], [], []>} : vector<2048x12xbf16>, vector<12x256xbf16>, vector<2048x256xf32> -> vector<2048x256xf32>
    %cst_15 = arith.constant 0.000000e+00 : f32
    %13 = vector.broadcast %cst_15 : f32 to vector<2048x256xf32>
    %14 = arith.maximumf %12, %13 : vector<2048x256xf32>
    %cst_16 = arith.constant dense<0.000000e+00> : vector<2048xf32>
    %15 = vector.multi_reduction <add>, %14, %cst_16 [1] : vector<2048x256xf32> to vector<2048xf32>
    %16 = vector.shape_cast %15 : vector<2048xf32> to vector<2048x1xf32>
    %cst_17 = arith.constant 2.560000e+02 : f32
    %17 = vector.broadcast %cst_17 : f32 to vector<2048x1xf32>
    %18 = arith.divf %16, %17 : vector<2048x1xf32>
    %c0_18 = arith.constant 0 : index
    %c0_19 = arith.constant 0 : index
    %19 = vector.load %arg7[%c0_18, %c0_19] : memref<2x2048xf32, #tpu.memory_space<vmem>>, vector<2x2048xf32>
    %cst_20 = arith.constant dense<0.000000e+00> : vector<2x1xf32>
    %20 = tpu.matmul %19, %18, %cst_20 {dimension_numbers = #tpu.dot_dimension_numbers<[1], [0], [0], [1], [0, 0, 1, 1], [], []>} : vector<2x2048xf32>, vector<2048x1xf32>, vector<2x1xf32> -> vector<2x1xf32>
    %c0_21 = arith.constant 0 : index
    %c0_22 = arith.constant 0 : index
    %21 = vector.load %arg8[%c0_21, %c0_22] : memref<2x1xf32, #tpu.memory_space<vmem>>, vector<2x1xf32>
    %22 = arith.addf %20, %21 : vector<2x1xf32>
    %c0_23 = arith.constant 0 : index
    %c0_24 = arith.constant 0 : index
    %c0_25 = arith.constant 0 : index
    %23 = vector.load %arg9[%c0_23, %c0_24, %c0_25] : memref<1x2x1xf32, #tpu.memory_space<vmem>>, vector<1x2x1xf32>
    %24 = vector.shape_cast %23 : vector<1x2x1xf32> to vector<2x1xf32>
    %25 = vector.shape_cast %22 : vector<2x1xf32> to vector<1x2x1xf32>
    tpu.vector_store %arg9[%c0_23, %c0_24, %c0_25], %25 {strides = array<i32>} : memref<1x2x1xf32, #tpu.memory_space<vmem>>, vector<1x2x1xf32>,
    return
  }
  func.func @transform_0(%arg0: i32) -> (i32, i32, i32) {
    %c0_i32 = arith.constant 0 : i32
    %c0_i32_0 = arith.constant 0 : i32
    %c0_i32_1 = arith.constant 0 : i32
    return %arg0, %c0_i32, %c0_i32_0 : i32, i32, i32
  }
  func.func @transform_1(%arg0: i32) -> (i32, i32) {
    %c0_i32 = arith.constant 0 : i32
    %c0_i32_0 = arith.constant 0 : i32
    %c0_i32_1 = arith.constant 0 : i32
    return %c0_i32, %c0_i32_0 : i32, i32
  }
  func.func @transform_2(%arg0: i32) -> (i32, i32) {
    %c0_i32 = arith.constant 0 : i32
    %c0_i32_0 = arith.constant 0 : i32
    %c0_i32_1 = arith.constant 0 : i32
    return %c0_i32, %c0_i32_0 : i32, i32
  }
  func.func @transform_3(%arg0: i32) -> (i32, i32) {
    %c0_i32 = arith.constant 0 : i32
    %c0_i32_0 = arith.constant 0 : i32
    %c0_i32_1 = arith.constant 0 : i32
    return %c0_i32, %c0_i32_0 : i32, i32
  }
  func.func @transform_4(%arg0: i32) -> (i32, i32) {
    %c0_i32 = arith.constant 0 : i32
    %c0_i32_0 = arith.constant 0 : i32
    %c0_i32_1 = arith.constant 0 : i32
    return %c0_i32, %c0_i32_0 : i32, i32
  }
  func.func @transform_5(%arg0: i32) -> (i32, i32) {
    %c0_i32 = arith.constant 0 : i32
    %c0_i32_0 = arith.constant 0 : i32
    %c0_i32_1 = arith.constant 0 : i32
    return %c0_i32, %c0_i32_0 : i32, i32
  }
  func.func @transform_6(%arg0: i32) -> (i32, i32) {
    %c0_i32 = arith.constant 0 : i32
    %c0_i32_0 = arith.constant 0 : i32
    %c0_i32_1 = arith.constant 0 : i32
    return %c0_i32, %c0_i32_0 : i32, i32
  }
  func.func @transform_7(%arg0: i32) -> (i32, i32) {
    %c0_i32 = arith.constant 0 : i32
    %c0_i32_0 = arith.constant 0 : i32
    %c0_i32_1 = arith.constant 0 : i32
    return %c0_i32, %c0_i32_0 : i32, i32
  }
  func.func @transform_8(%arg0: i32) -> (i32, i32, i32) {
    %c0_i32 = arith.constant 0 : i32
    %c0_i32_0 = arith.constant 0 : i32
    %c0_i32_1 = arith.constant 0 : i32
    return %arg0, %c0_i32, %c0_i32_0 : i32, i32, i32
  }
}

</mosaic_0001>

<bundles_post_ra>
// kernel: tpu_custom_call.1
= control target key start
LH: loop header
LB: loop body
LE: loop exit
PB: predicated region body
PF: predicated region fallthrough
CT: control target
= control target key end

     0   :  { %s6214_s27 = smov 0   ;;  %s8169_s0 = inlined_call_operand.vmem [shape: f32[2,3,256], index: 0, kind: input, shape index: {}]   ;;  %s8170_s1 = inlined_call_operand.vmem [shape: f32[256,256], index: 1, kind: input, shape index: {}]   ;;  %s8171_s2 = inlined_call_operand.vmem [shape: f32[256,256], index: 2, kind: input, shape index: {}]   ;;  %s8172_s3 = inlined_call_operand.vmem [shape: f32[12,3], index: 3, kind: input, shape index: {}]   ;;  %s8173_s4 = inlined_call_operand.vmem [shape: f32[12,256], index: 4, kind: input, shape index: {}]   ;;  %s8174_s5 = inlined_call_operand.vmem [shape: bf16[2048,12], index: 5, kind: input, shape index: {}]   ;;  %s8175_s6 = inlined_call_operand.vmem [shape: f32[2,2048], index: 6, kind: input, shape index: {}]   ;;  %s8176_s7 = inlined_call_operand.vmem [shape: f32[2,1], index: 7, kind: input, shape index: {}]   ;;  %s8177_s8 = inlined_call_operand.vmem [shape: f32[2,2,1], index: 8, kind: output, shape index: {}]  }
   0x1 LB: > { %s5234_s28 = sadd.s32 4294967295, %s6166_s27   ;;  %p5238_p0 = scmp.ge.s32.totalorder %s6166_s27, 1  ;;  %s6166_s27 = sphi %s6214_s27, %s18_s27  }
   0x2   : > { %p262_p1 = scmp.lt.s32.totalorder %s6166_s27, 3 }
   0x4   : > { %p263_p2 = pnand %p5238_p0, %p262_p1 }
   0x6   : > { %266 = sbr.rel (%p263_p2) target bundleno = 2017 (0x7e1), region = 52 }
   0xb   : > { %v337_v0 = vld [vmem:[%s8170_s1 + $0xf8] sm:$0xff]  ;;  %v335_v2 = vld [vmem:[%s8170_s1 + $0xe8] sm:$0xff]  ;;  %v336_v6 = vld [vmem:[%s8170_s1 + $0xf0] sm:$0xff]  ;;  %p6266_p3 = scmp.lt.s32.totalorder %s5234_s28, 1  ;;  %vm465_vm0 = vcmask 1042432   ;;  %vm458_vm1 = vcmask 23552  }
   0xc   : > { %v369_v1 = vld [vmem:[%s8170_s1 + $0x1f8] sm:$0xff]  ;;  %416 = vmatpush.msra.mxu2 %v337_v0  ;;  %v367_v3 = vld [vmem:[%s8170_s1 + $0x1e8] sm:$0xff]  ;;  %v368_v7 = vld [vmem:[%s8170_s1 + $0x1f0] sm:$0xff]  ;;  %376 = vmatpush.msra.mxu0 %v336_v6  ;;  %vm1965_vm2 = vcmask 1045504   ;;  %vm1580_vm3 = vcmask 97280   ;;  %vm5179_vm5 = vcmask 1024  }
   0xd   : > { %436 = vmatpush.msra.mxu3 %v369_v1  ;;  %v333_v4 = vld [vmem:[%s8170_s1 + $0xd8] sm:$0xff]  ;;  %v334_v8 = vld [vmem:[%s8170_s1 + $0xe0] sm:$0xff]  ;;  %396 = vmatpush.msra.mxu1 %v368_v7  ;;  %v331_v10 = vld [vmem:[%s8170_s1 + $0xc8] sm:$0xff]  ;;  %s8312_s28 = smov (!%p6266_p3, %s5234_s28), 1 }
   0xe   : > { %v365_v5 = vld [vmem:[%s8170_s1 + $0x1d8] sm:$0xff]  ;;  %417 = vmatpush.msra.mxu2 %v335_v2  ;;  %v366_v9 = vld [vmem:[%s8170_s1 + $0x1e0] sm:$0xff]  ;;  %v363_v11 = vld [vmem:[%s8170_s1 + $0x1c8] sm:$0xff]  ;;  %377 = vmatpush.msra.mxu0 %v334_v8  ;;  %s6018_s30 = sshll.u32 %s8312_s28, 3  ;;  %s5241_s26 = sshll.u32 %s8312_s28, 1 }
   0xf   : > { %437 = vmatpush.msra.mxu3 %v367_v3  ;;  %v332_v12 = vld [vmem:[%s8170_s1 + $0xd0] sm:$0xff]  ;;  %397 = vmatpush.msra.mxu1 %v366_v9  ;;  %v329_v14 = vld [vmem:[%s8170_s1 + $0xb8] sm:$0xff]  ;;  %v330_v16 = vld [vmem:[%s8170_s1 + $0xc0] sm:$0xff]  ;;  %s299_s23 = scalar_lea.vmem %s8169_s0, %s6018_s30  ;;  %s303_s10 = scalar_lea.vmem %s8177_s8, %s5241_s26 }
  0x10   : > { %418 = vmatpush.msra.mxu2 %v333_v4  ;;  %v364_v13 = vld [vmem:[%s8170_s1 + $0x1d0] sm:$0xff]  ;;  %v361_v15 = vld [vmem:[%s8170_s1 + $0x1b8] sm:$0xff]  ;;  %v362_v17 = vld [vmem:[%s8170_s1 + $0x1c0] sm:$0xff]  ;;  %378 = vmatpush.msra.mxu0 %v332_v12 }
  0x11   : > { %438 = vmatpush.msra.mxu3 %v365_v5  ;;  %398 = vmatpush.msra.mxu1 %v364_v13  ;;  %v327_v18 = vld [vmem:[%s8170_s1 + $0xa8] sm:$0xff]  ;;  %v328_v20 = vld [vmem:[%s8170_s1 + $0xb0] sm:$0xff]  ;;  %v325_v22 = vld [vmem:[%s8170_s1 + $0x98] sm:$0xff] }
  0x12   : > { %419 = vmatpush.msra.mxu2 %v331_v10  ;;  %v359_v19 = vld [vmem:[%s8170_s1 + $0x1a8] sm:$0xff]  ;;  %v360_v21 = vld [vmem:[%s8170_s1 + $0x1b0] sm:$0xff]  ;;  %379 = vmatpush.msra.mxu0 %v330_v16  ;;  %v357_v23 = vld [vmem:[%s8170_s1 + $0x198] sm:$0xff] }
  0x13   : > { %439 = vmatpush.msra.mxu3 %v363_v11  ;;  %399 = vmatpush.msra.mxu1 %v362_v17  ;;  %v326_v24 = vld [vmem:[%s8170_s1 + $0xa0] sm:$0xff]  ;;  %v323_v26 = vld [vmem:[%s8170_s1 + $0x88] sm:$0xff]  ;;  %v324_v28 = vld [vmem:[%s8170_s1 + $0x90] sm:$0xff] }
  0x14   : > { %420 = vmatpush.msra.mxu2 %v329_v14  ;;  %v358_v25 = vld [vmem:[%s8170_s1 + $0x1a0] sm:$0xff]  ;;  %380 = vmatpush.msra.mxu0 %v328_v20  ;;  %v355_v27 = vld [vmem:[%s8170_s1 + $0x188] sm:$0xff]  ;;  %v356_v29 = vld [vmem:[%s8170_s1 + $0x190] sm:$0xff] }
  0x15   : > { %440 = vmatpush.msra.mxu3 %v361_v15  ;;  %400 = vmatpush.msra.mxu1 %v360_v21  ;;  %v321_v30 = vld [vmem:[%s8170_s1 + $0x78] sm:$0xff]  ;;  %v322_v32 = vld [vmem:[%s8170_s1 + $0x80] sm:$0xff]  ;;  %v319_v34 = vld [vmem:[%s8170_s1 + $0x68] sm:$0xff] }
  0x16   : > { %421 = vmatpush.msra.mxu2 %v327_v18  ;;  %381 = vmatpush.msra.mxu0 %v326_v24  ;;  %v353_v31 = vld [vmem:[%s8170_s1 + $0x178] sm:$0xff]  ;;  %v354_v33 = vld [vmem:[%s8170_s1 + $0x180] sm:$0xff]  ;;  %v351_v35 = vld [vmem:[%s8170_s1 + $0x168] sm:$0xff] }
  0x17   : > { %441 = vmatpush.msra.mxu3 %v359_v19  ;;  %401 = vmatpush.msra.mxu1 %v358_v25  ;;  %v320_v36 = vld [vmem:[%s8170_s1 + $0x70] sm:$0xff]  ;;  %v317_v38 = vld [vmem:[%s8170_s1 + $0x58] sm:$0xff]  ;;  %v318_v40 = vld [vmem:[%s8170_s1 + $0x60] sm:$0xff] }
  0x18   : > { %422 = vmatpush.msra.mxu2 %v325_v22  ;;  %382 = vmatpush.msra.mxu0 %v324_v28  ;;  %v352_v37 = vld [vmem:[%s8170_s1 + $0x170] sm:$0xff]  ;;  %v349_v39 = vld [vmem:[%s8170_s1 + $0x158] sm:$0xff]  ;;  %v350_v41 = vld [vmem:[%s8170_s1 + $0x160] sm:$0xff] }
  0x19   : > { %442 = vmatpush.msra.mxu3 %v357_v23  ;;  %402 = vmatpush.msra.mxu1 %v356_v29  ;;  %v305_v42 = vld [vmem:[%s299_s23] sm:$0x77]  ;;  %v315_v43 = vld [vmem:[%s8170_s1 + $0x48] sm:$0xff]  ;;  %v316_v45 = vld [vmem:[%s8170_s1 + $0x50] sm:$0xff] }
  0x1a   : > { %423 = vmatpush.msra.mxu2 %v323_v26  ;;  %383 = vmatpush.msra.mxu0 %v322_v32  ;;  %v347_v44 = vld [vmem:[%s8170_s1 + $0x148] sm:$0xff]  ;;  %371 = vst [vmem:[#allocation1] ss:$2 sm:$0xff] %v305_v42  ;;  %v348_v46 = vld [vmem:[%s8170_s1 + $0x150] sm:$0xff]  ;;  %v313_v47 = vld [vmem:[%s8170_s1 + $0x38] sm:$0xff] }
  0x1b   : > { %443 = vmatpush.msra.mxu3 %v355_v27  ;;  %403 = vmatpush.msra.mxu1 %v354_v33  ;;  %v345_v48 = vld [vmem:[%s8170_s1 + $0x138] sm:$0xff]  ;;  %v314_v49 = vld [vmem:[%s8170_s1 + $0x40] sm:$0xff]  ;;  %v311_v51 = vld [vmem:[%s8170_s1 + $0x28] sm:$0xff] }
  0x1c   : > { %424 = vmatpush.msra.mxu2 %v321_v30  ;;  %384 = vmatpush.msra.mxu0 %v320_v36  ;;  %v346_v50 = vld [vmem:[%s8170_s1 + $0x140] sm:$0xff]  ;;  %v343_v52 = vld [vmem:[%s8170_s1 + $0x128] sm:$0xff]  ;;  %v309_v53 = vld [vmem:[%s8170_s1 + $0x18] sm:$0xff] }
  0x1d   : > { %444 = vmatpush.msra.mxu3 %v353_v31  ;;  %404 = vmatpush.msra.mxu1 %v352_v37  ;;  %v312_v54 = vld [vmem:[%s8170_s1 + $0x30] sm:$0xff]  ;;  %v4813_v56 = vld [vmem:[%s8175_s6] sm:$0xff]  ;;  %v341_v57 = vld [vmem:[%s8170_s1 + $0x118] sm:$0xff] }
  0x1e   : > { %425 = vmatpush.msra.mxu2 %v319_v34  ;;  %385 = vmatpush.msra.mxu0 %v318_v40  ;;  %v344_v55 = vld [vmem:[%s8170_s1 + $0x130] sm:$0xff]  ;;  %v310_v58 = vld [vmem:[%s8170_s1 + $0x20] sm:$0xff]  ;;  %v307_v62 = vld [vmem:[%s8170_s1 + $0x8] sm:$0xff] }
  0x1f   : > { %445 = vmatpush.msra.mxu3 %v351_v35  ;;  %405 = vmatpush.msra.mxu1 %v350_v41  ;;  %v342_v59 = vld [vmem:[%s8170_s1 + $0x120] sm:$0xff]  ;;  %v339_v63 = vld [vmem:[%s8170_s1 + $0x108] sm:$0xff]  ;;  %v308_v0 = vld [vmem:[%s8170_s1 + $0x10] sm:$0xff] }
  0x20   : > { %426 = vmatpush.msra.mxu2 %v317_v38  ;;  %386 = vmatpush.msra.mxu0 %v316_v45  ;;  %v340_v1 = vld [vmem:[%s8170_s1 + $0x110] sm:$0xff]  ;;  %v306_v2 = vld [vmem:[%s8170_s1] sm:$0xff]  ;;  %v557_v32 = vld [vmem:[%s8171_s2 + $0xf8] sm:$0xff] }
  0x21   : > { %446 = vmatpush.msra.mxu3 %v349_v39  ;;  %406 = vmatpush.msra.mxu1 %v348_v46  ;;  %v372_v60 = vld.sshfl [vmem:[#allocation1] sm:$0xff pattern:$0x75316420]  ;;  %v373_v61 = vld.sshfl [vmem:[#allocation1 + $0x8] sm:$0xff pattern:$0x75316420] }
  0x22   : > { %427 = vmatpush.msra.mxu2 %v315_v43  ;;  %387 = vmatpush.msra.mxu0 %v314_v49  ;;  %4822 = vst [vmem:[#allocation1] ss:$4 sm:$0xff] %v4813_v56  ;;  %v338_v3 = vld [vmem:[%s8170_s1 + $0x100] sm:$0xff]  ;;  %v556_v4 = vld [vmem:[%s8171_s2 + $0xf0] sm:$0xff]  ;;  %v589_v35 = vld [vmem:[%s8171_s2 + $0x1f8] sm:$0xff] }
  0x23   : > { %447 = vmatpush.msra.mxu3 %v347_v44  ;;  %407 = vmatpush.msra.mxu1 %v346_v50  ;;  %v588_v5 = vld [vmem:[%s8171_s2 + $0x1f0] sm:$0xff]  ;;  %v554_v6 = vld [vmem:[%s8171_s2 + $0xe0] sm:$0xff]  ;;  %v555_v36 = vld [vmem:[%s8171_s2 + $0xe8] sm:$0xff] }
  0x24   : > { %428 = vmatpush.msra.mxu2 %v313_v47  ;;  %388 = vmatpush.msra.mxu0 %v312_v54  ;;  %v586_v7 = vld [vmem:[%s8171_s2 + $0x1e0] sm:$0xff]  ;;  %v552_v8 = vld [vmem:[%s8171_s2 + $0xd0] sm:$0xff]  ;;  %v587_v39 = vld [vmem:[%s8171_s2 + $0x1e8] sm:$0xff] }
  0x25   : > { %448 = vmatpush.msra.mxu3 %v345_v48  ;;  %408 = vmatpush.msra.mxu1 %v344_v55  ;;  %v584_v9 = vld [vmem:[%s8171_s2 + $0x1d0] sm:$0xff]  ;;  %v550_v10 = vld [vmem:[%s8171_s2 + $0xc0] sm:$0xff]  ;;  %v553_v40 = vld [vmem:[%s8171_s2 + $0xd8] sm:$0xff] }
  0x26   : > { %429 = vmatpush.msra.mxu2 %v311_v51  ;;  %389 = vmatpush.msra.mxu0 %v310_v58  ;;  %v582_v11 = vld [vmem:[%s8171_s2 + $0x1c0] sm:$0xff]  ;;  %v548_v12 = vld [vmem:[%s8171_s2 + $0xb0] sm:$0xff]  ;;  %v585_v43 = vld [vmem:[%s8171_s2 + $0x1d8] sm:$0xff] }
  0x27   : > { %449 = vmatpush.msra.mxu3 %v343_v52  ;;  %409 = vmatpush.msra.mxu1 %v342_v59  ;;  %v580_v13 = vld [vmem:[%s8171_s2 + $0x1b0] sm:$0xff]  ;;  %v546_v14 = vld [vmem:[%s8171_s2 + $0xa0] sm:$0xff]  ;;  %v551_v44 = vld [vmem:[%s8171_s2 + $0xc8] sm:$0xff] }
  0x28   : > { %430 = vmatpush.msra.mxu2 %v309_v53  ;;  %390 = vmatpush.msra.mxu0 %v308_v0  ;;  %v578_v15 = vld [vmem:[%s8171_s2 + $0x1a0] sm:$0xff]  ;;  %v544_v16 = vld [vmem:[%s8171_s2 + $0x90] sm:$0xff]  ;;  %v457_v45 = vld [vmem:[%s8172_s3 + $0x8] sm:$0xf] }
  0x29   : > { %450 = vmatpush.msra.mxu3 %v341_v57  ;;  %410 = vmatpush.msra.mxu1 %v340_v1  ;;  %v576_v17 = vld [vmem:[%s8171_s2 + $0x190] sm:$0xff]  ;;  %v542_v18 = vld [vmem:[%s8171_s2 + $0x80] sm:$0xff]  ;;  %v583_v47 = vld [vmem:[%s8171_s2 + $0x1c8] sm:$0xff] }
  0x2a   : > { %431 = vmatpush.msra.mxu2 %v307_v62  ;;  %391 = vmatpush.msra.mxu0 %v306_v2  ;;  %v574_v19 = vld [vmem:[%s8171_s2 + $0x180] sm:$0xff]  ;;  %v540_v20 = vld [vmem:[%s8171_s2 + $0x70] sm:$0xff]  ;;  %v549_v48 = vld [vmem:[%s8171_s2 + $0xb8] sm:$0xff] }
  0x2b   : > { %451 = vmatpush.msra.mxu3 %v339_v63  ;;  %432 = vmatmul.f32.vlgmr.msra.gmra.mxu2 %v372_v60  ;;  %v572_v21 = vld [vmem:[%s8171_s2 + $0x170] sm:$0xff]  ;;  %v538_v22 = vld [vmem:[%s8171_s2 + $0x60] sm:$0xff]  ;;  %v581_v49 = vld [vmem:[%s8171_s2 + $0x1b8] sm:$0xff] }
  0x2c   : > { %452 = vmatmul.f32.vlgmr.msra.gmra.mxu3 %v373_v61  ;;  %411 = vmatpush.msra.mxu1 %v338_v3  ;;  %v570_v23 = vld [vmem:[%s8171_s2 + $0x160] sm:$0xff]  ;;  %v536_v26 = vld [vmem:[%s8171_s2 + $0x50] sm:$0xff]  ;;  %v547_v50 = vld [vmem:[%s8171_s2 + $0xa8] sm:$0xff] }
  0x2d   : > { %392 = vmatmul.f32.vlgmr.msra.gmra.mxu0 %v372_v60  ;;  %412 = vmatmul.f32.vlgmr.msra.gmra.mxu1 %v373_v61  ;;  %v456_v28 = vld [vmem:[%s8172_s3] sm:$0xff]  ;;  %v568_v29 = vld [vmem:[%s8171_s2 + $0x150] sm:$0xff]  ;;  %v579_v51 = vld [vmem:[%s8171_s2 + $0x1a8] sm:$0xff] }
  0x2e   : > { %590 = vmatpush.msrb.mxu2 %v556_v4  ;;  %613 = vmatpush.msrb.mxu3 %v588_v5  ;;  %v534_v34 = vld [vmem:[%s8171_s2 + $0x40] sm:$0xff]  ;;  %v532_v38 = vld [vmem:[%s8171_s2 + $0x30] sm:$0xff]  ;;  %v545_v52 = vld [vmem:[%s8171_s2 + $0x98] sm:$0xff] }
  0x2f   : > { %v566_v37 = vld [vmem:[%s8171_s2 + $0x140] sm:$0xff]  ;;  %v564_v41 = vld [vmem:[%s8171_s2 + $0x130] sm:$0xff]  ;;  %v577_v53 = vld [vmem:[%s8171_s2 + $0x198] sm:$0xff] }
  0x30   : > { %591 = vmatpush.msrb.mxu2 %v554_v6  ;;  %614 = vmatpush.msrb.mxu3 %v586_v7  ;;  %v530_v42 = vld [vmem:[%s8171_s2 + $0x20] sm:$0xff]  ;;  %v543_v54 = vld [vmem:[%s8171_s2 + $0x88] sm:$0xff]  ;;  %v541_v56 = vld [vmem:[%s8171_s2 + $0x78] sm:$0xff] }
  0x31   : > { %v562_v46 = vld [vmem:[%s8171_s2 + $0x120] sm:$0xff]  ;;  %v575_v55 = vld [vmem:[%s8171_s2 + $0x188] sm:$0xff]  ;;  %v573_v57 = vld [vmem:[%s8171_s2 + $0x178] sm:$0xff] }
  0x32   : > { %592 = vmatpush.msrb.mxu2 %v552_v8  ;;  %615 = vmatpush.msrb.mxu3 %v584_v9  ;;  %v539_v58 = vld [vmem:[%s8171_s2 + $0x68] sm:$0xff]  ;;  %v537_v60 = vld [vmem:[%s8171_s2 + $0x58] sm:$0xff]  ;;  %v528_v4 = vld [vmem:[%s8171_s2 + $0x10] sm:$0xff] }
  0x33   : > { %v571_v59 = vld [vmem:[%s8171_s2 + $0x168] sm:$0xff]  ;;  %v569_v61 = vld [vmem:[%s8171_s2 + $0x158] sm:$0xff]  ;;  %v560_v5 = vld [vmem:[%s8171_s2 + $0x110] sm:$0xff] }
  0x34   : > { %593 = vmatpush.msrb.mxu2 %v550_v10  ;;  %616 = vmatpush.msrb.mxu3 %v582_v11  ;;  %v535_v62 = vld [vmem:[%s8171_s2 + $0x48] sm:$0xff]  ;;  %v533_v0 = vld [vmem:[%s8171_s2 + $0x38] sm:$0xff]  ;;  %v526_v8 = vld [vmem:[%s8171_s2] sm:$0xff] }
  0x35   : > { %v567_v63 = vld [vmem:[%s8171_s2 + $0x148] sm:$0xff]  ;;  %v565_v1 = vld [vmem:[%s8171_s2 + $0x138] sm:$0xff]  ;;  %v558_v9 = vld [vmem:[%s8171_s2 + $0x100] sm:$0xff] }
  0x36   : > { %594 = vmatpush.msrb.mxu2 %v548_v12  ;;  %617 = vmatpush.msrb.mxu3 %v580_v13  ;;  %v531_v2 = vld [vmem:[%s8171_s2 + $0x28] sm:$0xff]  ;;  %v529_v6 = vld [vmem:[%s8171_s2 + $0x18] sm:$0xff]  ;;  %v518_v12 = vld [vmem:[%s8173_s4] sm:$0xff] }
  0x37   : > { %v563_v3 = vld [vmem:[%s8171_s2 + $0x128] sm:$0xff]  ;;  %v561_v7 = vld [vmem:[%s8171_s2 + $0x118] sm:$0xff] }
  0x38   : > { %595 = vmatpush.msrb.mxu2 %v546_v14  ;;  %618 = vmatpush.msrb.mxu3 %v578_v15  ;;  %v527_v10 = vld [vmem:[%s8171_s2 + $0x8] sm:$0xff] }
  0x39   : > { %v559_v11 = vld [vmem:[%s8171_s2 + $0x108] sm:$0xff] }
  0x3a   : > { %596 = vmatpush.msrb.mxu2 %v544_v16  ;;  %619 = vmatpush.msrb.mxu3 %v576_v17  ;;  %v519_v14 = vld [vmem:[%s8173_s4 + $0x8] sm:$0xff] }
  0x3c   : > { %597 = vmatpush.msrb.mxu2 %v542_v18  ;;  %620 = vmatpush.msrb.mxu3 %v574_v19  ;;  %v520_v18 = vld [vmem:[%s8173_s4 + $0x10] sm:$0xf] }
  0x3e   : > { %598 = vmatpush.msrb.mxu2 %v540_v20  ;;  %621 = vmatpush.msrb.mxu3 %v572_v21  ;;  %v521_v20 = vld [vmem:[%s8173_s4 + $0x18] sm:$0xf] }
  0x40   : > { %599 = vmatpush.msrb.mxu2 %v538_v22  ;;  %622 = vmatpush.msrb.mxu3 %v570_v23 }
  0x42   : > { %600 = vmatpush.msrb.mxu2 %v536_v26  ;;  %623 = vmatpush.msrb.mxu3 %v568_v29 }
  0x44   : > { %601 = vmatpush.msrb.mxu2 %v534_v34  ;;  %624 = vmatpush.msrb.mxu3 %v566_v37 }
  0x46   : > { %602 = vmatpush.msrb.mxu2 %v532_v38  ;;  %625 = vmatpush.msrb.mxu3 %v564_v41 }
  0x48   : > { %603 = vmatpush.msrb.mxu2 %v530_v42  ;;  %626 = vmatpush.msrb.mxu3 %v562_v46  ;;  %v6076_v42 = vld [vmem:[%s8174_s5 + $0x1c8] sm:$0xff]  ;;  %v6078_v46 = vld [vmem:[%s8174_s5 + $0x1d8] sm:$0xff] }
  0x4a   : > { %604 = vmatpush.msrb.mxu2 %v528_v4  ;;  %627 = vmatpush.msrb.mxu3 %v560_v5 }
  0x4c   : > { %605 = vmatpush.msrb.mxu2 %v526_v8  ;;  %628 = vmatpush.msrb.mxu3 %v558_v9  ;;  %v6084_v9 = vld [vmem:[%s8174_s5 + $0x208] sm:$0xff] }
  0xaa   : > { %v393_v24 = vpop.f32.mrf.mxu0  ;;  %v413_v25 = vpop.f32.mrf.mxu1 }
  0xab   : > { %v414_v27 = vadd.f32 %v413_v25, %v393_v24 }
  0xad   : > { %5242 = vmatpush.msk.msrb.mxu0 %vm465_vm0, %v414_v27 }
  0xae   : > { %v433_v30 = vpop.f32.mrf.mxu2  ;;  %5243 = vmatmul.msk.f32.vlgmr.msrb.gmra.mxu0 %vm458_vm1, %v456_v28 }
  0xaf   : > { %v453_v31 = vpop.f32.mrf.mxu3  ;;  %636 = vmatpush.msra.mxu0 %v557_v32 }
  0xb0   : > { %v454_v33 = vadd.f32 %v453_v31, %v433_v30 }
  0xb1   : > { %637 = vmatpush.msra.mxu0 %v555_v36  ;;  %v6019_v36 = vld [vmem:[%s8174_s5] sm:$0xff] }
  0xb2   : > { %5245 = vmatpush.msk.msrb.mxu1 %vm465_vm0, %v454_v33 }
  0xb3   : > { %5246 = vmatmul.msk.f32.vlgmr.msrb.gmra.mxu1 %vm458_vm1, %v456_v28  ;;  %638 = vmatpush.msra.mxu0 %v553_v40 }
  0xb4   : > { %659 = vmatpush.msra.mxu1 %v589_v35  ;;  %v6075_v35 = vld [vmem:[%s8174_s5 + $0x1c0] sm:$0xff] }
  0xb5   : > { %639 = vmatpush.msra.mxu0 %v551_v44  ;;  %v6077_v44 = vld [vmem:[%s8174_s5 + $0x1d0] sm:$0xff] }
  0xb6   : > { %660 = vmatpush.msra.mxu1 %v587_v39  ;;  %5244 = vmatmul.msk.f32.gmra.mxu0 %vm458_vm1, %v457_v45 }
  0xb7   : > { %640 = vmatpush.msra.mxu0 %v549_v48  ;;  %v6079_v48 = vld [vmem:[%s8174_s5 + $0x1e0] sm:$0xff] }
  0xb8   : > { %661 = vmatpush.msra.mxu1 %v585_v43  ;;  %v6020_v43 = vld [vmem:[%s8174_s5 + $0x8] sm:$0xff] }
  0xb9   : > { %641 = vmatpush.msra.mxu0 %v547_v50  ;;  %v6080_v50 = vld [vmem:[%s8174_s5 + $0x1e8] sm:$0xff] }
  0xba   : > { %662 = vmatpush.msra.mxu1 %v583_v47  ;;  %v6022_v47 = vld [vmem:[%s8174_s5 + $0x18] sm:$0xff] }
  0xbb   : > { %5247 = vmatmul.msk.f32.gmra.mxu1 %vm458_vm1, %v457_v45  ;;  %642 = vmatpush.msra.mxu0 %v545_v52  ;;  %v6021_v45 = vld [vmem:[%s8174_s5 + $0x10] sm:$0xff] }
  0xbc   : > { %663 = vmatpush.msra.mxu1 %v581_v49  ;;  %v6023_v49 = vld [vmem:[%s8174_s5 + $0x20] sm:$0xff]  ;;  %v6081_v52 = vld [vmem:[%s8174_s5 + $0x1f0] sm:$0xff] }
  0xbd   : > { %643 = vmatpush.msra.mxu0 %v543_v54  ;;  %v6082_v54 = vld [vmem:[%s8174_s5 + $0x1f8] sm:$0xff] }
  0xbe   : > { %664 = vmatpush.msra.mxu1 %v579_v51  ;;  %v6024_v51 = vld [vmem:[%s8174_s5 + $0x28] sm:$0xff] }
  0xbf   : > { %644 = vmatpush.msra.mxu0 %v541_v56  ;;  %v6083_v56 = vld [vmem:[%s8174_s5 + $0x200] sm:$0xff] }
  0xc0   : > { %665 = vmatpush.msra.mxu1 %v577_v53  ;;  %v6025_v53 = vld [vmem:[%s8174_s5 + $0x30] sm:$0xff] }
  0xc1   : > { %645 = vmatpush.msra.mxu0 %v539_v58 }
  0xc2   : > { %666 = vmatpush.msra.mxu1 %v575_v55  ;;  %v6026_v55 = vld [vmem:[%s8174_s5 + $0x38] sm:$0xff] }
  0xc3   : > { %646 = vmatpush.msra.mxu0 %v537_v60 }
  0xc4   : > { %667 = vmatpush.msra.mxu1 %v573_v57  ;;  %v6027_v57 = vld [vmem:[%s8174_s5 + $0x40] sm:$0xff] }
  0xc5   : > { %647 = vmatpush.msra.mxu0 %v535_v62 }
  0xc6   : > { %668 = vmatpush.msra.mxu1 %v571_v59 }
  0xc7   : > { %648 = vmatpush.msra.mxu0 %v533_v0 }
  0xc8   : > { %669 = vmatpush.msra.mxu1 %v569_v61 }
  0xc9   : > { %649 = vmatpush.msra.mxu0 %v531_v2 }
  0xca   : > { %670 = vmatpush.msra.mxu1 %v567_v63 }
  0xcb   : > { %650 = vmatpush.msra.mxu0 %v529_v6 }
  0xcc   : > { %671 = vmatpush.msra.mxu1 %v565_v1 }
  0xcd   : > { %651 = vmatpush.msra.mxu0 %v527_v10 }
  0xce   : > { %672 = vmatpush.msra.mxu1 %v563_v3 }
  0xd0   : > { %673 = vmatpush.msra.mxu1 %v561_v7 }
  0xd2   : > { %674 = vmatpush.msra.mxu1 %v559_v11  ;;  %v6028_v11 = vld [vmem:[%s8174_s5 + $0x48] sm:$0xff] }
 0x12b   : > { %v489_v13 = vpop.f32.mrf.mxu0 }
 0x12c   : > { %v522_v15 = vmul.f32 %v518_v12, %v489_v13 }
 0x12e   : > { %606 = vmatmul.f32.vlgmr.msrb.gmra.mxu2 %v522_v15  ;;  %652 = vmatmul.f32.vlgmr.msra.gmra.mxu0 %v522_v15 }
 0x130   : > { %v512_v16 = vpop.f32.mrf.mxu1 }
 0x131   : > { %v523_v17 = vmul.f32 %v519_v14, %v512_v16 }
 0x133   : > { %629 = vmatmul.f32.vlgmr.msrb.gmra.mxu3 %v523_v17  ;;  %675 = vmatmul.f32.vlgmr.msra.gmra.mxu1 %v523_v17  ;;  %v492_v19 = vpop.f32.mrf.mxu0 }
 0x134   : > { %v524_v21 = vmul.f32 %v520_v18, %v492_v19 }
 0x136   : > { %609 = vmatmul.f32.gmra.mxu2 %v524_v21  ;;  %655 = vmatmul.f32.gmra.mxu0 %v524_v21 }
 0x138   : > { %v515_v22 = vpop.f32.mrf.mxu1 }
 0x139   : > { %v525_v23 = vmul.f32 %v521_v20, %v515_v22 }
 0x13b   : > { %632 = vmatmul.f32.gmra.mxu3 %v525_v23  ;;  %678 = vmatmul.f32.gmra.mxu1 %v525_v23 }
 0x1ab   : > { %v653_v24 = vpop.f32.mrf.mxu0 }
 0x1b0   : > { %v676_v25 = vpop.f32.mrf.mxu1 }
 0x1b1   : > { %v607_v26 = vpop.f32.mrf.mxu2  ;;  %v677_v30 = vadd.f32 %v676_v25, %v653_v24 }
 0x1b3   : > { %v656_v28 = vpop.f32.mrf.mxu0 }
 0x1b6   : > { %v630_v27 = vpop.f32.mrf.mxu3 }
 0x1b7   : > { %v631_v38 = vadd.f32 %v630_v27, %v607_v26 }
 0x1b8   : > { %v679_v29 = vpop.f32.mrf.mxu1 }
 0x1b9   : > { %v680_v31 = vadd.f32 %v679_v29, %v656_v28  ;;  %v610_v33 = vpop.f32.mrf.mxu2 }
 0x1bb   : > { %v939_v32 = vpack.c.bf16 %v680_v31, %v677_v30  ;;  %v6085_v31 = vld [vmem:[%s8174_s5 + $0x210] sm:$0xff] }
 0x1bd   : > { %v1970_v34 = vsel %vm1965_vm2, %v939_v32, 0 }
 0x1be   : > { %v633_v37 = vpop.f32.mrf.mxu3  ;;  %2628 = vmatpush.bf16.msrb.mxu1 %v1970_v34  ;;  %6148 = vmatpush.bf16.msra.mxu3 %v1970_v34 }
 0x1bf   : > { %v634_v39 = vadd.f32 %v633_v37, %v610_v33  ;;  %v6029_v33 = vld [vmem:[%s8174_s5 + $0x50] sm:$0xff] }
 0x1c1   : > { %v938_v40 = vpack.c.bf16 %v634_v39, %v631_v38  ;;  %5944 = vmatmul.msk.bf16.vlgmr.msra.gmra.mxu3 %vm1580_vm3, %v6075_v35  ;;  %5888 = vmatmul.msk.bf16.vlgmr.msrb.gmra.mxu1 %vm1580_vm3, %v6019_v36 }
 0x1c3   : > { %v1967_v41 = vsel %vm1965_vm2, %v938_v40, 0 }
 0x1c4   : > { %1979 = vmatpush.bf16.msrb.mxu0 %v1967_v41  ;;  %6147 = vmatpush.bf16.msra.mxu2 %v1967_v41 }
 0x1c7   : > { %5760 = vmatmul.msk.bf16.vlgmr.msrb.gmra.mxu0 %vm1580_vm3, %v6019_v36  ;;  %5816 = vmatmul.msk.bf16.vlgmr.msra.gmra.mxu2 %vm1580_vm3, %v6075_v35 }
 0x1d1   : > { %5945 = vmatmul.msk.bf16.gmra.mxu3 %vm1580_vm3, %v6076_v42  ;;  %5889 = vmatmul.msk.bf16.gmra.mxu1 %vm1580_vm3, %v6020_v43 }
 0x1d7   : > { %5761 = vmatmul.msk.bf16.gmra.mxu0 %vm1580_vm3, %v6020_v43  ;;  %5817 = vmatmul.msk.bf16.gmra.mxu2 %vm1580_vm3, %v6076_v42 }
 0x1e1   : > { %5946 = vmatmul.msk.bf16.gmra.mxu3 %vm1580_vm3, %v6077_v44  ;;  %5890 = vmatmul.msk.bf16.gmra.mxu1 %vm1580_vm3, %v6021_v45 }
 0x1e7   : > { %5762 = vmatmul.msk.bf16.gmra.mxu0 %vm1580_vm3, %v6021_v45  ;;  %5818 = vmatmul.msk.bf16.gmra.mxu2 %vm1580_vm3, %v6077_v44 }
 0x1f1   : > { %5947 = vmatmul.msk.bf16.gmra.mxu3 %vm1580_vm3, %v6078_v46  ;;  %5891 = vmatmul.msk.bf16.gmra.mxu1 %vm1580_vm3, %v6022_v47 }
 0x1f7   : > { %5763 = vmatmul.msk.bf16.gmra.mxu0 %vm1580_vm3, %v6022_v47  ;;  %5819 = vmatmul.msk.bf16.gmra.mxu2 %vm1580_vm3, %v6078_v46 }
 0x201   : > { %5948 = vmatmul.msk.bf16.gmra.mxu3 %vm1580_vm3, %v6079_v48  ;;  %5892 = vmatmul.msk.bf16.gmra.mxu1 %vm1580_vm3, %v6023_v49 }
 0x207   : > { %5764 = vmatmul.msk.bf16.gmra.mxu0 %vm1580_vm3, %v6023_v49  ;;  %5820 = vmatmul.msk.bf16.gmra.mxu2 %vm1580_vm3, %v6079_v48 }
 0x211   : > { %5949 = vmatmul.msk.bf16.gmra.mxu3 %vm1580_vm3, %v6080_v50  ;;  %5893 = vmatmul.msk.bf16.gmra.mxu1 %vm1580_vm3, %v6024_v51 }
 0x217   : > { %5765 = vmatmul.msk.bf16.gmra.mxu0 %vm1580_vm3, %v6024_v51  ;;  %5821 = vmatmul.msk.bf16.gmra.mxu2 %vm1580_vm3, %v6080_v50  ;;  %v6086_v50 = vld [vmem:[%s8174_s5 + $0x218] sm:$0xff] }
 0x221   : > { %5950 = vmatmul.msk.bf16.gmra.mxu3 %vm1580_vm3, %v6081_v52  ;;  %5894 = vmatmul.msk.bf16.gmra.mxu1 %vm1580_vm3, %v6025_v53 }
 0x227   : > { %5766 = vmatmul.msk.bf16.gmra.mxu0 %vm1580_vm3, %v6025_v53  ;;  %5822 = vmatmul.msk.bf16.gmra.mxu2 %vm1580_vm3, %v6081_v52  ;;  %v6030_v52 = vld [vmem:[%s8174_s5 + $0x58] sm:$0xff] }
 0x231   : > { %5951 = vmatmul.msk.bf16.gmra.mxu3 %vm1580_vm3, %v6082_v54  ;;  %5895 = vmatmul.msk.bf16.gmra.mxu1 %vm1580_vm3, %v6026_v55 }
 0x237   : > { %5767 = vmatmul.msk.bf16.gmra.mxu0 %vm1580_vm3, %v6026_v55  ;;  %5823 = vmatmul.msk.bf16.gmra.mxu2 %vm1580_vm3, %v6082_v54 }
 0x23e   : > { %v2630_v58 = vpop.f32.mrf.mxu1 }
 0x23f   : > { %v3271_v59 = vmax.f32 %v2630_v58, 0.0 }
 0x241   : > { %5952 = vmatmul.msk.bf16.gmra.mxu3 %vm1580_vm3, %v6083_v56  ;;  %5896 = vmatmul.msk.bf16.gmra.mxu1 %vm1580_vm3, %v6027_v57 }
 0x244   : > { %v1981_v60 = vpop.f32.mrf.mxu0  ;;  %v2910_v61 = vpop.f32.mrf.mxu3 }
 0x245   : > { %v3270_v62 = vmax.f32 %v1981_v60, 0.0  ;;  %v3495_v1 = vmax.f32 %v2910_v61, 0.0 }
 0x246   : > { %v2632_v63 = vpop.f32.mrf.mxu1 }
 0x247   : > { %5768 = vmatmul.msk.bf16.gmra.mxu0 %vm1580_vm3, %v6027_v57  ;;  %5824 = vmatmul.msk.bf16.gmra.mxu2 %vm1580_vm3, %v6083_v56  ;;  %v3782_v0 = vadd.f32 %v3271_v59, %v3270_v62  ;;  %v3273_v4 = vmax.f32 %v2632_v63, 0.0 }
 0x249   : > { %3783 = vadd.xlane.f32.xlu0 %v3782_v0 }
 0x24a   : > { %v2261_v2 = vpop.f32.mrf.mxu2 }
 0x24b   : > { %v3494_v3 = vmax.f32 %v2261_v2, 0.0 }
 0x24c   : > { %v1983_v5 = vpop.f32.mrf.mxu0  ;;  %v2912_v6 = vpop.f32.mrf.mxu3 }
 0x24d   : > { %v3272_v7 = vmax.f32 %v1983_v5, 0.0  ;;  %v4118_v8 = vadd.f32 %v3495_v1, %v3494_v3  ;;  %v3497_v14 = vmax.f32 %v2912_v6, 0.0 }
 0x24e   : > { %v2635_v10 = vpop.f32.mrf.mxu1 }
 0x24f   : > { %4119 = vadd.xlane.f32.xlu1 %v4118_v8  ;;  %v3785_v12 = vadd.f32 %v3273_v4, %v3272_v7  ;;  %v3275_v16 = vmax.f32 %v2635_v10, 0.0 }
 0x251   : > { %5953 = vmatmul.msk.bf16.gmra.mxu3 %vm1580_vm3, %v6084_v9  ;;  %3786 = vadd.xlane.f32.xlu0 %v3785_v12 }
 0x252   : > { %v2263_v13 = vpop.f32.mrf.mxu2  ;;  %5897 = vmatmul.msk.bf16.gmra.mxu1 %vm1580_vm3, %v6028_v11 }
 0x253   : > { %v3496_v15 = vmax.f32 %v2263_v13, 0.0 }
 0x254   : > { %v1986_v17 = vpop.f32.mrf.mxu0  ;;  %v2915_v18 = vpop.f32.mrf.mxu3 }
 0x255   : > { %v3274_v19 = vmax.f32 %v1986_v17, 0.0  ;;  %v4121_v20 = vadd.f32 %v3497_v14, %v3496_v15  ;;  %v3499_v23 = vmax.f32 %v2915_v18, 0.0 }
 0x256   : > { %v2637_v21 = vpop.f32.mrf.mxu1 }
 0x257   : > { %5825 = vmatmul.msk.bf16.gmra.mxu2 %vm1580_vm3, %v6084_v9  ;;  %4122 = vadd.xlane.f32.xlu2 %v4121_v20  ;;  %v3788_v22 = vadd.f32 %v3275_v16, %v3274_v19  ;;  %v3277_v26 = vmax.f32 %v2637_v21, 0.0  ;;  %v6087_v9 = vld [vmem:[%s8174_s5 + $0x220] sm:$0xff] }
 0x258   : > { %5769 = vmatmul.msk.bf16.gmra.mxu0 %vm1580_vm3, %v6028_v11  ;;  %v6031_v11 = vld [vmem:[%s8174_s5 + $0x60] sm:$0xff] }
 0x259   : > { %3789 = vadd.xlane.f32.xlu1 %v3788_v22 }
 0x25a   : > { %v2266_v24 = vpop.f32.mrf.mxu2 }
 0x25b   : > { %v3498_v25 = vmax.f32 %v2266_v24, 0.0 }
 0x25c   : > { %v1988_v27 = vpop.f32.mrf.mxu0  ;;  %v2917_v28 = vpop.f32.mrf.mxu3 }
 0x25d   : > { %v3276_v29 = vmax.f32 %v1988_v27, 0.0  ;;  %v4124_v30 = vadd.f32 %v3499_v23, %v3498_v25  ;;  %v3501_v40 = vmax.f32 %v2917_v28, 0.0 }
 0x25e   : > { %v2640_v32 = vpop.f32.mrf.mxu1 }
 0x25f   : > { %4125 = vadd.xlane.f32.xlu0 %v4124_v30  ;;  %v3791_v34 = vadd.f32 %v3277_v26, %v3276_v29  ;;  %v3279_v37 = vmax.f32 %v2640_v32, 0.0 }
 0x261   : > { %5954 = vmatmul.msk.bf16.gmra.mxu3 %vm1580_vm3, %v6085_v31  ;;  %3792 = vadd.xlane.f32.xlu1 %v3791_v34 }
 0x262   : > { %v2268_v35 = vpop.f32.mrf.mxu2  ;;  %5898 = vmatmul.msk.bf16.gmra.mxu1 %vm1580_vm3, %v6029_v33 }
 0x263   : > { %v3500_v36 = vmax.f32 %v2268_v35, 0.0 }
 0x264   : > { %v1991_v38 = vpop.f32.mrf.mxu0  ;;  %v2920_v39 = vpop.f32.mrf.mxu3 }
 0x265   : > { %v3278_v41 = vmax.f32 %v1991_v38, 0.0  ;;  %v4127_v43 = vadd.f32 %v3501_v40, %v3500_v36  ;;  %v3503_v46 = vmax.f32 %v2920_v39, 0.0 }
 0x266   : > { %v2642_v42 = vpop.f32.mrf.mxu1 }
 0x267   : > { %5826 = vmatmul.msk.bf16.gmra.mxu2 %vm1580_vm3, %v6085_v31  ;;  %v3794_v44 = vadd.f32 %v3279_v37, %v3278_v41  ;;  %v3281_v54 = vmax.f32 %v2642_v42, 0.0  ;;  %v6088_v31 = vld [vmem:[%s8174_s5 + $0x228] sm:$0xff] }
 0x268   : > { %5770 = vmatmul.msk.bf16.gmra.mxu0 %vm1580_vm3, %v6029_v33  ;;  %v6032_v33 = vld [vmem:[%s8174_s5 + $0x68] sm:$0xff] }
 0x269   : > { %4128 = vadd.xlane.f32.xlu1 %v4127_v43  ;;  %3795 = vadd.xlane.f32.xlu2 %v3794_v44 }
 0x26a   : > { %v2271_v45 = vpop.f32.mrf.mxu2 }
 0x26b   : > { %v3502_v47 = vmax.f32 %v2271_v45, 0.0 }
 0x26c   : > { %v1993_v48 = vpop.f32.mrf.mxu0  ;;  %v2922_v49 = vpop.f32.mrf.mxu3 }
 0x26d   : > { %v4130_v53 = vadd.f32 %v3503_v46, %v3502_v47  ;;  %v3280_v55 = vmax.f32 %v1993_v48, 0.0  ;;  %v3505_v57 = vmax.f32 %v2922_v49, 0.0 }
 0x26e   : > { %v2645_v51 = vpop.f32.mrf.mxu1 }
 0x26f   : > { %v3797_v62 = vadd.f32 %v3281_v54, %v3280_v55  ;;  %v3283_v0 = vmax.f32 %v2645_v51, 0.0  ;;  %v6033_v55 = vld [vmem:[%s8174_s5 + $0x70] sm:$0xff] }
 0x271   : > { %5955 = vmatmul.msk.bf16.gmra.mxu3 %vm1580_vm3, %v6086_v50  ;;  %4131 = vadd.xlane.f32.xlu2 %v4130_v53  ;;  %v6089_v53 = vld [vmem:[%s8174_s5 + $0x230] sm:$0xff] }
 0x272   : > { %v2273_v56 = vpop.f32.mrf.mxu2  ;;  %5899 = vmatmul.msk.bf16.gmra.mxu1 %vm1580_vm3, %v6030_v52 }
 0x273   : > { %v3504_v58 = vmax.f32 %v2273_v56, 0.0 }
 0x274   : > { %v1996_v59 = vpop.f32.mrf.mxu0  ;;  %v2925_v60 = vpop.f32.mrf.mxu3 }
 0x275   : > { %v4133_v61 = vadd.f32 %v3505_v57, %v3504_v58  ;;  %v3282_v1 = vmax.f32 %v1996_v59, 0.0  ;;  %v3507_v2 = vmax.f32 %v2925_v60, 0.0 }
 0x276   : > { %v2647_v63 = vpop.f32.mrf.mxu1 }
 0x277   : > { %5827 = vmatmul.msk.bf16.gmra.mxu2 %vm1580_vm3, %v6086_v50  ;;  %4134 = vadd.xlane.f32.xlu0 %v4133_v61  ;;  %v3800_v5 = vadd.f32 %v3283_v0, %v3282_v1  ;;  %v3285_v12 = vmax.f32 %v2647_v63, 0.0 }
 0x278   : > { %5771 = vmatmul.msk.bf16.gmra.mxu0 %vm1580_vm3, %v6030_v52 }
 0x279   : > { %3798 = vadd.xlane.f32.xlu2 %v3797_v62 }
 0x27a   : > { %v2276_v3 = vpop.f32.mrf.mxu2 }
 0x27b   : > { %v3506_v4 = vmax.f32 %v2276_v3, 0.0 }
 0x27c   : > { %v1998_v6 = vpop.f32.mrf.mxu0  ;;  %v2927_v7 = vpop.f32.mrf.mxu3 }
 0x27d   : > { %v4136_v8 = vadd.f32 %v3507_v2, %v3506_v4  ;;  %v3284_v13 = vmax.f32 %v1998_v6, 0.0  ;;  %v3509_v15 = vmax.f32 %v2927_v7, 0.0 }
 0x27e   : > { %v2650_v10 = vpop.f32.mrf.mxu1 }
 0x27f   : > { %4137 = vadd.xlane.f32.xlu1 %v4136_v8  ;;  %3801 = vadd.xlane.f32.xlu0 %v3800_v5  ;;  %v3803_v19 = vadd.f32 %v3285_v12, %v3284_v13  ;;  %v3287_v22 = vmax.f32 %v2650_v10, 0.0  ;;  %v6034_v13 = vld [vmem:[%s8174_s5 + $0x78] sm:$0xff] }
 0x281   : > { %5956 = vmatmul.msk.bf16.gmra.mxu3 %vm1580_vm3, %v6087_v9 }
 0x282   : > { %v2278_v14 = vpop.f32.mrf.mxu2  ;;  %5900 = vmatmul.msk.bf16.gmra.mxu1 %vm1580_vm3, %v6031_v11 }
 0x283   : > { %v3508_v16 = vmax.f32 %v2278_v14, 0.0 }
 0x284   : > { %v2001_v17 = vpop.f32.mrf.mxu0  ;;  %v2930_v18 = vpop.f32.mrf.mxu3 }
 0x285   : > { %v4139_v20 = vadd.f32 %v3509_v15, %v3508_v16  ;;  %v3286_v23 = vmax.f32 %v2001_v17, 0.0  ;;  %v3511_v24 = vmax.f32 %v2930_v18, 0.0 }
 0x286   : > { %v2652_v21 = vpop.f32.mrf.mxu1 }
 0x287   : > { %5828 = vmatmul.msk.bf16.gmra.mxu2 %vm1580_vm3, %v6087_v9  ;;  %4140 = vadd.xlane.f32.xlu2 %v4139_v20  ;;  %v3806_v27 = vadd.f32 %v3287_v22, %v3286_v23  ;;  %v3289_v34 = vmax.f32 %v2652_v21, 0.0 }
 0x288   : > { %5772 = vmatmul.msk.bf16.gmra.mxu0 %vm1580_vm3, %v6031_v11  ;;  %3804 = vadd.xlane.f32.xlu1 %v3803_v19  ;;  %v6090_v11 = vld [vmem:[%s8174_s5 + $0x238] sm:$0xff] }
 0x28a   : > { %v2281_v25 = vpop.f32.mrf.mxu2 }
 0x28b   : > { %v3510_v26 = vmax.f32 %v2281_v25, 0.0 }
 0x28c   : > { %v2003_v28 = vpop.f32.mrf.mxu0  ;;  %v2932_v29 = vpop.f32.mrf.mxu3 }
 0x28d   : > { %v4142_v30 = vadd.f32 %v3511_v24, %v3510_v26  ;;  %v3288_v35 = vmax.f32 %v2003_v28, 0.0  ;;  %v3513_v37 = vmax.f32 %v2932_v29, 0.0 }
 0x28e   : > { %v2655_v32 = vpop.f32.mrf.mxu1 }
 0x28f   : > { %4143 = vadd.xlane.f32.xlu0 %v4142_v30  ;;  %3807 = vadd.xlane.f32.xlu2 %v3806_v27  ;;  %v3809_v41 = vadd.f32 %v3289_v34, %v3288_v35  ;;  %v3291_v44 = vmax.f32 %v2655_v32, 0.0  ;;  %v6035_v35 = vld [vmem:[%s8174_s5 + $0x80] sm:$0xff] }
 0x291   : > { %5957 = vmatmul.msk.bf16.gmra.mxu3 %vm1580_vm3, %v6088_v31 }
 0x292   : > { %v2283_v36 = vpop.f32.mrf.mxu2  ;;  %5901 = vmatmul.msk.bf16.gmra.mxu1 %vm1580_vm3, %v6032_v33 }
 0x293   : > { %v3512_v38 = vmax.f32 %v2283_v36, 0.0 }
 0x294   : > { %v2006_v39 = vpop.f32.mrf.mxu0  ;;  %v2935_v40 = vpop.f32.mrf.mxu3 }
 0x295   : > { %v4145_v42 = vadd.f32 %v3513_v37, %v3512_v38  ;;  %v3290_v45 = vmax.f32 %v2006_v39, 0.0  ;;  %v3515_v46 = vmax.f32 %v2935_v40, 0.0 }
 0x296   : > { %v2657_v43 = vpop.f32.mrf.mxu1 }
 0x297   : > { %5829 = vmatmul.msk.bf16.gmra.mxu2 %vm1580_vm3, %v6088_v31  ;;  %4146 = vadd.xlane.f32.xlu1 %v4145_v42  ;;  %v3812_v49 = vadd.f32 %v3291_v44, %v3290_v45  ;;  %v3293_v56 = vmax.f32 %v2657_v43, 0.0 }
 0x298   : > { %5773 = vmatmul.msk.bf16.gmra.mxu0 %vm1580_vm3, %v6032_v33  ;;  %3810 = vadd.xlane.f32.xlu0 %v3809_v41  ;;  %v6091_v33 = vld [vmem:[%s8174_s5 + $0x240] sm:$0xff] }
 0x29a   : > { %v2286_v47 = vpop.f32.mrf.mxu2 }
 0x29b   : > { %v3514_v48 = vmax.f32 %v2286_v47, 0.0 }
 0x29c   : > { %v2008_v50 = vpop.f32.mrf.mxu0  ;;  %v2937_v51 = vpop.f32.mrf.mxu3 }
 0x29d   : > { %v4148_v52 = vadd.f32 %v3515_v46, %v3514_v48  ;;  %v3292_v57 = vmax.f32 %v2008_v50, 0.0  ;;  %v3517_v59 = vmax.f32 %v2937_v51, 0.0 }
 0x29e   : > { %v2660_v54 = vpop.f32.mrf.mxu1 }
 0x29f   : > { %4149 = vadd.xlane.f32.xlu2 %v4148_v52  ;;  %3813 = vadd.xlane.f32.xlu1 %v3812_v49  ;;  %v3815_v63 = vadd.f32 %v3293_v56, %v3292_v57  ;;  %v3295_v2 = vmax.f32 %v2660_v54, 0.0  ;;  %v6036_v56 = vld [vmem:[%s8174_s5 + $0x88] sm:$0xff] }
 0x2a1   : > { %5958 = vmatmul.msk.bf16.gmra.mxu3 %vm1580_vm3, %v6089_v53 }
 0x2a2   : > { %v2288_v58 = vpop.f32.mrf.mxu2  ;;  %5902 = vmatmul.msk.bf16.gmra.mxu1 %vm1580_vm3, %v6033_v55 }
 0x2a3   : > { %v3516_v60 = vmax.f32 %v2288_v58, 0.0 }
 0x2a4   : > { %v2011_v61 = vpop.f32.mrf.mxu0  ;;  %v2940_v62 = vpop.f32.mrf.mxu3 }
 0x2a5   : > { %v4151_v0 = vadd.f32 %v3517_v59, %v3516_v60  ;;  %v3294_v3 = vmax.f32 %v2011_v61, 0.0  ;;  %v3519_v4 = vmax.f32 %v2940_v62, 0.0 }
 0x2a6   : > { %v2662_v1 = vpop.f32.mrf.mxu1 }
 0x2a7   : > { %5830 = vmatmul.msk.bf16.gmra.mxu2 %vm1580_vm3, %v6089_v53  ;;  %4152 = vadd.xlane.f32.xlu0 %v4151_v0  ;;  %v3818_v7 = vadd.f32 %v3295_v2, %v3294_v3  ;;  %v3297_v14 = vmax.f32 %v2662_v1, 0.0 }
 0x2a8   : > { %5774 = vmatmul.msk.bf16.gmra.mxu0 %vm1580_vm3, %v6033_v55  ;;  %3816 = vadd.xlane.f32.xlu2 %v3815_v63  ;;  %v6092_v55 = vld [vmem:[%s8174_s5 + $0x248] sm:$0xff] }
 0x2aa   : > { %v2291_v5 = vpop.f32.mrf.mxu2 }
 0x2ab   : > { %v3518_v6 = vmax.f32 %v2291_v5, 0.0 }
 0x2ac   : > { %v2013_v8 = vpop.f32.mrf.mxu0  ;;  %v2942_v9 = vpop.f32.mrf.mxu3 }
 0x2ad   : > { %v4154_v10 = vadd.f32 %v3519_v4, %v3518_v6  ;;  %v3296_v15 = vmax.f32 %v2013_v8, 0.0  ;;  %v3521_v17 = vmax.f32 %v2942_v9, 0.0 }
 0x2ae   : > { %v2665_v12 = vpop.f32.mrf.mxu1 }
 0x2af   : > { %4155 = vadd.xlane.f32.xlu1 %v4154_v10  ;;  %3819 = vadd.xlane.f32.xlu0 %v3818_v7  ;;  %v3821_v21 = vadd.f32 %v3297_v14, %v3296_v15  ;;  %v3299_v24 = vmax.f32 %v2665_v12, 0.0  ;;  %v6037_v14 = vld [vmem:[%s8174_s5 + $0x90] sm:$0xff] }
 0x2b1   : > { %5959 = vmatmul.msk.bf16.gmra.mxu3 %vm1580_vm3, %v6090_v11 }
 0x2b2   : > { %v2293_v16 = vpop.f32.mrf.mxu2  ;;  %5903 = vmatmul.msk.bf16.gmra.mxu1 %vm1580_vm3, %v6034_v13 }
 0x2b3   : > { %v3520_v18 = vmax.f32 %v2293_v16, 0.0 }
 0x2b4   : > { %v2016_v19 = vpop.f32.mrf.mxu0  ;;  %v2945_v20 = vpop.f32.mrf.mxu3 }
 0x2b5   : > { %v4157_v22 = vadd.f32 %v3521_v17, %v3520_v18  ;;  %v3298_v25 = vmax.f32 %v2016_v19, 0.0  ;;  %v3523_v26 = vmax.f32 %v2945_v20, 0.0 }
 0x2b6   : > { %v2667_v23 = vpop.f32.mrf.mxu1 }
 0x2b7   : > { %5831 = vmatmul.msk.bf16.gmra.mxu2 %vm1580_vm3, %v6090_v11  ;;  %4158 = vadd.xlane.f32.xlu2 %v4157_v22  ;;  %v3824_v29 = vadd.f32 %v3299_v24, %v3298_v25  ;;  %v3301_v36 = vmax.f32 %v2667_v23, 0.0 }
 0x2b8   : > { %5775 = vmatmul.msk.bf16.gmra.mxu0 %vm1580_vm3, %v6034_v13  ;;  %3822 = vadd.xlane.f32.xlu1 %v3821_v21  ;;  %v6093_v13 = vld [vmem:[%s8174_s5 + $0x250] sm:$0xff] }
 0x2ba   : > { %v2296_v27 = vpop.f32.mrf.mxu2 }
 0x2bb   : > { %v3522_v28 = vmax.f32 %v2296_v27, 0.0 }
 0x2bc   : > { %v2947_v30 = vpop.f32.mrf.mxu3  ;;  %v2018_v31 = vpop.f32.mrf.mxu0 }
 0x2bd   : > { %v4160_v32 = vadd.f32 %v3523_v26, %v3522_v28  ;;  %v3300_v37 = vmax.f32 %v2018_v31, 0.0  ;;  %v3525_v39 = vmax.f32 %v2947_v30, 0.0  ;;  %v6835_v16 = vpop.xlane.xlu0 %3783 }
 0x2be   : > { %v2670_v34 = vpop.f32.mrf.mxu1 }
 0x2bf   : > { %4161 = vadd.xlane.f32.xlu0 %v4160_v32  ;;  %3825 = vadd.xlane.f32.xlu2 %v3824_v29  ;;  %v3827_v42 = vadd.f32 %v3301_v36, %v3300_v37  ;;  %v3303_v46 = vmax.f32 %v2670_v34, 0.0 }
 0x2c1   : > { %5960 = vmatmul.msk.bf16.gmra.mxu3 %vm1580_vm3, %v6091_v33 }
 0x2c2   : > { %v2298_v38 = vpop.f32.mrf.mxu2  ;;  %5904 = vmatmul.msk.bf16.gmra.mxu1 %vm1580_vm3, %v6035_v35  ;;  %v6845_v36 = vpop.xlane.xlu1 %4119 }
 0x2c3   : > { %v3524_v40 = vmax.f32 %v2298_v38, 0.0 }
 0x2c4   : > { %v2950_v41 = vpop.f32.mrf.mxu3  ;;  %v2021_v43 = vpop.f32.mrf.mxu0 }
 0x2c5   : > { %v4163_v44 = vadd.f32 %v3525_v39, %v3524_v40  ;;  %v3302_v47 = vmax.f32 %v2021_v43, 0.0  ;;  %v3527_v48 = vmax.f32 %v2950_v41, 0.0  ;;  %v6841_v30 = vpop.xlane.xlu0 %3786  ;;  %v6094_v39 = vld [vmem:[%s8174_s5 + $0x258] sm:$0xff] }
 0x2c6   : > { %v2672_v45 = vpop.f32.mrf.mxu1  ;;  %v6038_v40 = vld [vmem:[%s8174_s5 + $0x98] sm:$0xff] }
 0x2c7   : > { %5832 = vmatmul.msk.bf16.gmra.mxu2 %vm1580_vm3, %v6091_v33  ;;  %4164 = vadd.xlane.f32.xlu1 %v4163_v44  ;;  %v3830_v51 = vadd.f32 %v3303_v46, %v3302_v47  ;;  %v3305_v58 = vmax.f32 %v2672_v45, 0.0 }
 0x2c8   : > { %5776 = vmatmul.msk.bf16.gmra.mxu0 %vm1580_vm3, %v6035_v35  ;;  %3828 = vadd.xlane.f32.xlu0 %v3827_v42 }
 0x2ca   : > { %v2301_v49 = vpop.f32.mrf.mxu2  ;;  %v6843_v32 = vpop.xlane.xlu2 %4122 }
 0x2cb   : > { %v3526_v50 = vmax.f32 %v2301_v49, 0.0 }
 0x2cc   : > { %v2952_v52 = vpop.f32.mrf.mxu3  ;;  %v2023_v53 = vpop.f32.mrf.mxu0 }
 0x2cd   : > { %v4166_v54 = vadd.f32 %v3527_v48, %v3526_v50  ;;  %v3304_v59 = vmax.f32 %v2023_v53, 0.0  ;;  %v3529_v61 = vmax.f32 %v2952_v52, 0.0 }
 0x2cf   : > { %4167 = vadd.xlane.f32.xlu2 %v4166_v54  ;;  %3831 = vadd.xlane.f32.xlu1 %v3830_v51  ;;  %v2675_v57 = vpop.f32.mrf.mxu1  ;;  %v3833_v0 = vadd.f32 %v3305_v58, %v3304_v59  ;;  %v6859_v51 = vpop.xlane.xlu1 %3789 }
 0x2d0   : > { %v3307_v3 = vmax.f32 %v2675_v57, 0.0 }
 0x2d1   : > { %5961 = vmatmul.msk.bf16.gmra.mxu3 %vm1580_vm3, %v6092_v55 }
 0x2d2   : > { %v2303_v60 = vpop.f32.mrf.mxu2  ;;  %5905 = vmatmul.msk.bf16.gmra.mxu1 %vm1580_vm3, %v6036_v56  ;;  %v6857_v48 = vpop.xlane.xlu0 %4125 }
 0x2d3   : > { %v3528_v62 = vmax.f32 %v2303_v60, 0.0 }
 0x2d4   : > { %v2955_v63 = vpop.f32.mrf.mxu3 }
 0x2d5   : > { %v2026_v1 = vpop.f32.mrf.mxu0  ;;  %v4169_v2 = vadd.f32 %v3529_v61, %v3528_v62  ;;  %v3531_v6 = vmax.f32 %v2955_v63, 0.0 }
 0x2d6   : > { %v3306_v4 = vmax.f32 %v2026_v1, 0.0 }
 0x2d7   : > { %5833 = vmatmul.msk.bf16.gmra.mxu2 %vm1580_vm3, %v6092_v55  ;;  %4170 = vadd.xlane.f32.xlu0 %v4169_v2  ;;  %v2677_v5 = vpop.f32.mrf.mxu1  ;;  %v6095_v2 = vld [vmem:[%s8174_s5 + $0x260] sm:$0xff] }
 0x2d8   : > { %5777 = vmatmul.msk.bf16.gmra.mxu0 %vm1580_vm3, %v6036_v56  ;;  %3834 = vadd.xlane.f32.xlu2 %v3833_v0  ;;  %v3836_v9 = vadd.f32 %v3307_v3, %v3306_v4  ;;  %v3309_v17 = vmax.f32 %v2677_v5, 0.0  ;;  %v6039_v3 = vld [vmem:[%s8174_s5 + $0xa0] sm:$0xff]  ;;  %v6873_v4 = vpop.xlane.xlu1 %3792 }
 0x2da   : > { %v2306_v7 = vpop.f32.mrf.mxu2 }
 0x2db   : > { %v3530_v8 = vmax.f32 %v2306_v7, 0.0 }
 0x2dc   : > { %v2957_v10 = vpop.f32.mrf.mxu3  ;;  %v6855_v45 = vpop.xlane.xlu2 %3795 }
 0x2dd   : > { %v2028_v11 = vpop.f32.mrf.mxu0  ;;  %v4172_v12 = vadd.f32 %v3531_v6, %v3530_v8  ;;  %v3533_v20 = vmax.f32 %v2957_v10, 0.0 }
 0x2de   : > { %v3308_v18 = vmax.f32 %v2028_v11, 0.0 }
 0x2df   : > { %4173 = vadd.xlane.f32.xlu1 %v4172_v12  ;;  %3837 = vadd.xlane.f32.xlu0 %v3836_v9  ;;  %v2680_v15 = vpop.f32.mrf.mxu1 }
 0x2e0   : > { %v3839_v23 = vadd.f32 %v3309_v17, %v3308_v18  ;;  %v3311_v26 = vmax.f32 %v2680_v15, 0.0 }
 0x2e1   : > { %5962 = vmatmul.msk.bf16.gmra.mxu3 %vm1580_vm3, %v6093_v13 }
 0x2e2   : > { %v2308_v19 = vpop.f32.mrf.mxu2  ;;  %5906 = vmatmul.msk.bf16.gmra.mxu1 %vm1580_vm3, %v6037_v14 }
 0x2e3   : > { %v3532_v21 = vmax.f32 %v2308_v19, 0.0 }
 0x2e4   : > { %v2960_v22 = vpop.f32.mrf.mxu3  ;;  %v6865_v63 = vpop.xlane.xlu2 %4131 }
 0x2e5   : > { %v2031_v24 = vpop.f32.mrf.mxu0  ;;  %v4175_v25 = vadd.f32 %v3533_v20, %v3532_v21  ;;  %v3535_v29 = vmax.f32 %v2960_v22, 0.0  ;;  %v6883_v21 = vpop.xlane.xlu1 %4128 }
 0x2e6   : > { %v3310_v27 = vmax.f32 %v2031_v24, 0.0 }
 0x2e7   : > { %5834 = vmatmul.msk.bf16.gmra.mxu2 %vm1580_vm3, %v6093_v13  ;;  %4176 = vadd.xlane.f32.xlu2 %v4175_v25  ;;  %v2682_v28 = vpop.f32.mrf.mxu1 }
 0x2e8   : > { %5778 = vmatmul.msk.bf16.gmra.mxu0 %vm1580_vm3, %v6037_v14  ;;  %3840 = vadd.xlane.f32.xlu1 %v3839_v23  ;;  %v3842_v34 = vadd.f32 %v3311_v26, %v3310_v27  ;;  %v3313_v42 = vmax.f32 %v2682_v28, 0.0 }
 0x2ea   : > { %v2311_v31 = vpop.f32.mrf.mxu2  ;;  %v6863_v61 = vpop.xlane.xlu0 %4134 }
 0x2eb   : > { %v3534_v33 = vmax.f32 %v2311_v31, 0.0 }
 0x2ec   : > { %v2962_v35 = vpop.f32.mrf.mxu3  ;;  %v6879_v14 = vpop.xlane.xlu2 %3798 }
 0x2ed   : > { %v2033_v37 = vpop.f32.mrf.mxu0  ;;  %v4178_v38 = vadd.f32 %v3535_v29, %v3534_v33  ;;  %v3537_v46 = vmax.f32 %v2962_v35, 0.0  ;;  %v6096_v29 = vld [vmem:[%s8174_s5 + $0x268] sm:$0xff] }
 0x2ee   : > { %v3312_v43 = vmax.f32 %v2033_v37, 0.0  ;;  %v6040_v33 = vld [vmem:[%s8174_s5 + $0xa8] sm:$0xff] }
 0x2ef   : > { %4179 = vadd.xlane.f32.xlu0 %v4178_v38  ;;  %3843 = vadd.xlane.f32.xlu2 %v3842_v34  ;;  %v2685_v41 = vpop.f32.mrf.mxu1 }
 0x2f0   : > { %v3845_v50 = vadd.f32 %v3313_v42, %v3312_v43  ;;  %v3315_v54 = vmax.f32 %v2685_v41, 0.0 }
 0x2f1   : > { %5963 = vmatmul.msk.bf16.gmra.mxu3 %vm1580_vm3, %v6094_v39 }
 0x2f2   : > { %v2313_v44 = vpop.f32.mrf.mxu2  ;;  %5907 = vmatmul.msk.bf16.gmra.mxu1 %vm1580_vm3, %v6038_v40  ;;  %v6877_v11 = vpop.xlane.xlu0 %3801 }
 0x2f3   : > { %v3536_v47 = vmax.f32 %v2313_v44, 0.0 }
 0x2f4   : > { %v2965_v49 = vpop.f32.mrf.mxu3 }
 0x2f5   : > { %v2036_v52 = vpop.f32.mrf.mxu0  ;;  %v4181_v53 = vadd.f32 %v3537_v46, %v3536_v47  ;;  %v3539_v57 = vmax.f32 %v2965_v49, 0.0 }
 0x2f6   : > { %v3314_v55 = vmax.f32 %v2036_v52, 0.0 }
 0x2f7   : > { %5835 = vmatmul.msk.bf16.gmra.mxu2 %vm1580_vm3, %v6094_v39  ;;  %4182 = vadd.xlane.f32.xlu1 %v4181_v53  ;;  %v2687_v56 = vpop.f32.mrf.mxu1  ;;  %v6895_v39 = vpop.xlane.xlu1 %4137 }
 0x2f8   : > { %5779 = vmatmul.msk.bf16.gmra.mxu0 %vm1580_vm3, %v6038_v40  ;;  %3846 = vadd.xlane.f32.xlu0 %v3845_v50  ;;  %v3848_v60 = vadd.f32 %v3315_v54, %v3314_v55  ;;  %v3317_v6 = vmax.f32 %v2687_v56, 0.0 }
 0x2fa   : > { %v2316_v58 = vpop.f32.mrf.mxu2  ;;  %v6893_v34 = vpop.xlane.xlu2 %4140 }
 0x2fb   : > { %v3538_v59 = vmax.f32 %v2316_v58, 0.0 }
 0x2fc   : > { %v2967_v62 = vpop.f32.mrf.mxu3 }
 0x2fd   : > { %v2038_v0 = vpop.f32.mrf.mxu0  ;;  %v4184_v1 = vadd.f32 %v3539_v57, %v3538_v59  ;;  %v3541_v9 = vmax.f32 %v2967_v62, 0.0 }
 0x2fe   : > { %v3316_v7 = vmax.f32 %v2038_v0, 0.0 }
 0x2ff   : > { %4185 = vadd.xlane.f32.xlu2 %v4184_v1  ;;  %3849 = vadd.xlane.f32.xlu1 %v3848_v60  ;;  %v2690_v5 = vpop.f32.mrf.mxu1  ;;  %v6905_v55 = vpop.xlane.xlu1 %3804  ;;  %v6097_v1 = vld [vmem:[%s8174_s5 + $0x270] sm:$0xff] }
 0x300   : > { %v3851_v13 = vadd.f32 %v3317_v6, %v3316_v7  ;;  %v3319_v18 = vmax.f32 %v2690_v5, 0.0 }
 0x301   : > { %5964 = vmatmul.msk.bf16.gmra.mxu3 %vm1580_vm3, %v6095_v2 }
 0x302   : > { %v2318_v8 = vpop.f32.mrf.mxu2  ;;  %5908 = vmatmul.msk.bf16.gmra.mxu1 %vm1580_vm3, %v6039_v3  ;;  %v6888_v31 = vpop.xlane.xlu0 %4143 }
 0x303   : > { %v3540_v10 = vmax.f32 %v2318_v8, 0.0  ;;  %v6901_v50 = vpop.xlane.xlu2 %3807 }
 0x304   : > { %v2970_v12 = vpop.f32.mrf.mxu3 }
 0x305   : > { %v2041_v15 = vpop.f32.mrf.mxu0  ;;  %v4187_v17 = vadd.f32 %v3541_v9, %v3540_v10  ;;  %v3543_v22 = vmax.f32 %v2970_v12, 0.0  ;;  %v6168_v9 = vmov 256.0  }
 0x306   : > { %v3318_v19 = vmax.f32 %v2041_v15, 0.0  ;;  %6158 = vrcp.f32 %v6168_v9 }
 0x307   : > { %5836 = vmatmul.msk.bf16.gmra.mxu2 %vm1580_vm3, %v6095_v2  ;;  %4188 = vadd.xlane.f32.xlu0 %v4187_v17  ;;  %v2692_v20 = vpop.f32.mrf.mxu1  ;;  %v6041_v2 = vld [vmem:[%s8174_s5 + $0xb0] sm:$0xff] }
 0x308   : > { %5780 = vmatmul.msk.bf16.gmra.mxu0 %vm1580_vm3, %v6039_v3  ;;  %3852 = vadd.xlane.f32.xlu2 %v3851_v13  ;;  %v3854_v25 = vadd.f32 %v3319_v18, %v3318_v19  ;;  %v3321_v37 = vmax.f32 %v2692_v20, 0.0 }
 0x30a   : > { %v2321_v23 = vpop.f32.mrf.mxu2  ;;  %v6919_v12 = vpop.xlane.xlu1 %4146 }
 0x30b   : > { %v3542_v24 = vmax.f32 %v2321_v23, 0.0  ;;  %v6899_v49 = vpop.xlane.xlu0 %3810 }
 0x30c   : > { %v2972_v26 = vpop.f32.mrf.mxu3 }
 0x30d   : > { %v2043_v27 = vpop.f32.mrf.mxu0  ;;  %v4190_v28 = vadd.f32 %v3543_v22, %v3542_v24  ;;  %v3545_v41 = vmax.f32 %v2972_v26, 0.0 }
 0x30e   : > { %v3320_v38 = vmax.f32 %v2043_v27, 0.0 }
 0x30f   : > { %4191 = vadd.xlane.f32.xlu1 %v4190_v28  ;;  %3855 = vadd.xlane.f32.xlu0 %v3854_v25  ;;  %v2695_v35 = vpop.f32.mrf.mxu1  ;;  %v6159_v25 = vpop.eup %6158 }
 0x310   : > { %v3857_v44 = vadd.f32 %v3321_v37, %v3320_v38  ;;  %v3323_v52 = vmax.f32 %v2695_v35, 0.0  ;;  %vm4555_vm4 = vweird.f32 %v6159_v25 }
 0x311   : > { %5965 = vmatmul.msk.bf16.gmra.mxu3 %vm1580_vm3, %v6096_v29 }
 0x312   : > { %v2323_v40 = vpop.f32.mrf.mxu2  ;;  %5909 = vmatmul.msk.bf16.gmra.mxu1 %vm1580_vm3, %v6040_v33  ;;  %v6915_v8 = vpop.xlane.xlu2 %4149 }
 0x313   : > { %v3544_v42 = vmax.f32 %v2323_v40, 0.0  ;;  %v6927_v35 = vpop.xlane.xlu1 %3813 }
 0x314   : > { %v2975_v43 = vpop.f32.mrf.mxu3 }
 0x315   : > { %v2046_v46 = vpop.f32.mrf.mxu0  ;;  %v4193_v47 = vadd.f32 %v3545_v41, %v3544_v42  ;;  %v3547_v56 = vmax.f32 %v2975_v43, 0.0  ;;  %v6098_v43 = vld [vmem:[%s8174_s5 + $0x278] sm:$0xff] }
 0x316   : > { %v3322_v53 = vmax.f32 %v2046_v46, 0.0 }
 0x317   : > { %5837 = vmatmul.msk.bf16.gmra.mxu2 %vm1580_vm3, %v6096_v29  ;;  %4194 = vadd.xlane.f32.xlu2 %v4193_v47  ;;  %v2697_v54 = vpop.f32.mrf.mxu1 }
 0x318   : > { %5781 = vmatmul.msk.bf16.gmra.mxu0 %vm1580_vm3, %v6040_v33  ;;  %3858 = vadd.xlane.f32.xlu1 %v3857_v44  ;;  %v3860_v59 = vadd.f32 %v3323_v52, %v3322_v53  ;;  %v3325_v5 = vmax.f32 %v2697_v54, 0.0  ;;  %v4551_v33 = vmul.f32 256.0, %v6159_v25  ;;  %v6042_v44 = vld [vmem:[%s8174_s5 + $0xb8] sm:$0xff] }
 0x31a   : > { %v2326_v57 = vpop.f32.mrf.mxu2  ;;  %v6913_v6 = vpop.xlane.xlu0 %4152  ;;  %v4552_v46 = vsub.f32 1.0, %v4551_v33 }
 0x31b   : > { %v3546_v58 = vmax.f32 %v2326_v57, 0.0  ;;  %v6925_v27 = vpop.xlane.xlu2 %3816 }
 0x31c   : > { %v2977_v60 = vpop.f32.mrf.mxu3  ;;  %v4553_v57 = vmul.f32 %v6159_v25, %v4552_v46 }
 0x31d   : > { %v2048_v62 = vpop.f32.mrf.mxu0  ;;  %v4196_v0 = vadd.f32 %v3547_v56, %v3546_v58  ;;  %v3549_v13 = vmax.f32 %v2977_v60, 0.0 }
 0x31e   : > { %v3324_v7 = vmax.f32 %v2048_v62, 0.0 }
 0x31f   : > { %4197 = vadd.xlane.f32.xlu0 %v4196_v0  ;;  %3861 = vadd.xlane.f32.xlu2 %v3860_v59  ;;  %v2700_v3 = vpop.f32.mrf.mxu1 }
 0x320   : > { %v3863_v18 = vadd.f32 %v3325_v5, %v3324_v7  ;;  %v3327_v22 = vmax.f32 %v2700_v3, 0.0  ;;  %v4554_v5 = vadd.f32 %v6159_v25, %v4553_v57 }
 0x321   : > { %5966 = vmatmul.msk.bf16.gmra.mxu3 %vm1580_vm3, %v6097_v1 }
 0x322   : > { %v2328_v10 = vpop.f32.mrf.mxu2  ;;  %5910 = vmatmul.msk.bf16.gmra.mxu1 %vm1580_vm3, %v6041_v2  ;;  %v6922_v26 = vpop.xlane.xlu0 %3819 }
 0x323   : > { %v3548_v15 = vmax.f32 %v2328_v10, 0.0 }
 0x324   : > { %v2980_v17 = vpop.f32.mrf.mxu3 }
 0x325   : > { %v2051_v19 = vpop.f32.mrf.mxu0  ;;  %v4199_v20 = vadd.f32 %v3549_v13, %v3548_v15  ;;  %v3551_v28 = vmax.f32 %v2980_v17, 0.0  ;;  %v6945_v17 = vsel %vm4555_vm4, %v6159_v25, %v4554_v5  ;;  %v6043_v25 = vld [vmem:[%s8174_s5 + $0xc0] sm:$0xff] }
 0x326   : > { %v3326_v23 = vmax.f32 %v2051_v19, 0.0  ;;  %v4568_v46 = vmul.f32 %v6945_v17, %v6925_v27 }
 0x327   : > { %5838 = vmatmul.msk.bf16.gmra.mxu2 %vm1580_vm3, %v6097_v1  ;;  %4200 = vadd.xlane.f32.xlu1 %v4199_v20  ;;  %v2702_v24 = vpop.f32.mrf.mxu1  ;;  %v6941_v1 = vpop.xlane.xlu1 %4155 }
 0x328   : > { %5782 = vmatmul.msk.bf16.gmra.mxu0 %vm1580_vm3, %v6041_v2  ;;  %3864 = vadd.xlane.f32.xlu0 %v3863_v18  ;;  %v3866_v38 = vadd.f32 %v3327_v22, %v3326_v23  ;;  %v3329_v52 = vmax.f32 %v2702_v24, 0.0 }
 0x32a   : > { %v2331_v29 = vpop.f32.mrf.mxu2  ;;  %v6939_v58 = vpop.xlane.xlu2 %4158 }
 0x32b   : > { %v3550_v37 = vmax.f32 %v2331_v29, 0.0 }
 0x32c   : > { %v2982_v40 = vpop.f32.mrf.mxu3 }
 0x32d   : > { %v2053_v41 = vpop.f32.mrf.mxu0  ;;  %v4202_v42 = vadd.f32 %v3551_v28, %v3550_v37  ;;  %v3553_v59 = vmax.f32 %v2982_v40, 0.0 }
 0x32e   : > { %v3328_v53 = vmax.f32 %v2053_v41, 0.0 }
 0x32f   : > { %4203 = vadd.xlane.f32.xlu2 %v4202_v42  ;;  %3867 = vadd.xlane.f32.xlu1 %v3866_v38  ;;  %v2705_v47 = vpop.f32.mrf.mxu1  ;;  %v3823_v29 = vpop.xlane.xlu1 %3822  ;;  %v6099_v38 = vld [vmem:[%s8174_s5 + $0x280] sm:$0xff]  ;;  %v4569_v42 = vmul.f32 %v6945_v17, %v6922_v26  ;;  %v4567_v26 = vmul.f32 %v6945_v17, %v6927_v35 }
 0x330   : > { %v3869_v0 = vadd.f32 %v3329_v52, %v3328_v53  ;;  %v3331_v7 = vmax.f32 %v2705_v47, 0.0  ;;  %v4570_v40 = vmul.f32 %v6945_v17, %v3823_v29 }
 0x331   : > { %5967 = vmatmul.msk.bf16.gmra.mxu3 %vm1580_vm3, %v6098_v43 }
 0x332   : > { %v2333_v54 = vpop.f32.mrf.mxu2  ;;  %v6936_v56 = vpop.xlane.xlu0 %4161  ;;  %5911 = vmatmul.msk.bf16.gmra.mxu1 %vm1580_vm3, %v6042_v44 }
 0x333   : > { %v3552_v60 = vmax.f32 %v2333_v54, 0.0  ;;  %v3826_v18 = vpop.xlane.xlu2 %3825 }
 0x334   : > { %v2985_v62 = vpop.f32.mrf.mxu3  ;;  %v4571_v23 = vmul.f32 %v6945_v17, %v3826_v18  ;;  %v6100_v18 = vld [vmem:[%s8174_s5 + $0x288] sm:$0xff] }
 0x335   : > { %v2056_v2 = vpop.f32.mrf.mxu0  ;;  %v4205_v3 = vadd.f32 %v3553_v59, %v3552_v60  ;;  %v3555_v13 = vmax.f32 %v2985_v62, 0.0  ;;  %v4566_v62 = vmul.f32 %v6945_v17, %v6899_v49 }
 0x336   : > { %v3330_v9 = vmax.f32 %v2056_v2, 0.0 }
 0x337   : > { %5839 = vmatmul.msk.bf16.gmra.mxu2 %vm1580_vm3, %v6098_v43  ;;  %4206 = vadd.xlane.f32.xlu0 %v4205_v3  ;;  %v2707_v10 = vpop.f32.mrf.mxu1  ;;  %v4565_v3 = vmul.f32 %v6945_v17, %v6901_v50 }
 0x338   : > { %5783 = vmatmul.msk.bf16.gmra.mxu0 %vm1580_vm3, %v6042_v44  ;;  %3870 = vadd.xlane.f32.xlu2 %v3869_v0  ;;  %v3872_v22 = vadd.f32 %v3331_v7, %v3330_v9  ;;  %v3333_v43 = vmax.f32 %v2707_v10, 0.0  ;;  %v4564_v7 = vmul.f32 %v6945_v17, %v6905_v55  ;;  %v4562_v55 = vmul.f32 %v6945_v17, %v6879_v14 }
 0x33a   : > { %v2336_v15 = vpop.f32.mrf.mxu2 }
 0x33b   : > { %v3554_v19 = vmax.f32 %v2336_v15, 0.0  ;;  %v3829_v20 = vpop.xlane.xlu0 %3828 }
 0x33c   : > { %v4572_v24 = vmul.f32 %v6945_v17, %v3829_v20  ;;  %v2987_v28 = vpop.f32.mrf.mxu3 }
 0x33d   : > { %v2058_v33 = vpop.f32.mrf.mxu0  ;;  %v4208_v37 = vadd.f32 %v3555_v13, %v3554_v19  ;;  %v3557_v52 = vmax.f32 %v2987_v28, 0.0  ;;  %v4563_v13 = vmul.f32 %v6945_v17, %v6877_v11  ;;  %v6044_v19 = vld [vmem:[%s8174_s5 + $0xc8] sm:$0xff]  ;;  %v4561_v11 = vmul.f32 %v6945_v17, %v6855_v45 }
 0x33e   : > { %4859 = vmatpush.msra.mxu0 %v4572_v24  ;;  %v3332_v44 = vmax.f32 %v2058_v33, 0.0  ;;  %v4560_v28 = vmul.f32 %v6945_v17, %v6873_v4  ;;  %v4558_v4 = vmul.f32 %v6945_v17, %v6841_v30  ;;  %v6045_v30 = vld [vmem:[%s8174_s5 + $0xd0] sm:$0xff] }
 0x33f   : > { %4209 = vadd.xlane.f32.xlu1 %v4208_v37  ;;  %3873 = vadd.xlane.f32.xlu0 %v3872_v22  ;;  %v2710_v41 = vpop.f32.mrf.mxu1  ;;  %v4559_v37 = vmul.f32 %v6945_v17, %v6859_v51 }
 0x340   : > { %4860 = vmatpush.msra.mxu0 %v4571_v23  ;;  %v3875_v54 = vadd.f32 %v3333_v43, %v3332_v44  ;;  %v3335_v2 = vmax.f32 %v2710_v41, 0.0  ;;  %v6991_v41 = vpop.xlane.xlu1 %4164 }
 0x341   : > { %5968 = vmatmul.msk.bf16.gmra.mxu3 %vm1580_vm3, %v6099_v38 }
 0x342   : > { %4861 = vmatpush.msra.mxu0 %v4570_v40  ;;  %v2338_v47 = vpop.f32.mrf.mxu2  ;;  %5912 = vmatmul.msk.bf16.gmra.mxu1 %vm1580_vm3, %v6043_v25 }
 0x343   : > { %v3556_v53 = vmax.f32 %v2338_v47, 0.0 }
 0x344   : > { %4862 = vmatpush.msra.mxu0 %v4569_v42  ;;  %v2990_v57 = vpop.f32.mrf.mxu3 }
 0x345   : > { %v2061_v59 = vpop.f32.mrf.mxu0  ;;  %v4211_v60 = vadd.f32 %v3557_v52, %v3556_v53  ;;  %v3559_v35 = vmax.f32 %v2990_v57, 0.0  ;;  %v6101_v57 = vld [vmem:[%s8174_s5 + $0x290] sm:$0xff] }
 0x346   : > { %4863 = vmatpush.msra.mxu0 %v4568_v46  ;;  %v3334_v0 = vmax.f32 %v2061_v59, 0.0  ;;  %v4557_v46 = vmul.f32 %v6945_v17, %v6835_v16 }
 0x347   : > { %5840 = vmatmul.msk.bf16.gmra.mxu2 %vm1580_vm3, %v6099_v38  ;;  %4212 = vadd.xlane.f32.xlu2 %v4211_v60  ;;  %v2712_v27 = vpop.f32.mrf.mxu1 }
 0x348   : > { %5784 = vmatmul.msk.bf16.gmra.mxu0 %vm1580_vm3, %v6043_v25  ;;  %3876 = vadd.xlane.f32.xlu1 %v3875_v54  ;;  %v3878_v10 = vadd.f32 %v3335_v2, %v3334_v0  ;;  %v3337_v23 = vmax.f32 %v2712_v27, 0.0  ;;  %v7004_v60 = vpop.xlane.xlu1 %3831 }
 0x349   : > { %4864 = vmatpush.msra.mxu0 %v4567_v26 }
 0x34a   : > { %v2341_v5 = vpop.f32.mrf.mxu2 }
 0x34b   : > { %4865 = vmatpush.msra.mxu0 %v4566_v62  ;;  %v3558_v49 = vmax.f32 %v2341_v5, 0.0 }
 0x34c   : > { %v2992_v9 = vpop.f32.mrf.mxu3 }
 0x34d   : > { %4866 = vmatpush.msra.mxu0 %v4565_v3  ;;  %v2063_v15 = vpop.f32.mrf.mxu0  ;;  %v4214_v50 = vadd.f32 %v3559_v35, %v3558_v49  ;;  %v3561_v29 = vmax.f32 %v2992_v9, 0.0 }
 0x34e   : > { %v3336_v22 = vmax.f32 %v2063_v15, 0.0 }
 0x34f   : > { %4867 = vmatpush.msra.mxu0 %v4564_v7  ;;  %v2715_v20 = vpop.f32.mrf.mxu1  ;;  %4215 = vadd.xlane.f32.xlu0 %v4214_v50  ;;  %v7012_v50 = vpop.xlane.xlu0 %4170 }
 0x350   : > { %3879 = vadd.xlane.f32.xlu2 %v3878_v10  ;;  %v3881_v40 = vadd.f32 %v3337_v23, %v3336_v22  ;;  %v3339_v43 = vmax.f32 %v2715_v20, 0.0  ;;  %8180 = vst [vmem:[#allocation3_spill] sm:$0xff] %v7012_v50  ;;  %v6102_v23 = vld [vmem:[%s8174_s5 + $0x298] sm:$0xff] }
 0x351   : > { %4868 = vmatpush.msra.mxu0 %v4563_v13  ;;  %5969 = vmatmul.msk.bf16.gmra.mxu3 %vm1580_vm3, %v6100_v18 }
 0x352   : > { %v2343_v24 = vpop.f32.mrf.mxu2  ;;  %5913 = vmatmul.msk.bf16.gmra.mxu1 %vm1580_vm3, %v6044_v19  ;;  %v7010_v15 = vpop.xlane.xlu1 %4173 }
 0x353   : > { %4869 = vmatpush.msra.mxu0 %v4562_v55  ;;  %v3560_v14 = vmax.f32 %v2343_v24, 0.0  ;;  %8179 = vst [vmem:[#allocation2_spill] sm:$0xff] %v7010_v15 }
 0x354   : > { %v2995_v33 = vpop.f32.mrf.mxu3 }
 0x355   : > { %4870 = vmatpush.msra.mxu0 %v4561_v11  ;;  %v2066_v45 = vpop.f32.mrf.mxu0  ;;  %v4217_v38 = vadd.f32 %v3561_v29, %v3560_v14  ;;  %v3563_v51 = vmax.f32 %v2995_v33, 0.0  ;;  %v7014_v11 = vpop.xlane.xlu2 %4167 }
 0x356   : > { %v3338_v42 = vmax.f32 %v2066_v45, 0.0  ;;  %8181 = vst [vmem:[#allocation4_spill] sm:$0xff] %v7014_v11 }
 0x357   : > { %4871 = vmatpush.msra.mxu0 %v4560_v28  ;;  %5841 = vmatmul.msk.bf16.gmra.mxu2 %vm1580_vm3, %v6100_v18  ;;  %v2717_v25 = vpop.f32.mrf.mxu1  ;;  %v6046_v28 = vld [vmem:[%s8174_s5 + $0xd8] sm:$0xff] }
 0x358   : > { %5785 = vmatmul.msk.bf16.gmra.mxu0 %vm1580_vm3, %v6044_v19  ;;  %4218 = vadd.xlane.f32.xlu1 %v4217_v38  ;;  %v3884_v53 = vadd.f32 %v3339_v43, %v3338_v42  ;;  %v3341_v62 = vmax.f32 %v2717_v25, 0.0  ;;  %v7026_v38 = vpop.xlane.xlu0 %3837 }
 0x359   : > { %4872 = vmatpush.msra.mxu0 %v4559_v37  ;;  %3882 = vadd.xlane.f32.xlu0 %v3881_v40 }
 0x35a   : > { %v2346_v44 = vpop.f32.mrf.mxu2 }
 0x35b   : > { %4873 = vmatpush.msra.mxu0 %v4558_v4  ;;  %v3562_v47 = vmax.f32 %v2346_v44, 0.0  ;;  %v7023_v37 = vpop.xlane.xlu1 %3840 }
 0x35c   : > { %v2997_v52 = vpop.f32.mrf.mxu3 }
 0x35d   : > { %4874 = vmatpush.msra.mxu0 %v4557_v46  ;;  %v2068_v54 = vpop.f32.mrf.mxu0  ;;  %v4220_v26 = vadd.f32 %v3563_v51, %v3562_v47  ;;  %v3565_v2 = vmax.f32 %v2997_v52, 0.0  ;;  %v7028_v4 = vpop.xlane.xlu2 %3834 }
 0x35e   : > { %v3340_v16 = vmax.f32 %v2068_v54, 0.0 }
 0x35f   : > { %v2720_v59 = vpop.f32.mrf.mxu1  ;;  %4221 = vadd.xlane.f32.xlu2 %v4220_v26 }
 0x360   : > { %3885 = vadd.xlane.f32.xlu1 %v3884_v53  ;;  %v3887_v35 = vadd.f32 %v3341_v62, %v3340_v16  ;;  %v3343_v9 = vmax.f32 %v2720_v59, 0.0 }
 0x361   : > { %5970 = vmatmul.msk.bf16.gmra.mxu3 %vm1580_vm3, %v6101_v57 }
 0x362   : > { %v2348_v27 = vpop.f32.mrf.mxu2  ;;  %5914 = vmatmul.msk.bf16.gmra.mxu1 %vm1580_vm3, %v6045_v30  ;;  %v7034_v16 = vpop.xlane.xlu0 %4179 }
 0x363   : > { %v3564_v0 = vmax.f32 %v2348_v27, 0.0  ;;  %8183 = vst [vmem:[#allocation6_spill] sm:$0xff] %v7034_v16  ;;  %v6103_v27 = vld [vmem:[%s8174_s5 + $0x2a0] sm:$0xff] }
 0x364   : > { %v3000_v3 = vpop.f32.mrf.mxu3 }
 0x365   : > { %v2071_v5 = vpop.f32.mrf.mxu0  ;;  %v4223_v7 = vadd.f32 %v3565_v2, %v3564_v0  ;;  %v3567_v13 = vmax.f32 %v3000_v3, 0.0  ;;  %v6047_v2 = vld [vmem:[%s8174_s5 + $0xe0] sm:$0xff]  ;;  %v7042_v3 = vpop.xlane.xlu2 %4176 }
 0x366   : > { %v3342_v49 = vmax.f32 %v2071_v5, 0.0  ;;  %8184 = vst [vmem:[#allocation7_spill] sm:$0xff] %v7042_v3 }
 0x367   : > { %5842 = vmatmul.msk.bf16.gmra.mxu2 %vm1580_vm3, %v6101_v57  ;;  %v2722_v10 = vpop.f32.mrf.mxu1  ;;  %4224 = vadd.xlane.f32.xlu0 %v4223_v7 }
 0x368   : > { %5786 = vmatmul.msk.bf16.gmra.mxu0 %vm1580_vm3, %v6045_v30  ;;  %3888 = vadd.xlane.f32.xlu2 %v3887_v35  ;;  %v3890_v55 = vadd.f32 %v3343_v9, %v3342_v49  ;;  %v3345_v33 = vmax.f32 %v2722_v10, 0.0 }
 0x36a   : > { %v2351_v18 = vpop.f32.mrf.mxu2  ;;  %v7032_v30 = vpop.xlane.xlu1 %4182 }
 0x36b   : > { %v3566_v19 = vmax.f32 %v2351_v18, 0.0  ;;  %8182 = vst [vmem:[#allocation5_spill] sm:$0xff] %v7032_v30 }
 0x36c   : > { %v3002_v20 = vpop.f32.mrf.mxu3 }
 0x36d   : > { %v2073_v22 = vpop.f32.mrf.mxu0  ;;  %v4226_v24 = vadd.f32 %v3567_v13, %v3566_v19  ;;  %v3569_v25 = vmax.f32 %v3002_v20, 0.0 }
 0x36e   : > { %v3344_v29 = vmax.f32 %v2073_v22, 0.0 }
 0x36f   : > { %v2725_v14 = vpop.f32.mrf.mxu1  ;;  %4227 = vadd.xlane.f32.xlu1 %v4226_v24  ;;  %3891 = vadd.xlane.f32.xlu0 %v3890_v55  ;;  %v7048_v55 = vpop.xlane.xlu0 %3846 }
 0x370   : > { %v3893_v43 = vadd.f32 %v3345_v33, %v3344_v29  ;;  %v3347_v47 = vmax.f32 %v2725_v14, 0.0 }
 0x371   : > { %5971 = vmatmul.msk.bf16.gmra.mxu3 %vm1580_vm3, %v6102_v23 }
 0x372   : > { %v2353_v45 = vpop.f32.mrf.mxu2  ;;  %5915 = vmatmul.msk.bf16.gmra.mxu1 %vm1580_vm3, %v6046_v28  ;;  %v7046_v13 = vpop.xlane.xlu1 %3849 }
 0x373   : > { %v3568_v40 = vmax.f32 %v2353_v45, 0.0 }
 0x374   : > { %v3005_v42 = vpop.f32.mrf.mxu3 }
 0x375   : > { %v2076_v51 = vpop.f32.mrf.mxu0  ;;  %v4229_v44 = vadd.f32 %v3569_v25, %v3568_v40  ;;  %v3571_v53 = vmax.f32 %v3005_v42, 0.0 }
 0x376   : > { %v3346_v46 = vmax.f32 %v2076_v51, 0.0 }
 0x377   : > { %5843 = vmatmul.msk.bf16.gmra.mxu2 %vm1580_vm3, %v6102_v23  ;;  %v2727_v52 = vpop.f32.mrf.mxu1  ;;  %4230 = vadd.xlane.f32.xlu2 %v4229_v44  ;;  %v7050_v23 = vpop.xlane.xlu2 %3843 }
 0x378   : > { %5787 = vmatmul.msk.bf16.gmra.mxu0 %vm1580_vm3, %v6046_v28  ;;  %3894 = vadd.xlane.f32.xlu1 %v3893_v43  ;;  %v3896_v26 = vadd.f32 %v3347_v47, %v3346_v46  ;;  %v3349_v7 = vmax.f32 %v2727_v52, 0.0  ;;  %v6104_v43 = vld [vmem:[%s8174_s5 + $0x2a8] sm:$0xff] }
 0x379   : > { %v6048_v46 = vld [vmem:[%s8174_s5 + $0xe8] sm:$0xff] }
 0x37a   : > { %v2356_v54 = vpop.f32.mrf.mxu2  ;;  %v7062_v47 = vpop.xlane.xlu0 %4188 }
 0x37b   : > { %v3570_v57 = vmax.f32 %v2356_v54, 0.0  ;;  %8186 = vst [vmem:[#allocation9_spill] sm:$0xff] %v7062_v47 }
 0x37c   : > { %v3007_v59 = vpop.f32.mrf.mxu3 }
 0x37d   : > { %v2078_v62 = vpop.f32.mrf.mxu0  ;;  %v4232_v0 = vadd.f32 %v3571_v53, %v3570_v57  ;;  %v3573_v10 = vmax.f32 %v3007_v59, 0.0 }
 0x37e   : > { %v3348_v5 = vmax.f32 %v2078_v62, 0.0 }
 0x37f   : > { %v2730_v35 = vpop.f32.mrf.mxu1  ;;  %4233 = vadd.xlane.f32.xlu0 %v4232_v0  ;;  %3897 = vadd.xlane.f32.xlu2 %v3896_v26  ;;  %v7064_v57 = vpop.xlane.xlu2 %4185 }
 0x380   : > { %v3899_v19 = vadd.f32 %v3349_v7, %v3348_v5  ;;  %v3351_v28 = vmax.f32 %v2730_v35, 0.0  ;;  %8187 = vst [vmem:[#allocation10_spill] sm:$0xff] %v7064_v57 }
 0x381   : > { %5972 = vmatmul.msk.bf16.gmra.mxu3 %vm1580_vm3, %v6103_v27 }
 0x382   : > { %v2358_v49 = vpop.f32.mrf.mxu2  ;;  %5916 = vmatmul.msk.bf16.gmra.mxu1 %vm1580_vm3, %v6047_v2  ;;  %v7057_v44 = vpop.xlane.xlu1 %4191 }
 0x383   : > { %v3572_v9 = vmax.f32 %v2358_v49, 0.0  ;;  %8185 = vst [vmem:[#allocation8_spill] sm:$0xff] %v7057_v44  ;;  %v7070_v7 = vpop.xlane.xlu0 %3855 }
 0x384   : > { %v3010_v18 = vpop.f32.mrf.mxu3 }
 0x385   : > { %v2081_v20 = vpop.f32.mrf.mxu0  ;;  %v4235_v22 = vadd.f32 %v3573_v10, %v3572_v9  ;;  %v3575_v29 = vmax.f32 %v3010_v18, 0.0 }
 0x386   : > { %v3350_v24 = vmax.f32 %v2081_v20, 0.0 }
 0x387   : > { %5844 = vmatmul.msk.bf16.gmra.mxu2 %vm1580_vm3, %v6103_v27  ;;  %v2732_v14 = vpop.f32.mrf.mxu1  ;;  %4236 = vadd.xlane.f32.xlu1 %v4235_v22  ;;  %v7074_v18 = vpop.xlane.xlu2 %3852 }
 0x388   : > { %5788 = vmatmul.msk.bf16.gmra.mxu0 %vm1580_vm3, %v6047_v2  ;;  %3900 = vadd.xlane.f32.xlu0 %v3899_v19  ;;  %v3902_v40 = vadd.f32 %v3351_v28, %v3350_v24  ;;  %v3353_v54 = vmax.f32 %v2732_v14, 0.0 }
 0x38a   : > { %v2361_v33 = vpop.f32.mrf.mxu2 }
 0x38b   : > { %v3574_v45 = vmax.f32 %v2361_v33, 0.0  ;;  %v7068_v5 = vpop.xlane.xlu1 %3858 }
 0x38c   : > { %v3012_v25 = vpop.f32.mrf.mxu3 }
 0x38d   : > { %v2083_v42 = vpop.f32.mrf.mxu0  ;;  %v4238_v51 = vadd.f32 %v3575_v29, %v3574_v45  ;;  %v3577_v62 = vmax.f32 %v3012_v25, 0.0  ;;  %v6105_v29 = vld [vmem:[%s8174_s5 + $0x2b0] sm:$0xff] }
 0x38e   : > { %v3352_v53 = vmax.f32 %v2083_v42, 0.0  ;;  %v6049_v45 = vld [vmem:[%s8174_s5 + $0xf0] sm:$0xff] }
 0x38f   : > { %v2735_v52 = vpop.f32.mrf.mxu1  ;;  %4239 = vadd.xlane.f32.xlu2 %v4238_v51  ;;  %3903 = vadd.xlane.f32.xlu1 %v3902_v40 }
 0x390   : > { %v3905_v0 = vadd.f32 %v3353_v54, %v3352_v53  ;;  %v3355_v9 = vmax.f32 %v2735_v52, 0.0  ;;  %v7088_v52 = vpop.xlane.xlu2 %4194 }
 0x391   : > { %5973 = vmatmul.msk.bf16.gmra.mxu3 %vm1580_vm3, %v6104_v43  ;;  %8190 = vst [vmem:[#allocation13_spill] sm:$0xff] %v7088_v52 }
 0x392   : > { %v2363_v26 = vpop.f32.mrf.mxu2  ;;  %5917 = vmatmul.msk.bf16.gmra.mxu1 %vm1580_vm3, %v6048_v46  ;;  %v7084_v51 = vpop.xlane.xlu0 %4197 }
 0x393   : > { %v3576_v59 = vmax.f32 %v2363_v26, 0.0  ;;  %8189 = vst [vmem:[#allocation12_spill] sm:$0xff] %v7084_v51 }
 0x394   : > { %v3015_v27 = vpop.f32.mrf.mxu3 }
 0x395   : > { %v2086_v2 = vpop.f32.mrf.mxu0  ;;  %v4241_v35 = vadd.f32 %v3577_v62, %v3576_v59  ;;  %v3579_v19 = vmax.f32 %v3015_v27, 0.0 }
 0x396   : > { %v3354_v49 = vmax.f32 %v2086_v2, 0.0 }
 0x397   : > { %5845 = vmatmul.msk.bf16.gmra.mxu2 %vm1580_vm3, %v6104_v43  ;;  %v2737_v10 = vpop.f32.mrf.mxu1  ;;  %4242 = vadd.xlane.f32.xlu0 %v4241_v35 }
 0x398   : > { %5789 = vmatmul.msk.bf16.gmra.mxu0 %vm1580_vm3, %v6048_v46  ;;  %3906 = vadd.xlane.f32.xlu2 %v3905_v0  ;;  %v3908_v24 = vadd.f32 %v3355_v9, %v3354_v49  ;;  %v3357_v43 = vmax.f32 %v2737_v10, 0.0 }
 0x39a   : > { %v2366_v20 = vpop.f32.mrf.mxu2  ;;  %v7082_v25 = vpop.xlane.xlu1 %4200 }
 0x39b   : > { %v3578_v22 = vmax.f32 %v2366_v20, 0.0  ;;  %8188 = vst [vmem:[#allocation11_spill] sm:$0xff] %v7082_v25  ;;  %v3865_v9 = vpop.xlane.xlu0 %3864  ;;  %v7092_v20 = vpop.xlane.xlu2 %3861 }
 0x39c   : > { %v3017_v28 = vpop.f32.mrf.mxu3 }
 0x39d   : > { %v2088_v14 = vpop.f32.mrf.mxu0  ;;  %v4244_v33 = vadd.f32 %v3579_v19, %v3578_v22  ;;  %v3581_v54 = vmax.f32 %v3017_v28, 0.0 }
 0x39e   : > { %v3356_v42 = vmax.f32 %v2088_v14, 0.0 }
 0x39f   : > { %v2740_v40 = vpop.f32.mrf.mxu1  ;;  %4245 = vadd.xlane.f32.xlu1 %v4244_v33  ;;  %3909 = vadd.xlane.f32.xlu0 %v3908_v24  ;;  %v6106_v33 = vld [vmem:[%s8174_s5 + $0x2b8] sm:$0xff] }
 0x3a0   : > { %v3911_v59 = vadd.f32 %v3357_v43, %v3356_v42  ;;  %v3359_v2 = vmax.f32 %v2740_v40, 0.0  ;;  %v6050_v40 = vld [vmem:[%s8174_s5 + $0xf8] sm:$0xff] }
 0x3a1   : > { %5974 = vmatmul.msk.bf16.gmra.mxu3 %vm1580_vm3, %v6105_v29 }
 0x3a2   : > { %v2368_v46 = vpop.f32.mrf.mxu2  ;;  %5918 = vmatmul.msk.bf16.gmra.mxu1 %vm1580_vm3, %v6049_v45  ;;  %v3868_v49 = vpop.xlane.xlu1 %3867 }
 0x3a3   : > { %v3580_v53 = vmax.f32 %v2368_v46, 0.0 }
 0x3a4   : > { %v3020_v26 = vpop.f32.mrf.mxu3 }
 0x3a5   : > { %v2091_v62 = vpop.f32.mrf.mxu0  ;;  %v4247_v27 = vadd.f32 %v3581_v54, %v3580_v53  ;;  %v3583_v10 = vmax.f32 %v3020_v26, 0.0 }
 0x3a6   : > { %v3358_v0 = vmax.f32 %v2091_v62, 0.0 }
 0x3a7   : > { %5846 = vmatmul.msk.bf16.gmra.mxu2 %vm1580_vm3, %v6105_v29  ;;  %v2742_v35 = vpop.f32.mrf.mxu1  ;;  %4248 = vadd.xlane.f32.xlu2 %v4247_v27 }
 0x3a8   : > { %5790 = vmatmul.msk.bf16.gmra.mxu0 %vm1580_vm3, %v6049_v45  ;;  %3912 = vadd.xlane.f32.xlu1 %v3911_v59  ;;  %v3914_v24 = vadd.f32 %v3359_v2, %v3358_v0  ;;  %v3361_v43 = vmax.f32 %v2742_v35, 0.0  ;;  %v7106_v0 = vpop.xlane.xlu2 %4203 }
 0x3a9   : > { %8193 = vst [vmem:[#allocation16_spill] sm:$0xff] %v7106_v0 }
 0x3aa   : > { %v2371_v19 = vpop.f32.mrf.mxu2  ;;  %v7104_v54 = vpop.xlane.xlu0 %4206 }
 0x3ab   : > { %v3582_v22 = vmax.f32 %v2371_v19, 0.0  ;;  %8192 = vst [vmem:[#allocation15_spill] sm:$0xff] %v7104_v54 }
 0x3ac   : > { %v3022_v28 = vpop.f32.mrf.mxu3 }
 0x3ad   : > { %v2093_v14 = vpop.f32.mrf.mxu0  ;;  %v4250_v29 = vadd.f32 %v3583_v10, %v3582_v22  ;;  %v3585_v59 = vmax.f32 %v3022_v28, 0.0 }
 0x3ae   : > { %v3360_v42 = vmax.f32 %v2093_v14, 0.0 }
 0x3af   : > { %v2745_v45 = vpop.f32.mrf.mxu1  ;;  %3915 = vadd.xlane.f32.xlu2 %v3914_v24  ;;  %4251 = vadd.xlane.f32.xlu0 %v4250_v29 }
 0x3b0   : > { %v3917_v27 = vadd.f32 %v3361_v43, %v3360_v42  ;;  %v3363_v22 = vmax.f32 %v2745_v45, 0.0 }
 0x3b1   : > { %5975 = vmatmul.msk.bf16.gmra.mxu3 %vm1580_vm3, %v6106_v33 }
 0x3b2   : > { %v2373_v46 = vpop.f32.mrf.mxu2  ;;  %v7101_v53 = vpop.xlane.xlu1 %4209  ;;  %5919 = vmatmul.msk.bf16.gmra.mxu1 %vm1580_vm3, %v6050_v40 }
 0x3b3   : > { %8191 = vst [vmem:[#allocation14_spill] sm:$0xff] %v7101_v53  ;;  %v3584_v26 = vmax.f32 %v2373_v46, 0.0  ;;  %v3874_v29 = vpop.xlane.xlu0 %3873 }
 0x3b4   : > { %v3025_v62 = vpop.f32.mrf.mxu3  ;;  %v4587_v42 = vmul.f32 %v6945_v17, %v3874_v29 }
 0x3b5   : > { %v2096_v2 = vpop.f32.mrf.mxu0  ;;  %v4253_v10 = vadd.f32 %v3585_v59, %v3584_v26  ;;  %v3587_v24 = vmax.f32 %v3025_v62, 0.0  ;;  %v3871_v59 = vpop.xlane.xlu2 %3870 }
 0x3b6   : > { %v3362_v19 = vmax.f32 %v2096_v2, 0.0 }
 0x3b7   : > { %5847 = vmatmul.msk.bf16.gmra.mxu2 %vm1580_vm3, %v6106_v33  ;;  %v2747_v35 = vpop.f32.mrf.mxu1  ;;  %4254 = vadd.xlane.f32.xlu1 %v4253_v10  ;;  %v6107_v33 = vld [vmem:[%s8174_s5 + $0x2c0] sm:$0xff] }
 0x3b8   : > { %5791 = vmatmul.msk.bf16.gmra.mxu0 %vm1580_vm3, %v6050_v40  ;;  %3918 = vadd.xlane.f32.xlu0 %v3917_v27  ;;  %v3920_v11 = vadd.f32 %v3363_v22, %v3362_v19  ;;  %v4586_v40 = vmul.f32 %v6945_v17, %v3871_v59  ;;  %v3365_v27 = vmax.f32 %v2747_v35, 0.0  ;;  %v6051_v19 = vld [vmem:[%s8174_s5 + $0x100] sm:$0xff]  ;;  %v4585_v22 = vmul.f32 %v6945_v17, %v3868_v49 }
 0x3b9   : > { %v4582_v49 = vmul.f32 %v6945_v17, %v7068_v5 }
 0x3ba   : > { %v2376_v14 = vpop.f32.mrf.mxu2 }
 0x3bb   : > { %v3586_v46 = vmax.f32 %v2376_v14, 0.0  ;;  %v3877_v28 = vpop.xlane.xlu1 %3876  ;;  %v4584_v14 = vmul.f32 %v6945_v17, %v3865_v9 }
 0x3bc   : > { %v4588_v43 = vmul.f32 %v6945_v17, %v3877_v28  ;;  %v3027_v26 = vpop.f32.mrf.mxu3  ;;  %v4583_v28 = vmul.f32 %v6945_v17, %v7092_v20 }
 0x3bd   : > { %v2098_v45 = vpop.f32.mrf.mxu0  ;;  %v4256_v2 = vadd.f32 %v3587_v24, %v3586_v46  ;;  %v3589_v46 = vmax.f32 %v3027_v26, 0.0 }
 0x3be   : > { %4879 = vmatpush.msra.mxu1 %v4588_v43  ;;  %v3364_v62 = vmax.f32 %v2098_v45, 0.0 }
 0x3bf   : > { %v2750_v10 = vpop.f32.mrf.mxu1  ;;  %4257 = vadd.xlane.f32.xlu2 %v4256_v2  ;;  %3921 = vadd.xlane.f32.xlu1 %v3920_v11  ;;  %v4580_v2 = vmul.f32 %v6945_v17, %v7074_v18 }
 0x3c0   : > { %4880 = vmatpush.msra.mxu1 %v4587_v42  ;;  %v3923_v35 = vadd.f32 %v3365_v27, %v3364_v62  ;;  %v4581_v42 = vmul.f32 %v6945_v17, %v7070_v7  ;;  %v3367_v20 = vmax.f32 %v2750_v10, 0.0  ;;  %v6108_v7 = vld [vmem:[%s8174_s5 + $0x2c8] sm:$0xff] }
 0x3c1   : > { %5976 = vmatmul.msk.bf16.gmra.mxu3 %vm1580_vm3, %v6107_v33 }
 0x3c2   : > { %4881 = vmatpush.msra.mxu1 %v4586_v40  ;;  %v2378_v24 = vpop.f32.mrf.mxu2 }
 0x3c3   : > { %v3588_v29 = vmax.f32 %v2378_v24, 0.0  ;;  %5920 = vmatmul.msk.bf16.gmra.mxu1 %vm1580_vm3, %v6051_v19 }
 0x3c4   : > { %4882 = vmatpush.msra.mxu1 %v4585_v22  ;;  %v3030_v43 = vpop.f32.mrf.mxu3  ;;  %v4578_v22 = vmul.f32 %v6945_v17, %v7048_v55 }
 0x3c5   : > { %v2101_v11 = vpop.f32.mrf.mxu0  ;;  %v4259_v59 = vadd.f32 %v3589_v46, %v3588_v29  ;;  %v3591_v45 = vmax.f32 %v3030_v43, 0.0  ;;  %v4576_v46 = vmul.f32 %v6945_v17, %v7023_v37  ;;  %v4575_v43 = vmul.f32 %v6945_v17, %v7026_v38 }
 0x3c6   : > { %4883 = vmatpush.msra.mxu1 %v4584_v14  ;;  %v3366_v26 = vmax.f32 %v2101_v11, 0.0  ;;  %v6052_v14 = vld [vmem:[%s8174_s5 + $0x108] sm:$0xff] }
 0x3c7   : > { %5848 = vmatmul.msk.bf16.gmra.mxu2 %vm1580_vm3, %v6107_v33  ;;  %v2752_v9 = vpop.f32.mrf.mxu1  ;;  %3924 = vadd.xlane.f32.xlu2 %v3923_v35  ;;  %v4579_v33 = vmul.f32 %v6945_v17, %v7046_v13  ;;  %v4577_v13 = vmul.f32 %v6945_v17, %v7050_v23 }
 0x3c8   : > { %5792 = vmatmul.msk.bf16.gmra.mxu0 %vm1580_vm3, %v6051_v19  ;;  %4884 = vmatpush.msra.mxu1 %v4583_v28  ;;  %v3926_v10 = vadd.f32 %v3367_v20, %v3366_v26  ;;  %v3369_v29 = vmax.f32 %v2752_v9, 0.0  ;;  %v4574_v26 = vmul.f32 %v6945_v17, %v7028_v4  ;;  %v7154_v20 = vpop.xlane.xlu2 %4212  ;;  %v6109_v4 = vld [vmem:[%s8174_s5 + $0x2d0] sm:$0xff] }
 0x3c9   : > { %4260 = vadd.xlane.f32.xlu0 %v4259_v59  ;;  %8194 = vst [vmem:[#allocation17_spill] sm:$0xff] %v7154_v20 }
 0x3ca   : > { %4885 = vmatpush.msra.mxu1 %v4582_v49  ;;  %v2381_v5 = vpop.f32.mrf.mxu2 }
 0x3cb   : > { %v3590_v40 = vmax.f32 %v2381_v5, 0.0 }
 0x3cc   : > { %4886 = vmatpush.msra.mxu1 %v4581_v42  ;;  %v3032_v62 = vpop.f32.mrf.mxu3 }
 0x3cd   : > { %v2103_v27 = vpop.f32.mrf.mxu0  ;;  %v4262_v19 = vadd.f32 %v3591_v45, %v3590_v40  ;;  %v3593_v28 = vmax.f32 %v3032_v62, 0.0  ;;  %v4573_v45 = vmul.f32 %v6945_v17, %v7004_v60 }
 0x3ce   : > { %4887 = vmatpush.msra.mxu1 %v4580_v2  ;;  %v3368_v24 = vmax.f32 %v2103_v27, 0.0 }
 0x3cf   : > { %v2755_v18 = vpop.f32.mrf.mxu1  ;;  %4263 = vadd.xlane.f32.xlu1 %v4262_v19  ;;  %v6053_v19 = vld [vmem:[%s8174_s5 + $0x110] sm:$0xff] }
 0x3d0   : > { %4888 = vmatpush.msra.mxu1 %v4579_v33  ;;  %v3929_v49 = vadd.f32 %v3369_v29, %v3368_v24  ;;  %v3371_v42 = vmax.f32 %v2755_v18, 0.0 }
 0x3d1   : > { %5977 = vmatmul.msk.bf16.gmra.mxu3 %vm1580_vm3, %v6108_v7  ;;  %3927 = vadd.xlane.f32.xlu0 %v3926_v10 }
 0x3d2   : > { %4889 = vmatpush.msra.mxu1 %v4578_v22  ;;  %v2383_v55 = vpop.f32.mrf.mxu2  ;;  %v7165_v22 = vpop.xlane.xlu2 %3879 }
 0x3d3   : > { %v3592_v35 = vmax.f32 %v2383_v55, 0.0  ;;  %5921 = vmatmul.msk.bf16.gmra.mxu1 %vm1580_vm3, %v6052_v14 }
 0x3d4   : > { %4890 = vmatpush.msra.mxu1 %v4577_v13  ;;  %v3035_v23 = vpop.f32.mrf.mxu3 }
 0x3d5   : > { %v2106_v11 = vpop.f32.mrf.mxu0  ;;  %v4265_v59 = vadd.f32 %v3593_v28, %v3592_v35  ;;  %v3595_v38 = vmax.f32 %v3035_v23, 0.0 }
 0x3d6   : > { %4891 = vmatpush.msra.mxu1 %v4576_v46  ;;  %v3370_v9 = vmax.f32 %v2106_v11, 0.0  ;;  %v7171_v11 = vpop.xlane.xlu1 %4218 }
 0x3d7   : > { %5849 = vmatmul.msk.bf16.gmra.mxu2 %vm1580_vm3, %v6108_v7  ;;  %v2757_v37 = vpop.f32.mrf.mxu1  ;;  %4266 = vadd.xlane.f32.xlu2 %v4265_v59  ;;  %8195 = vst [vmem:[#allocation18_spill] sm:$0xff] %v7171_v11 }
 0x3d8   : > { %5793 = vmatmul.msk.bf16.gmra.mxu0 %vm1580_vm3, %v6052_v14  ;;  %4892 = vmatpush.msra.mxu1 %v4575_v43  ;;  %v3932_v40 = vadd.f32 %v3371_v42, %v3370_v9  ;;  %v3373_v10 = vmax.f32 %v2757_v37, 0.0 }
 0x3d9   : > { %3930 = vadd.xlane.f32.xlu1 %v3929_v49 }
 0x3da   : > { %4893 = vmatpush.msra.mxu1 %v4574_v26  ;;  %v2386_v2 = vpop.f32.mrf.mxu2  ;;  %v7173_v49 = vpop.xlane.xlu2 %4221 }
 0x3db   : > { %v3594_v5 = vmax.f32 %v2386_v2, 0.0  ;;  %8196 = vst [vmem:[#allocation19_spill] sm:$0xff] %v7173_v49  ;;  %v7175_v26 = vpop.xlane.xlu0 %4215 }
 0x3dc   : > { %4894 = vmatpush.msra.mxu1 %v4573_v45  ;;  %v3037_v33 = vpop.f32.mrf.mxu3  ;;  %8197 = vst [vmem:[#allocation20_spill] sm:$0xff] %v7175_v26  ;;  %v6110_v45 = vld [vmem:[%s8174_s5 + $0x2d8] sm:$0xff] }
 0x3dd   : > { %v2108_v62 = vpop.f32.mrf.mxu0  ;;  %v4268_v27 = vadd.f32 %v3595_v38, %v3594_v5  ;;  %v3597_v13 = vmax.f32 %v3037_v33, 0.0 }
 0x3de   : > { %v3372_v60 = vmax.f32 %v2108_v62, 0.0 }
 0x3df   : > { %v2760_v7 = vpop.f32.mrf.mxu1  ;;  %4269 = vadd.xlane.f32.xlu0 %v4268_v27  ;;  %3933 = vadd.xlane.f32.xlu2 %v3932_v40  ;;  %v6054_v40 = vld [vmem:[%s8174_s5 + $0x118] sm:$0xff] }
 0x3e0   : > { %v3935_v29 = vadd.f32 %v3373_v10, %v3372_v60  ;;  %v3375_v28 = vmax.f32 %v2760_v7, 0.0 }
 0x3e1   : > { %5978 = vmatmul.msk.bf16.gmra.mxu3 %vm1580_vm3, %v6109_v4 }
 0x3e2   : > { %v2388_v18 = vpop.f32.mrf.mxu2  ;;  %v7186_v7 = vpop.xlane.xlu2 %3888 }
 0x3e3   : > { %v3596_v14 = vmax.f32 %v2388_v18, 0.0  ;;  %5922 = vmatmul.msk.bf16.gmra.mxu1 %vm1580_vm3, %v6053_v19  ;;  %v7189_v18 = vpop.xlane.xlu0 %3882 }
 0x3e4   : > { %v3040_v24 = vpop.f32.mrf.mxu3 }
 0x3e5   : > { %v2111_v46 = vpop.f32.mrf.mxu0  ;;  %v4271_v55 = vadd.f32 %v3597_v13, %v3596_v14  ;;  %v3599_v23 = vmax.f32 %v3040_v24, 0.0 }
 0x3e6   : > { %v3374_v35 = vmax.f32 %v2111_v46, 0.0 }
 0x3e7   : > { %5850 = vmatmul.msk.bf16.gmra.mxu2 %vm1580_vm3, %v6109_v4  ;;  %v2762_v43 = vpop.f32.mrf.mxu1  ;;  %4272 = vadd.xlane.f32.xlu1 %v4271_v55  ;;  %v7184_v4 = vpop.xlane.xlu1 %3885 }
 0x3e8   : > { %5794 = vmatmul.msk.bf16.gmra.mxu0 %vm1580_vm3, %v6053_v19  ;;  %3936 = vadd.xlane.f32.xlu0 %v3935_v29  ;;  %v3938_v42 = vadd.f32 %v3375_v28, %v3374_v35  ;;  %v3377_v62 = vmax.f32 %v2762_v43, 0.0 }
 0x3ea   : > { %v2391_v59 = vpop.f32.mrf.mxu2 }
 0x3eb   : > { %v3598_v9 = vmax.f32 %v2391_v59, 0.0 }
 0x3ec   : > { %v3042_v37 = vpop.f32.mrf.mxu3 }
 0x3ed   : > { %v2113_v38 = vpop.f32.mrf.mxu0  ;;  %v4274_v2 = vadd.f32 %v3599_v23, %v3598_v9  ;;  %v3601_v60 = vmax.f32 %v3042_v37, 0.0 }
 0x3ee   : > { %v3376_v33 = vmax.f32 %v2113_v38, 0.0  ;;  %v6111_v38 = vld [vmem:[%s8174_s5 + $0x2e0] sm:$0xff] }
 0x3ef   : > { %v2765_v5 = vpop.f32.mrf.mxu1  ;;  %4275 = vadd.xlane.f32.xlu2 %v4274_v2  ;;  %3939 = vadd.xlane.f32.xlu1 %v3938_v42  ;;  %v7193_v23 = vpop.xlane.xlu1 %4227 }
 0x3f0   : > { %v3941_v14 = vadd.f32 %v3377_v62, %v3376_v33  ;;  %v3379_v46 = vmax.f32 %v2765_v5, 0.0  ;;  %8198 = vst [vmem:[#allocation21_spill] sm:$0xff] %v7193_v23  ;;  %v7195_v42 = vpop.xlane.xlu2 %4230  ;;  %v7200_v2 = vpop.xlane.xlu0 %4224 }
 0x3f1   : > { %5979 = vmatmul.msk.bf16.gmra.mxu3 %vm1580_vm3, %v6110_v45  ;;  %8199 = vst [vmem:[#allocation22_spill] sm:$0xff] %v7200_v2 }
 0x3f2   : > { %v2393_v27 = vpop.f32.mrf.mxu2 }
 0x3f3   : > { %v3600_v19 = vmax.f32 %v2393_v27, 0.0  ;;  %5923 = vmatmul.msk.bf16.gmra.mxu1 %vm1580_vm3, %v6054_v40 }
 0x3f4   : > { %v3045_v10 = vpop.f32.mrf.mxu3 }
 0x3f5   : > { %v2116_v13 = vpop.f32.mrf.mxu0  ;;  %v4277_v24 = vadd.f32 %v3601_v60, %v3600_v19  ;;  %v3603_v35 = vmax.f32 %v3045_v10, 0.0 }
 0x3f6   : > { %v3378_v29 = vmax.f32 %v2116_v13, 0.0 }
 0x3f7   : > { %5851 = vmatmul.msk.bf16.gmra.mxu2 %vm1580_vm3, %v6110_v45  ;;  %v2767_v55 = vpop.f32.mrf.mxu1  ;;  %4278 = vadd.xlane.f32.xlu0 %v4277_v24  ;;  %v7207_v10 = vpop.xlane.xlu1 %3894 }
 0x3f8   : > { %5795 = vmatmul.msk.bf16.gmra.mxu0 %vm1580_vm3, %v6054_v40  ;;  %3942 = vadd.xlane.f32.xlu2 %v3941_v14  ;;  %v3944_v59 = vadd.f32 %v3379_v46, %v3378_v29  ;;  %v6055_v40 = vld [vmem:[%s8174_s5 + $0x120] sm:$0xff]  ;;  %v3381_v62 = vmax.f32 %v2767_v55, 0.0  ;;  %v7209_v13 = vpop.xlane.xlu2 %3897 }
 0x3fa   : > { %v2396_v28 = vpop.f32.mrf.mxu2 }
 0x3fb   : > { %v3602_v43 = vmax.f32 %v2396_v28, 0.0 }
 0x3fc   : > { %v3047_v9 = vpop.f32.mrf.mxu3 }
 0x3fd   : > { %v2118_v37 = vpop.f32.mrf.mxu0  ;;  %v4280_v45 = vadd.f32 %v3603_v35, %v3602_v43  ;;  %v3605_v60 = vmax.f32 %v3047_v9, 0.0  ;;  %v7211_v35 = vpop.xlane.xlu0 %3891 }
 0x3fe   : > { %v3380_v33 = vmax.f32 %v2118_v37, 0.0 }
 0x3ff   : > { %v2770_v5 = vpop.f32.mrf.mxu1  ;;  %4281 = vadd.xlane.f32.xlu1 %v4280_v45  ;;  %3945 = vadd.xlane.f32.xlu0 %v3944_v59 }
 0x400   : > { %v3947_v24 = vadd.f32 %v3381_v62, %v3380_v33  ;;  %v3383_v43 = vmax.f32 %v2770_v5, 0.0  ;;  %v6112_v33 = vld [vmem:[%s8174_s5 + $0x2e8] sm:$0xff]  ;;  %v7218_v62 = vpop.xlane.xlu1 %4236 }
 0x401   : > { %5980 = vmatmul.msk.bf16.gmra.mxu3 %vm1580_vm3, %v6111_v38 }
 0x402   : > { %v2398_v27 = vpop.f32.mrf.mxu2 }
 0x403   : > { %v3604_v19 = vmax.f32 %v2398_v27, 0.0  ;;  %5924 = vmatmul.msk.bf16.gmra.mxu1 %vm1580_vm3, %v6055_v40 }
 0x404   : > { %v3050_v14 = vpop.f32.mrf.mxu3 }
 0x405   : > { %v2121_v29 = vpop.f32.mrf.mxu0  ;;  %v4283_v46 = vadd.f32 %v3605_v60, %v3604_v19  ;;  %v3607_v59 = vmax.f32 %v3050_v14, 0.0  ;;  %v7220_v19 = vpop.xlane.xlu2 %4239 }
 0x406   : > { %v3382_v28 = vmax.f32 %v2121_v29, 0.0 }
 0x407   : > { %5852 = vmatmul.msk.bf16.gmra.mxu2 %vm1580_vm3, %v6111_v38  ;;  %v2772_v55 = vpop.f32.mrf.mxu1  ;;  %4284 = vadd.xlane.f32.xlu2 %v4283_v46 }
 0x408   : > { %5796 = vmatmul.msk.bf16.gmra.mxu0 %vm1580_vm3, %v6055_v40  ;;  %3948 = vadd.xlane.f32.xlu1 %v3947_v24  ;;  %v3950_v45 = vadd.f32 %v3383_v43, %v3382_v28  ;;  %v6056_v40 = vld [vmem:[%s8174_s5 + $0x128] sm:$0xff]  ;;  %v3385_v14 = vmax.f32 %v2772_v55, 0.0  ;;  %v7225_v24 = vpop.xlane.xlu0 %4233 }
 0x40a   : > { %v2401_v9 = vpop.f32.mrf.mxu2 }
 0x40b   : > { %v3606_v37 = vmax.f32 %v2401_v9, 0.0 }
 0x40c   : > { %v3052_v27 = vpop.f32.mrf.mxu3 }
 0x40d   : > { %v2123_v50 = vpop.f32.mrf.mxu0  ;;  %v4286_v5 = vadd.f32 %v3607_v59, %v3606_v37  ;;  %v3609_v28 = vmax.f32 %v3052_v27, 0.0  ;;  %v7229_v37 = vpop.xlane.xlu1 %3903 }
 0x40e   : > { %v3384_v60 = vmax.f32 %v2123_v50, 0.0  ;;  %v7231_v3 = vpop.xlane.xlu2 %3906 }
 0x40f   : > { %v2775_v38 = vpop.f32.mrf.mxu1  ;;  %4287 = vadd.xlane.f32.xlu0 %v4286_v5  ;;  %3951 = vadd.xlane.f32.xlu2 %v3950_v45 }
 0x410   : > { %v3953_v59 = vadd.f32 %v3385_v14, %v3384_v60  ;;  %v3387_v50 = vmax.f32 %v2775_v38, 0.0  ;;  %v7235_v5 = vpop.xlane.xlu0 %3900 }
 0x411   : > { %5981 = vmatmul.msk.bf16.gmra.mxu3 %vm1580_vm3, %v6112_v33 }
 0x412   : > { %v2403_v29 = vpop.f32.mrf.mxu2 }
 0x413   : > { %v3608_v46 = vmax.f32 %v2403_v29, 0.0  ;;  %5925 = vmatmul.msk.bf16.gmra.mxu1 %vm1580_vm3, %v6056_v40 }
 0x414   : > { %v3055_v43 = vpop.f32.mrf.mxu3 }
 0x415   : > { %v2126_v9 = vpop.f32.mrf.mxu0  ;;  %v4289_v15 = vadd.f32 %v3609_v28, %v3608_v46  ;;  %v3611_v27 = vmax.f32 %v3055_v43, 0.0  ;;  %v6113_v46 = vld [vmem:[%s8174_s5 + $0x2f0] sm:$0xff] }
 0x416   : > { %v3386_v45 = vmax.f32 %v2126_v9, 0.0 }
 0x417   : > { %5853 = vmatmul.msk.bf16.gmra.mxu2 %vm1580_vm3, %v6112_v33  ;;  %v2777_v55 = vpop.f32.mrf.mxu1  ;;  %4290 = vadd.xlane.f32.xlu1 %v4289_v15  ;;  %v6057_v15 = vld [vmem:[%s8174_s5 + $0x130] sm:$0xff]  ;;  %v7243_v33 = vpop.xlane.xlu1 %4245 }
 0x418   : > { %5797 = vmatmul.msk.bf16.gmra.mxu0 %vm1580_vm3, %v6056_v40  ;;  %3954 = vadd.xlane.f32.xlu0 %v3953_v59  ;;  %v3956_v14 = vadd.f32 %v3387_v50, %v3386_v45  ;;  %v3389_v43 = vmax.f32 %v2777_v55, 0.0  ;;  %v7248_v45 = vpop.xlane.xlu0 %4242 }
 0x41a   : > { %v2406_v29 = vpop.f32.mrf.mxu2  ;;  %v7245_v59 = vpop.xlane.xlu2 %4248 }
 0x41b   : > { %v3610_v60 = vmax.f32 %v2406_v29, 0.0 }
 0x41c   : > { %v3057_v16 = vpop.f32.mrf.mxu3 }
 0x41d   : > { %v2128_v30 = vpop.f32.mrf.mxu0  ;;  %v4292_v38 = vadd.f32 %v3611_v27, %v3610_v60  ;;  %v3613_v27 = vmax.f32 %v3057_v16, 0.0 }
 0x41e   : > { %v3388_v40 = vmax.f32 %v2128_v30, 0.0 }
 0x41f   : > { %v2780_v28 = vpop.f32.mrf.mxu1  ;;  %4293 = vadd.xlane.f32.xlu2 %v4292_v38  ;;  %3957 = vadd.xlane.f32.xlu1 %v3956_v14  ;;  %v7252_v55 = vpop.xlane.xlu1 %3912 }
 0x420   : > { %v3959_v60 = vadd.f32 %v3389_v43, %v3388_v40  ;;  %v3391_v38 = vmax.f32 %v2780_v28, 0.0  ;;  %v3910_v52 = vpop.xlane.xlu0 %3909 }
 0x421   : > { %5982 = vmatmul.msk.bf16.gmra.mxu3 %vm1580_vm3, %v6113_v46 }
 0x422   : > { %v2408_v9 = vpop.f32.mrf.mxu2  ;;  %v3916_v14 = vpop.xlane.xlu2 %3915 }
 0x423   : > { %v3612_v50 = vmax.f32 %v2408_v9, 0.0  ;;  %5926 = vmatmul.msk.bf16.gmra.mxu1 %vm1580_vm3, %v6057_v15 }
 0x424   : > { %v3060_v29 = vpop.f32.mrf.mxu3 }
 0x425   : > { %v2131_v57 = vpop.f32.mrf.mxu0  ;;  %v4295_v47 = vadd.f32 %v3613_v27, %v3612_v50  ;;  %v3615_v9 = vmax.f32 %v3060_v29, 0.0 }
 0x426   : > { %v3390_v44 = vmax.f32 %v2131_v57, 0.0  ;;  %v6114_v57 = vld [vmem:[%s8174_s5 + $0x2f8] sm:$0xff] }
 0x427   : > { %5854 = vmatmul.msk.bf16.gmra.mxu2 %vm1580_vm3, %v6113_v46  ;;  %v2782_v30 = vpop.f32.mrf.mxu1  ;;  %4296 = vadd.xlane.f32.xlu0 %v4295_v47  ;;  %v6058_v47 = vld [vmem:[%s8174_s5 + $0x138] sm:$0xff] }
 0x428   : > { %5798 = vmatmul.msk.bf16.gmra.mxu0 %vm1580_vm3, %v6057_v15  ;;  %3960 = vadd.xlane.f32.xlu2 %v3959_v60  ;;  %v3962_v25 = vadd.f32 %v3391_v38, %v3390_v44  ;;  %v3393_v50 = vmax.f32 %v2782_v30, 0.0 }
 0x42a   : > { %v2411_v16 = vpop.f32.mrf.mxu2  ;;  %v7262_v27 = vpop.xlane.xlu1 %4254 }
 0x42b   : > { %v3614_v51 = vmax.f32 %v2411_v16, 0.0 }
 0x42c   : > { %v3062_v40 = vpop.f32.mrf.mxu3 }
 0x42d   : > { %v2133_v43 = vpop.f32.mrf.mxu0  ;;  %v4298_v46 = vadd.f32 %v3615_v9, %v3614_v51  ;;  %v3617_v38 = vmax.f32 %v3062_v40, 0.0  ;;  %v7267_v9 = vpop.xlane.xlu0 %4251 }
 0x42e   : > { %v3392_v15 = vmax.f32 %v2133_v43, 0.0 }
 0x42f   : > { %v2785_v28 = vpop.f32.mrf.mxu1  ;;  %3963 = vadd.xlane.f32.xlu0 %v3962_v25  ;;  %4299 = vadd.xlane.f32.xlu1 %v4298_v46 }
 0x430   : > { %v3965_v16 = vadd.f32 %v3393_v50, %v3392_v15  ;;  %v3395_v46 = vmax.f32 %v2785_v28, 0.0 }
 0x431   : > { %5983 = vmatmul.msk.bf16.gmra.mxu3 %vm1580_vm3, %v6114_v57 }
 0x432   : > { %v2413_v44 = vpop.f32.mrf.mxu2  ;;  %v7264_v29 = vpop.xlane.xlu2 %4257 }
 0x433   : > { %v3616_v60 = vmax.f32 %v2413_v44, 0.0  ;;  %5927 = vmatmul.msk.bf16.gmra.mxu1 %vm1580_vm3, %v6058_v47  ;;  %v3922_v44 = vpop.xlane.xlu1 %3921 }
 0x434   : > { %v3065_v51 = vpop.f32.mrf.mxu3  ;;  %v4603_v15 = vmul.f32 %v6945_v17, %v3922_v44  ;;  %v4599_v44 = vmul.f32 %v6945_v17, %v3910_v52  ;;  %v4596_v52 = vmul.f32 %v6945_v17, %v7235_v5  ;;  %v6116_v5 = vld [vmem:[%s8174_s5 + $0x308] sm:$0xff] }
 0x435   : > { %v2136_v0 = vpop.f32.mrf.mxu0  ;;  %v4301_v25 = vadd.f32 %v3617_v38, %v3616_v60  ;;  %v3619_v54 = vmax.f32 %v3065_v51, 0.0  ;;  %v3919_v60 = vpop.xlane.xlu0 %3918  ;;  %v6059_v51 = vld [vmem:[%s8174_s5 + $0x140] sm:$0xff] }
 0x436   : > { %v3394_v43 = vmax.f32 %v2136_v0, 0.0  ;;  %v6115_v0 = vld [vmem:[%s8174_s5 + $0x300] sm:$0xff]  ;;  %v4602_v28 = vmul.f32 %v6945_v17, %v3919_v60 }
 0x437   : > { %5855 = vmatmul.msk.bf16.gmra.mxu2 %vm1580_vm3, %v6114_v57  ;;  %v2787_v30 = vpop.f32.mrf.mxu1  ;;  %4302 = vadd.xlane.f32.xlu2 %v4301_v25 }
 0x438   : > { %5799 = vmatmul.msk.bf16.gmra.mxu0 %vm1580_vm3, %v6058_v47  ;;  %3966 = vadd.xlane.f32.xlu1 %v3965_v16  ;;  %v3968_v38 = vadd.f32 %v3395_v46, %v3394_v43  ;;  %v3397_v25 = vmax.f32 %v2787_v30, 0.0  ;;  %v4600_v46 = vmul.f32 %v6945_v17, %v7252_v55  ;;  %v4598_v30 = vmul.f32 %v6945_v17, %v7231_v3 }
 0x439   : > { %v4597_v55 = vmul.f32 %v6945_v17, %v7229_v37 }
 0x43a   : > { %v2416_v40 = vpop.f32.mrf.mxu2  ;;  %v3925_v53 = vpop.xlane.xlu2 %3924 }
 0x43b   : > { %v3618_v20 = vmax.f32 %v2416_v40, 0.0  ;;  %v4604_v26 = vmul.f32 %v6945_v17, %v3925_v53  ;;  %v4601_v53 = vmul.f32 %v6945_v17, %v3916_v14 }
 0x43c   : > { %v3067_v50 = vpop.f32.mrf.mxu3 }
 0x43d   : > { %v2138_v57 = vpop.f32.mrf.mxu0  ;;  %4899 = vmatpush.msrb.mxu0 %v4604_v26  ;;  %v4304_v47 = vadd.f32 %v3619_v54, %v3618_v20  ;;  %v3621_v20 = vmax.f32 %v3067_v50, 0.0 }
 0x43e   : > { %v3396_v16 = vmax.f32 %v2138_v57, 0.0 }
 0x43f   : > { %4900 = vmatpush.msrb.mxu0 %v4603_v15  ;;  %4305 = vadd.xlane.f32.xlu0 %v4304_v47 }
 0x440   : > { %v2790_v43 = vpop.f32.mrf.mxu1  ;;  %3969 = vadd.xlane.f32.xlu2 %v3968_v38  ;;  %v3971_v40 = vadd.f32 %v3397_v25, %v3396_v16 }
 0x441   : > { %5984 = vmatmul.msk.bf16.gmra.mxu3 %vm1580_vm3, %v6115_v0  ;;  %4901 = vmatpush.msrb.mxu0 %v4602_v28  ;;  %v3399_v3 = vmax.f32 %v2790_v43, 0.0  ;;  %v4593_v43 = vmul.f32 %v6945_v17, %v7211_v35  ;;  %v4591_v35 = vmul.f32 %v6945_v17, %v7184_v4 }
 0x442   : > { %v2418_v26 = vpop.f32.mrf.mxu2 }
 0x443   : > { %v3620_v54 = vmax.f32 %v2418_v26, 0.0  ;;  %5928 = vmatmul.msk.bf16.gmra.mxu1 %vm1580_vm3, %v6059_v51  ;;  %4902 = vmatpush.msrb.mxu0 %v4601_v53 }
 0x444   : > { %v3070_v14 = vpop.f32.mrf.mxu3 }
 0x445   : > { %v2141_v15 = vpop.f32.mrf.mxu0  ;;  %4903 = vmatpush.msrb.mxu0 %v4600_v46  ;;  %v4307_v60 = vadd.f32 %v3621_v20, %v3620_v54  ;;  %v3623_v38 = vmax.f32 %v3070_v14, 0.0 }
 0x446   : > { %v3398_v57 = vmax.f32 %v2141_v15, 0.0 }
 0x447   : > { %5856 = vmatmul.msk.bf16.gmra.mxu2 %vm1580_vm3, %v6115_v0  ;;  %4904 = vmatpush.msrb.mxu0 %v4599_v44  ;;  %v4595_v0 = vmul.f32 %v6945_v17, %v7209_v13  ;;  %v6060_v13 = vld [vmem:[%s8174_s5 + $0x148] sm:$0xff] }
 0x448   : > { %5800 = vmatmul.msk.bf16.gmra.mxu0 %vm1580_vm3, %v6059_v51  ;;  %v2792_v50 = vpop.f32.mrf.mxu1  ;;  %3972 = vadd.xlane.f32.xlu0 %v3971_v40  ;;  %v4594_v51 = vmul.f32 %v6945_v17, %v7207_v10  ;;  %v3974_v25 = vadd.f32 %v3399_v3, %v3398_v57  ;;  %v4592_v10 = vmul.f32 %v6945_v17, %v7186_v7 }
 0x449   : > { %4905 = vmatpush.msrb.mxu0 %v4598_v30  ;;  %4308 = vadd.xlane.f32.xlu1 %v4307_v60  ;;  %v3401_v54 = vmax.f32 %v2792_v50, 0.0  ;;  %v4590_v60 = vmul.f32 %v6945_v17, %v7189_v18 }
 0x44a   : > { %v2421_v28 = vpop.f32.mrf.mxu2 }
 0x44b   : > { %v3622_v47 = vmax.f32 %v2421_v28, 0.0  ;;  %4906 = vmatpush.msrb.mxu0 %v4597_v55 }
 0x44c   : > { %v3072_v37 = vpop.f32.mrf.mxu3 }
 0x44d   : > { %v2143_v53 = vpop.f32.mrf.mxu0  ;;  %4907 = vmatpush.msrb.mxu0 %v4596_v52  ;;  %v4310_v16 = vadd.f32 %v3623_v38, %v3622_v47  ;;  %v3625_v14 = vmax.f32 %v3072_v37, 0.0  ;;  %v7316_v52 = vpop.xlane.xlu0 %4260  ;;  %v4589_v38 = vmul.f32 %v6945_v17, %v7165_v22  ;;  %v6117_v37 = vld [vmem:[%s8174_s5 + $0x310] sm:$0xff] }
 0x44e   : > { %v3400_v26 = vmax.f32 %v2143_v53, 0.0  ;;  %v6061_v22 = vld [vmem:[%s8174_s5 + $0x150] sm:$0xff] }
 0x44f   : > { %4908 = vmatpush.msrb.mxu0 %v4595_v0  ;;  %4311 = vadd.xlane.f32.xlu2 %v4310_v16 }
 0x450   : > { %v2795_v46 = vpop.f32.mrf.mxu1  ;;  %v3977_v7 = vadd.f32 %v3401_v54, %v3400_v26 }
 0x451   : > { %5985 = vmatmul.msk.bf16.gmra.mxu3 %vm1580_vm3, %v6116_v5  ;;  %4909 = vmatpush.msrb.mxu0 %v4594_v51  ;;  %v3403_v50 = vmax.f32 %v2795_v46, 0.0 }
 0x452   : > { %v2423_v20 = vpop.f32.mrf.mxu2  ;;  %3975 = vadd.xlane.f32.xlu1 %v3974_v25 }
 0x453   : > { %v3624_v44 = vmax.f32 %v2423_v20, 0.0  ;;  %5929 = vmatmul.msk.bf16.gmra.mxu1 %vm1580_vm3, %v6060_v13  ;;  %4910 = vmatpush.msrb.mxu0 %v4593_v43 }
 0x454   : > { %v3075_v40 = vpop.f32.mrf.mxu3 }
 0x455   : > { %v2146_v15 = vpop.f32.mrf.mxu0  ;;  %4911 = vmatpush.msrb.mxu0 %v4592_v10  ;;  %v4313_v30 = vadd.f32 %v3625_v14, %v3624_v44  ;;  %v3627_v57 = vmax.f32 %v3075_v40, 0.0  ;;  %v7326_v25 = vpop.xlane.xlu0 %3927 }
 0x456   : > { %v3402_v55 = vmax.f32 %v2146_v15, 0.0 }
 0x457   : > { %5857 = vmatmul.msk.bf16.gmra.mxu2 %vm1580_vm3, %v6116_v5  ;;  %4912 = vmatpush.msrb.mxu0 %v4591_v35 }
 0x458   : > { %5801 = vmatmul.msk.bf16.gmra.mxu0 %vm1580_vm3, %v6060_v13  ;;  %v2797_v4 = vpop.f32.mrf.mxu1  ;;  %4314 = vadd.xlane.f32.xlu0 %v4313_v30  ;;  %v3980_v0 = vadd.f32 %v3403_v50, %v3402_v55  ;;  %v7334_v55 = vpop.xlane.xlu2 %4266 }
 0x459   : > { %4913 = vmatpush.msrb.mxu0 %v4590_v60  ;;  %3978 = vadd.xlane.f32.xlu2 %v3977_v7  ;;  %v3405_v5 = vmax.f32 %v2797_v4, 0.0  ;;  %8201 = vst [vmem:[#allocation24_spill] sm:$0xff] %v7334_v55 }
 0x45a   : > { %v2426_v3 = vpop.f32.mrf.mxu2 }
 0x45b   : > { %v3626_v28 = vmax.f32 %v2426_v3, 0.0  ;;  %4914 = vmatpush.msrb.mxu0 %v4589_v38  ;;  %v7339_v3 = vpop.xlane.xlu1 %4263 }
 0x45c   : > { %v3077_v18 = vpop.f32.mrf.mxu3  ;;  %8202 = vst [vmem:[#allocation25_spill] sm:$0xff] %v7339_v3 }
 0x45d   : > { %v2148_v47 = vpop.f32.mrf.mxu0  ;;  %v4316_v51 = vadd.f32 %v3627_v57, %v3626_v28  ;;  %v3629_v46 = vmax.f32 %v3077_v18, 0.0  ;;  %v7332_v7 = vpop.xlane.xlu0 %4269  ;;  %v6118_v57 = vld [vmem:[%s8174_s5 + $0x318] sm:$0xff] }
 0x45e   : > { %v3404_v53 = vmax.f32 %v2148_v47, 0.0  ;;  %8200 = vst [vmem:[#allocation23_spill] sm:$0xff] %v7332_v7 }
 0x45f   : > { %4317 = vadd.xlane.f32.xlu1 %v4316_v51 }
 0x460   : > { %v2800_v16 = vpop.f32.mrf.mxu1  ;;  %3981 = vadd.xlane.f32.xlu0 %v3980_v0  ;;  %v3983_v10 = vadd.f32 %v3405_v5, %v3404_v53  ;;  %v6062_v0 = vld [vmem:[%s8174_s5 + $0x158] sm:$0xff]  ;;  %v7348_v5 = vpop.xlane.xlu2 %3933 }
 0x461   : > { %5986 = vmatmul.msk.bf16.gmra.mxu3 %vm1580_vm3, %v6117_v37  ;;  %v3407_v26 = vmax.f32 %v2800_v16, 0.0 }
 0x462   : > { %v2428_v43 = vpop.f32.mrf.mxu2 }
 0x463   : > { %v3628_v13 = vmax.f32 %v2428_v43, 0.0  ;;  %5930 = vmatmul.msk.bf16.gmra.mxu1 %vm1580_vm3, %v6061_v22 }
 0x464   : > { %v3080_v54 = vpop.f32.mrf.mxu3 }
 0x465   : > { %v2151_v20 = vpop.f32.mrf.mxu0  ;;  %v4319_v35 = vadd.f32 %v3629_v46, %v3628_v13  ;;  %v3631_v15 = vmax.f32 %v3080_v54, 0.0  ;;  %v7345_v53 = vpop.xlane.xlu0 %3936 }
 0x466   : > { %v3406_v44 = vmax.f32 %v2151_v20, 0.0  ;;  %v7350_v46 = vpop.xlane.xlu1 %3930 }
 0x467   : > { %5858 = vmatmul.msk.bf16.gmra.mxu2 %vm1580_vm3, %v6117_v37  ;;  %3984 = vadd.xlane.f32.xlu1 %v3983_v10 }
 0x468   : > { %5802 = vmatmul.msk.bf16.gmra.mxu0 %vm1580_vm3, %v6061_v22  ;;  %v2802_v14 = vpop.f32.mrf.mxu1  ;;  %4320 = vadd.xlane.f32.xlu0 %v4319_v35  ;;  %v3986_v40 = vadd.f32 %v3407_v26, %v3406_v44 }
 0x469   : > { %v3409_v50 = vmax.f32 %v2802_v14, 0.0 }
 0x46a   : > { %v2431_v30 = vpop.f32.mrf.mxu2  ;;  %3987 = vadd.xlane.f32.xlu2 %v3986_v40 }
 0x46b   : > { %v3630_v60 = vmax.f32 %v2431_v30, 0.0 }
 0x46c   : > { %v3082_v4 = vpop.f32.mrf.mxu3 }
 0x46d   : > { %v2153_v38 = vpop.f32.mrf.mxu0  ;;  %v4322_v28 = vadd.f32 %v3631_v15, %v3630_v60  ;;  %v3633_v10 = vmax.f32 %v3082_v4, 0.0  ;;  %v7354_v30 = vpop.xlane.xlu0 %4278 }
 0x46e   : > { %v3408_v18 = vmax.f32 %v2153_v38, 0.0  ;;  %8203 = vst [vmem:[#allocation26_spill] sm:$0xff] %v7354_v30  ;;  %v7359_v4 = vpop.xlane.xlu2 %4275 }
 0x46f   : > { %4323 = vadd.xlane.f32.xlu1 %v4322_v28  ;;  %8204 = vst [vmem:[#allocation27_spill] sm:$0xff] %v7359_v4  ;;  %v7364_v28 = vpop.xlane.xlu1 %4272 }
 0x470   : > { %v2805_v47 = vpop.f32.mrf.mxu1  ;;  %v3989_v37 = vadd.f32 %v3409_v50, %v3408_v18  ;;  %v6119_v50 = vld [vmem:[%s8174_s5 + $0x320] sm:$0xff]  ;;  %8205 = vst [vmem:[#allocation28_spill] sm:$0xff] %v7364_v28 }
 0x471   : > { %5987 = vmatmul.msk.bf16.gmra.mxu3 %vm1580_vm3, %v6118_v57  ;;  %v3411_v16 = vmax.f32 %v2805_v47, 0.0 }
 0x472   : > { %v2433_v51 = vpop.f32.mrf.mxu2  ;;  %3990 = vadd.xlane.f32.xlu0 %v3989_v37 }
 0x473   : > { %5931 = vmatmul.msk.bf16.gmra.mxu1 %vm1580_vm3, %v6062_v0  ;;  %v3632_v22 = vmax.f32 %v2433_v51, 0.0 }
 0x474   : > { %v3085_v43 = vpop.f32.mrf.mxu3 }
 0x475   : > { %v2156_v13 = vpop.f32.mrf.mxu0  ;;  %v4325_v20 = vadd.f32 %v3633_v10, %v3632_v22  ;;  %v3635_v44 = vmax.f32 %v3085_v43, 0.0 }
 0x476   : > { %v3410_v26 = vmax.f32 %v2156_v13, 0.0  ;;  %v7368_v13 = vpop.xlane.xlu0 %3945 }
 0x477   : > { %5859 = vmatmul.msk.bf16.gmra.mxu2 %vm1580_vm3, %v6118_v57  ;;  %v6063_v57 = vld [vmem:[%s8174_s5 + $0x160] sm:$0xff] }
 0x478   : > { %5803 = vmatmul.msk.bf16.gmra.mxu0 %vm1580_vm3, %v6062_v0  ;;  %v2807_v54 = vpop.f32.mrf.mxu1  ;;  %v3992_v35 = vadd.f32 %v3411_v16, %v3410_v26 }
 0x479   : > { %v3413_v0 = vmax.f32 %v2807_v54, 0.0  ;;  %v7373_v54 = vpop.xlane.xlu1 %3939 }
 0x47a   : > { %v2436_v14 = vpop.f32.mrf.mxu2  ;;  %4326 = vadd.xlane.f32.xlu0 %v4325_v20  ;;  %3993 = vadd.xlane.f32.xlu1 %v3992_v35  ;;  %v7370_v20 = vpop.xlane.xlu2 %3942 }
 0x47b   : > { %v3634_v40 = vmax.f32 %v2436_v14, 0.0 }
 0x47c   : > { %v3087_v15 = vpop.f32.mrf.mxu3 }
 0x47d   : > { %v2158_v60 = vpop.f32.mrf.mxu0  ;;  %v4328_v38 = vadd.f32 %v3635_v44, %v3634_v40  ;;  %v3637_v22 = vmax.f32 %v3087_v15, 0.0 }
 0x47e   : > { %v3412_v18 = vmax.f32 %v2158_v60, 0.0 }
 0x47f   : > { %4329 = vadd.xlane.f32.xlu2 %v4328_v38 }
 0x480   : > { %v2810_v47 = vpop.f32.mrf.mxu1  ;;  %v3995_v10 = vadd.f32 %v3413_v0, %v3412_v18 }
 0x481   : > { %5988 = vmatmul.msk.bf16.gmra.mxu3 %vm1580_vm3, %v6119_v50  ;;  %v3415_v16 = vmax.f32 %v2810_v47, 0.0 }
 0x482   : > { %v2438_v37 = vpop.f32.mrf.mxu2 }
 0x483   : > { %v3636_v51 = vmax.f32 %v2438_v37, 0.0  ;;  %5932 = vmatmul.msk.bf16.gmra.mxu1 %vm1580_vm3, %v6063_v57  ;;  %v6120_v37 = vld [vmem:[%s8174_s5 + $0x328] sm:$0xff] }
 0x484   : > { %v3090_v43 = vpop.f32.mrf.mxu3 }
 0x485   : > { %v2161_v26 = vpop.f32.mrf.mxu0  ;;  %v4331_v35 = vadd.f32 %v3637_v22, %v3636_v51  ;;  %v3639_v38 = vmax.f32 %v3090_v43, 0.0  ;;  %v7379_v51 = vpop.xlane.xlu0 %4287 }
 0x486   : > { %v3414_v44 = vmax.f32 %v2161_v26, 0.0  ;;  %8206 = vst [vmem:[#allocation29_spill] sm:$0xff] %v7379_v51  ;;  %v7384_v22 = vpop.xlane.xlu2 %4284  ;;  %v7387_v43 = vpop.xlane.xlu1 %4281 }
 0x487   : > { %5860 = vmatmul.msk.bf16.gmra.mxu2 %vm1580_vm3, %v6119_v50  ;;  %4332 = vadd.xlane.f32.xlu1 %v4331_v35  ;;  %8207 = vst [vmem:[#allocation30_spill] sm:$0xff] %v7384_v22 }
 0x488   : > { %5804 = vmatmul.msk.bf16.gmra.mxu0 %vm1580_vm3, %v6063_v57  ;;  %v2812_v14 = vpop.f32.mrf.mxu1  ;;  %3996 = vadd.xlane.f32.xlu2 %v3995_v10  ;;  %v3998_v40 = vadd.f32 %v3415_v16, %v3414_v44  ;;  %v6064_v57 = vld [vmem:[%s8174_s5 + $0x168] sm:$0xff]  ;;  %8208 = vst [vmem:[#allocation31_spill] sm:$0xff] %v7387_v43 }
 0x489   : > { %v3417_v18 = vmax.f32 %v2812_v14, 0.0 }
 0x48a   : > { %v2441_v15 = vpop.f32.mrf.mxu2  ;;  %3999 = vadd.xlane.f32.xlu0 %v3998_v40 }
 0x48b   : > { %v3638_v60 = vmax.f32 %v2441_v15, 0.0 }
 0x48c   : > { %v3092_v0 = vpop.f32.mrf.mxu3 }
 0x48d   : > { %v2163_v47 = vpop.f32.mrf.mxu0  ;;  %v4334_v16 = vadd.f32 %v3639_v38, %v3638_v60  ;;  %v3641_v14 = vmax.f32 %v3092_v0, 0.0  ;;  %v7390_v3 = vpop.xlane.xlu0 %3954 }
 0x48e   : > { %v3416_v50 = vmax.f32 %v2163_v47, 0.0  ;;  %v7393_v38 = vpop.xlane.xlu2 %3951 }
 0x490   : > { %v4001_v10 = vadd.f32 %v3417_v18, %v3416_v50  ;;  %v2815_v26 = vpop.f32.mrf.mxu1 }
 0x491   : > { %5989 = vmatmul.msk.bf16.gmra.mxu3 %vm1580_vm3, %v6120_v37  ;;  %v3419_v60 = vmax.f32 %v2815_v26, 0.0 }
 0x492   : > { %v2443_v35 = vpop.f32.mrf.mxu2  ;;  %4335 = vadd.xlane.f32.xlu0 %v4334_v16  ;;  %4002 = vadd.xlane.f32.xlu1 %v4001_v10  ;;  %v7396_v16 = vpop.xlane.xlu1 %3948 }
 0x493   : > { %v3640_v44 = vmax.f32 %v2443_v35, 0.0  ;;  %5933 = vmatmul.msk.bf16.gmra.mxu1 %vm1580_vm3, %v6064_v57 }
 0x494   : > { %v3095_v40 = vpop.f32.mrf.mxu3 }
 0x495   : > { %v2166_v15 = vpop.f32.mrf.mxu0  ;;  %v4337_v47 = vadd.f32 %v3641_v14, %v3640_v44  ;;  %v3643_v50 = vmax.f32 %v3095_v40, 0.0 }
 0x496   : > { %v3418_v55 = vmax.f32 %v2166_v15, 0.0 }
 0x497   : > { %5861 = vmatmul.msk.bf16.gmra.mxu2 %vm1580_vm3, %v6120_v37  ;;  %4338 = vadd.xlane.f32.xlu2 %v4337_v47  ;;  %v6121_v37 = vld [vmem:[%s8174_s5 + $0x330] sm:$0xff] }
 0x498   : > { %5805 = vmatmul.msk.bf16.gmra.mxu0 %vm1580_vm3, %v6064_v57  ;;  %v2817_v18 = vpop.f32.mrf.mxu1  ;;  %v4004_v35 = vadd.f32 %v3419_v60, %v3418_v55  ;;  %v6065_v57 = vld [vmem:[%s8174_s5 + $0x170] sm:$0xff]  ;;  %v7407_v55 = vpop.xlane.xlu2 %4293 }
 0x499   : > { %v3421_v7 = vmax.f32 %v2817_v18, 0.0  ;;  %8210 = vst [vmem:[#allocation33_spill] sm:$0xff] %v7407_v55 }
 0x49a   : > { %v2446_v0 = vpop.f32.mrf.mxu2  ;;  %v7404_v47 = vpop.xlane.xlu0 %4296 }
 0x49b   : > { %v3642_v10 = vmax.f32 %v2446_v0, 0.0  ;;  %8209 = vst [vmem:[#allocation32_spill] sm:$0xff] %v7404_v47  ;;  %v7410_v18 = vpop.xlane.xlu1 %4290 }
 0x49c   : > { %v3097_v44 = vpop.f32.mrf.mxu3  ;;  %8211 = vst [vmem:[#allocation34_spill] sm:$0xff] %v7410_v18 }
 0x49d   : > { %v4340_v14 = vadd.f32 %v3643_v50, %v3642_v10  ;;  %v2168_v28 = vpop.f32.mrf.mxu0 }
 0x49e   : > { %v3420_v26 = vmax.f32 %v2168_v28, 0.0 }
 0x49f   : > { %4005 = vadd.xlane.f32.xlu2 %v4004_v35  ;;  %4341 = vadd.xlane.f32.xlu1 %v4340_v14  ;;  %v3645_v35 = vmax.f32 %v3097_v44, 0.0  ;;  %v6122_v44 = vld [vmem:[%s8174_s5 + $0x338] sm:$0xff] }
 0x4a0   : > { %v4007_v40 = vadd.f32 %v3421_v7, %v3420_v26  ;;  %v2820_v15 = vpop.f32.mrf.mxu1 }
 0x4a1   : > { %5990 = vmatmul.msk.bf16.gmra.mxu3 %vm1580_vm3, %v6121_v37  ;;  %v3423_v50 = vmax.f32 %v2820_v15, 0.0 }
 0x4a2   : > { %v2448_v60 = vpop.f32.mrf.mxu2  ;;  %4008 = vadd.xlane.f32.xlu0 %v4007_v40  ;;  %v3964_v30 = vpop.xlane.xlu0 %3963 }
 0x4a3   : > { %5934 = vmatmul.msk.bf16.gmra.mxu1 %vm1580_vm3, %v6065_v57  ;;  %v3644_v28 = vmax.f32 %v2448_v60, 0.0  ;;  %v3961_v40 = vpop.xlane.xlu2 %3960  ;;  %v3958_v60 = vpop.xlane.xlu1 %3957 }
 0x4a4   : > { %v3100_v0 = vpop.f32.mrf.mxu3 }
 0x4a5   : > { %v2171_v10 = vpop.f32.mrf.mxu0  ;;  %v4343_v7 = vadd.f32 %v3645_v35, %v3644_v28  ;;  %v3647_v43 = vmax.f32 %v3100_v0, 0.0 }
 0x4a6   : > { %v3422_v14 = vmax.f32 %v2171_v10, 0.0 }
 0x4a7   : > { %5862 = vmatmul.msk.bf16.gmra.mxu2 %vm1580_vm3, %v6121_v37 }
 0x4a8   : > { %v4010_v26 = vadd.f32 %v3423_v50, %v3422_v14  ;;  %5806 = vmatmul.msk.bf16.gmra.mxu0 %vm1580_vm3, %v6065_v57  ;;  %v2822_v4 = vpop.f32.mrf.mxu1  ;;  %v6066_v57 = vld [vmem:[%s8174_s5 + $0x178] sm:$0xff] }
 0x4a9   : > { %v3425_v28 = vmax.f32 %v2822_v4, 0.0 }
 0x4aa   : > { %v2451_v22 = vpop.f32.mrf.mxu2  ;;  %4344 = vadd.xlane.f32.xlu0 %v4343_v7  ;;  %4011 = vadd.xlane.f32.xlu1 %v4010_v26 }
 0x4ab   : > { %v3646_v51 = vmax.f32 %v2451_v22, 0.0  ;;  %v7424_v35 = vpop.xlane.xlu2 %4302  ;;  %v7426_v26 = vpop.xlane.xlu1 %4299 }
 0x4ac   : > { %v3102_v15 = vpop.f32.mrf.mxu3  ;;  %8213 = vst [vmem:[#allocation36_spill] sm:$0xff] %v7424_v35 }
 0x4ad   : > { %v4346_v18 = vadd.f32 %v3647_v43, %v3646_v51  ;;  %v2173_v55 = vpop.f32.mrf.mxu0  ;;  %v3649_v43 = vmax.f32 %v3102_v15, 0.0  ;;  %8214 = vst [vmem:[#allocation37_spill] sm:$0xff] %v7426_v26 }
 0x4ae   : > { %v3424_v37 = vmax.f32 %v2173_v55, 0.0 }
 0x4af   : > { %4347 = vadd.xlane.f32.xlu2 %v4346_v18 }
 0x4b0   : > { %v2825_v50 = vpop.f32.mrf.mxu1  ;;  %v4013_v10 = vadd.f32 %v3425_v28, %v3424_v37 }
 0x4b1   : > { %5991 = vmatmul.msk.bf16.gmra.mxu3 %vm1580_vm3, %v6122_v44  ;;  %v3427_v55 = vmax.f32 %v2825_v50, 0.0 }
 0x4b2   : > { %v2453_v0 = vpop.f32.mrf.mxu2  ;;  %v7421_v22 = vpop.xlane.xlu0 %4305 }
 0x4b3   : > { %8212 = vst [vmem:[#allocation35_spill] sm:$0xff] %v7421_v22  ;;  %v3648_v51 = vmax.f32 %v2453_v0, 0.0  ;;  %5935 = vmatmul.msk.bf16.gmra.mxu1 %vm1580_vm3, %v6066_v57  ;;  %v3970_v0 = vpop.xlane.xlu2 %3969 }
 0x4b4   : > { %v3105_v4 = vpop.f32.mrf.mxu3 }
 0x4b5   : > { %v4349_v14 = vadd.f32 %v3649_v43, %v3648_v51  ;;  %v2176_v7 = vpop.f32.mrf.mxu0  ;;  %v4619_v43 = vmul.f32 %v6945_v17, %v3970_v0 }
 0x4b6   : > { %v3426_v18 = vmax.f32 %v2176_v7, 0.0  ;;  %v3651_v7 = vmax.f32 %v3105_v4, 0.0 }
 0x4b7   : > { %5863 = vmatmul.msk.bf16.gmra.mxu2 %vm1580_vm3, %v6122_v44  ;;  %4014 = vadd.xlane.f32.xlu2 %v4013_v10  ;;  %v6123_v44 = vld [vmem:[%s8174_s5 + $0x340] sm:$0xff] }
 0x4b8   : > { %v4016_v47 = vadd.f32 %v3427_v55, %v3426_v18  ;;  %5807 = vmatmul.msk.bf16.gmra.mxu0 %vm1580_vm3, %v6066_v57  ;;  %v2827_v37 = vpop.f32.mrf.mxu1  ;;  %4350 = vadd.xlane.f32.xlu1 %v4349_v14  ;;  %v3967_v57 = vpop.xlane.xlu1 %3966 }
 0x4b9   : > { %v3429_v35 = vmax.f32 %v2827_v37, 0.0  ;;  %v4618_v55 = vmul.f32 %v6945_v17, %v3967_v57  ;;  %v4617_v37 = vmul.f32 %v6945_v17, %v3964_v30 }
 0x4ba   : > { %v2456_v15 = vpop.f32.mrf.mxu2  ;;  %4017 = vadd.xlane.f32.xlu0 %v4016_v47  ;;  %v6067_v47 = vld [vmem:[%s8174_s5 + $0x180] sm:$0xff] }
 0x4bb   : > { %v3973_v28 = vpop.xlane.xlu0 %3972  ;;  %v3650_v26 = vmax.f32 %v2456_v15, 0.0 }
 0x4bc   : > { %v3107_v50 = vpop.f32.mrf.mxu3  ;;  %v4620_v51 = vmul.f32 %v6945_v17, %v3973_v28  ;;  %v4616_v28 = vmul.f32 %v6945_v17, %v3961_v40 }
 0x4bd   : > { %v2178_v22 = vpop.f32.mrf.mxu0  ;;  %v4352_v4 = vadd.f32 %v3651_v7, %v3650_v26  ;;  %v3653_v0 = vmax.f32 %v3107_v50, 0.0  ;;  %v4614_v26 = vmul.f32 %v6945_v17, %v7390_v3  ;;  %v4613_v50 = vmul.f32 %v6945_v17, %v7393_v38  ;;  %v6124_v38 = vld [vmem:[%s8174_s5 + $0x348] sm:$0xff] }
 0x4be   : > { %v3428_v10 = vmax.f32 %v2178_v22, 0.0  ;;  %4919 = vmatpush.msrb.mxu1 %v4620_v51 }
 0x4c0   : > { %v4019_v14 = vadd.f32 %v3429_v35, %v3428_v10  ;;  %v2830_v18 = vpop.f32.mrf.mxu1  ;;  %4920 = vmatpush.msrb.mxu1 %v4619_v43  ;;  %v4615_v35 = vmul.f32 %v6945_v17, %v3958_v60  ;;  %v4612_v10 = vmul.f32 %v6945_v17, %v7396_v16  ;;  %v4610_v16 = vmul.f32 %v6945_v17, %v7370_v20 }
 0x4c1   : > { %5992 = vmatmul.msk.bf16.gmra.mxu3 %vm1580_vm3, %v6123_v44  ;;  %v3431_v7 = vmax.f32 %v2830_v18, 0.0  ;;  %v4611_v18 = vmul.f32 %v6945_v17, %v7368_v13  ;;  %v4609_v13 = vmul.f32 %v6945_v17, %v7373_v54 }
 0x4c2   : > { %v2458_v15 = vpop.f32.mrf.mxu2  ;;  %4020 = vadd.xlane.f32.xlu1 %v4019_v14  ;;  %4921 = vmatpush.msrb.mxu1 %v4618_v55 }
 0x4c3   : > { %v3652_v22 = vmax.f32 %v2458_v15, 0.0  ;;  %5936 = vmatmul.msk.bf16.gmra.mxu1 %vm1580_vm3, %v6067_v47  ;;  %4353 = vadd.xlane.f32.xlu0 %v4352_v4 }
 0x4c4   : > { %v3110_v51 = vpop.f32.mrf.mxu3  ;;  %4922 = vmatpush.msrb.mxu1 %v4617_v37 }
 0x4c5   : > { %v4355_v57 = vadd.f32 %v3653_v0, %v3652_v22  ;;  %v2181_v30 = vpop.f32.mrf.mxu0  ;;  %v3655_v60 = vmax.f32 %v3110_v51, 0.0  ;;  %v4608_v51 = vmul.f32 %v6945_v17, %v7345_v53  ;;  %v4606_v53 = vmul.f32 %v6945_v17, %v7350_v46  ;;  %v6125_v46 = vld [vmem:[%s8174_s5 + $0x350] sm:$0xff] }
 0x4c6   : > { %4923 = vmatpush.msrb.mxu1 %v4616_v28  ;;  %v3430_v43 = vmax.f32 %v2181_v30, 0.0  ;;  %v6068_v28 = vld [vmem:[%s8174_s5 + $0x188] sm:$0xff]  ;;  %v4607_v30 = vmul.f32 %v6945_v17, %v7348_v5  ;;  %v4605_v5 = vmul.f32 %v6945_v17, %v7326_v25 }
 0x4c7   : > { %5864 = vmatmul.msk.bf16.gmra.mxu2 %vm1580_vm3, %v6123_v44  ;;  %4356 = vadd.xlane.f32.xlu2 %v4355_v57 }
 0x4c8   : > { %5808 = vmatmul.msk.bf16.gmra.mxu0 %vm1580_vm3, %v6067_v47  ;;  %v2832_v40 = vpop.f32.mrf.mxu1  ;;  %4924 = vmatpush.msrb.mxu1 %v4615_v35  ;;  %v4022_v3 = vadd.f32 %v3431_v7, %v3430_v43 }
 0x4c9   : > { %v3433_v44 = vmax.f32 %v2832_v40, 0.0 }
 0x4ca   : > { %v2461_v55 = vpop.f32.mrf.mxu2  ;;  %4925 = vmatpush.msrb.mxu1 %v4614_v26 }
 0x4cb   : > { %v3654_v14 = vmax.f32 %v2461_v55, 0.0 }
 0x4cc   : > { %v3112_v37 = vpop.f32.mrf.mxu3  ;;  %4926 = vmatpush.msrb.mxu1 %v4613_v50 }
 0x4cd   : > { %v7454_v47 = vadd.f32 %v3655_v60, %v3654_v14  ;;  %v2183_v4 = vpop.f32.mrf.mxu0  ;;  %v3657_v57 = vmax.f32 %v3112_v37, 0.0 }
 0x4ce   : > { %v3432_v15 = vmax.f32 %v2183_v4, 0.0  ;;  %4927 = vmatpush.msrb.mxu1 %v4612_v10 }
 0x4cf   : > { %4023 = vadd.xlane.f32.xlu2 %v4022_v3 }
 0x4d0   : > { %v4025_v22 = vadd.f32 %v3433_v44, %v3432_v15  ;;  %v2835_v0 = vpop.f32.mrf.mxu1  ;;  %4928 = vmatpush.msrb.mxu1 %v4611_v18  ;;  %v7484_v15 = vpop.xlane.xlu1 %4308 }
 0x4d1   : > { %5993 = vmatmul.msk.bf16.gmra.mxu3 %vm1580_vm3, %v6124_v38  ;;  %v3435_v40 = vmax.f32 %v2835_v0, 0.0  ;;  %8215 = vst [vmem:[#allocation38_spill] sm:$0xff] %v7484_v15 }
 0x4d2   : > { %v2463_v35 = vpop.f32.mrf.mxu2  ;;  %4929 = vmatpush.msrb.mxu1 %v4610_v16  ;;  %4026 = vadd.xlane.f32.xlu0 %v4025_v22 }
 0x4d3   : > { %v3656_v20 = vmax.f32 %v2463_v35, 0.0  ;;  %5937 = vmatmul.msk.bf16.gmra.mxu1 %vm1580_vm3, %v6068_v28 }
 0x4d4   : > { %v3115_v26 = vpop.f32.mrf.mxu3  ;;  %4930 = vmatpush.msrb.mxu1 %v4609_v13 }
 0x4d5   : > { %v4361_v54 = vadd.f32 %v3657_v57, %v3656_v20  ;;  %v2186_v43 = vpop.f32.mrf.mxu0  ;;  %v3659_v60 = vmax.f32 %v3115_v26, 0.0 }
 0x4d6   : > { %4931 = vmatpush.msrb.mxu1 %v4608_v51  ;;  %v3434_v7 = vmax.f32 %v2186_v43, 0.0 }
 0x4d7   : > { %5865 = vmatmul.msk.bf16.gmra.mxu2 %vm1580_vm3, %v6124_v38  ;;  %4362 = vadd.xlane.f32.xlu1 %v4361_v54  ;;  %v6069_v38 = vld [vmem:[%s8174_s5 + $0x190] sm:$0xff] }
 0x4d8   : > { %5809 = vmatmul.msk.bf16.gmra.mxu0 %vm1580_vm3, %v6068_v28  ;;  %v2837_v50 = vpop.f32.mrf.mxu1  ;;  %4932 = vmatpush.msrb.mxu1 %v4607_v30  ;;  %v4028_v55 = vadd.f32 %v3435_v40, %v3434_v7  ;;  %v7490_v54 = vpop.xlane.xlu1 %3975 }
 0x4d9   : > { %v3437_v14 = vmax.f32 %v2837_v50, 0.0 }
 0x4da   : > { %v2466_v10 = vpop.f32.mrf.mxu2  ;;  %4933 = vmatpush.msrb.mxu1 %v4606_v53 }
 0x4db   : > { %v3658_v3 = vmax.f32 %v2466_v10, 0.0 }
 0x4dc   : > { %v3117_v18 = vpop.f32.mrf.mxu3  ;;  %4934 = vmatpush.msrb.mxu1 %v4605_v5  ;;  %v6126_v5 = vld [vmem:[%s8174_s5 + $0x358] sm:$0xff] }
 0x4dd   : > { %v4364_v44 = vadd.f32 %v3659_v60, %v3658_v3  ;;  %v2188_v37 = vpop.f32.mrf.mxu0  ;;  %v3661_v35 = vmax.f32 %v3117_v18, 0.0  ;;  %v6070_v3 = vld [vmem:[%s8174_s5 + $0x198] sm:$0xff] }
 0x4de   : > { %v3436_v4 = vmax.f32 %v2188_v37, 0.0 }
 0x4df   : > { %4029 = vadd.xlane.f32.xlu1 %v4028_v55  ;;  %4365 = vadd.xlane.f32.xlu0 %v4364_v44 }
 0x4e0   : > { %v4031_v25 = vadd.f32 %v3437_v14, %v3436_v4  ;;  %v2840_v16 = vpop.f32.mrf.mxu1  ;;  %v7499_v44 = vpop.xlane.xlu1 %4317 }
 0x4e1   : > { %5994 = vmatmul.msk.bf16.gmra.mxu3 %vm1580_vm3, %v6125_v46  ;;  %v3439_v22 = vmax.f32 %v2840_v16, 0.0  ;;  %8216 = vst [vmem:[#allocation39_spill] sm:$0xff] %v7499_v44  ;;  %v7502_v16 = vpop.xlane.xlu0 %4314 }
 0x4e2   : > { %v2468_v28 = vpop.f32.mrf.mxu2  ;;  %4032 = vadd.xlane.f32.xlu2 %v4031_v25  ;;  %8217 = vst [vmem:[#allocation40_spill] sm:$0xff] %v7502_v16 }
 0x4e3   : > { %5938 = vmatmul.msk.bf16.gmra.mxu1 %vm1580_vm3, %v6069_v38  ;;  %v3660_v13 = vmax.f32 %v2468_v28, 0.0 }
 0x4e4   : > { %v3120_v0 = vpop.f32.mrf.mxu3 }
 0x4e5   : > { %v2191_v51 = vpop.f32.mrf.mxu0  ;;  %v4367_v57 = vadd.f32 %v3661_v35, %v3660_v13  ;;  %v3663_v43 = vmax.f32 %v3120_v0, 0.0 }
 0x4e6   : > { %v3438_v20 = vmax.f32 %v2191_v51, 0.0 }
 0x4e7   : > { %5866 = vmatmul.msk.bf16.gmra.mxu2 %vm1580_vm3, %v6125_v46 }
 0x4e8   : > { %v4034_v30 = vadd.f32 %v3439_v22, %v3438_v20  ;;  %5810 = vmatmul.msk.bf16.gmra.mxu0 %vm1580_vm3, %v6069_v38  ;;  %v2842_v26 = vpop.f32.mrf.mxu1 }
 0x4e9   : > { %v3441_v55 = vmax.f32 %v2842_v26, 0.0 }
 0x4ea   : > { %v2471_v7 = vpop.f32.mrf.mxu2  ;;  %4368 = vadd.xlane.f32.xlu2 %v4367_v57  ;;  %4035 = vadd.xlane.f32.xlu0 %v4034_v30 }
 0x4eb   : > { %v3662_v40 = vmax.f32 %v2471_v7, 0.0 }
 0x4ec   : > { %v3122_v53 = vpop.f32.mrf.mxu3 }
 0x4ed   : > { %v4370_v50 = vadd.f32 %v3663_v43, %v3662_v40  ;;  %v2193_v60 = vpop.f32.mrf.mxu0  ;;  %v3665_v4 = vmax.f32 %v3122_v53, 0.0  ;;  %v7506_v43 = vpop.xlane.xlu1 %3984  ;;  %v6127_v40 = vld [vmem:[%s8174_s5 + $0x360] sm:$0xff] }
 0x4ee   : > { %v3440_v10 = vmax.f32 %v2193_v60, 0.0  ;;  %v7513_v60 = vpop.xlane.xlu2 %4311 }
 0x4ef   : > { %4371 = vadd.xlane.f32.xlu1 %v4370_v50  ;;  %v7511_v50 = vpop.xlane.xlu0 %3981  ;;  %8218 = vst [vmem:[#allocation41_spill] sm:$0xff] %v7513_v60 }
 0x4f0   : > { %v2845_v14 = vpop.f32.mrf.mxu1  ;;  %v4037_v37 = vadd.f32 %v3441_v55, %v3440_v10 }
 0x4f1   : > { %5995 = vmatmul.msk.bf16.gmra.mxu3 %vm1580_vm3, %v6126_v5  ;;  %v3443_v38 = vmax.f32 %v2845_v14, 0.0 }
 0x4f2   : > { %v2473_v18 = vpop.f32.mrf.mxu2 }
 0x4f3   : > { %v3664_v46 = vmax.f32 %v2473_v18, 0.0  ;;  %5939 = vmatmul.msk.bf16.gmra.mxu1 %vm1580_vm3, %v6070_v3 }
 0x4f4   : > { %v3125_v25 = vpop.f32.mrf.mxu3 }
 0x4f5   : > { %v4373_v28 = vadd.f32 %v3665_v4, %v3664_v46  ;;  %v2196_v13 = vpop.f32.mrf.mxu0  ;;  %v3667_v57 = vmax.f32 %v3125_v25, 0.0  ;;  %v7520_v25 = vpop.xlane.xlu1 %4323 }
 0x4f6   : > { %v3442_v22 = vmax.f32 %v2196_v13, 0.0  ;;  %8219 = vst [vmem:[#allocation42_spill] sm:$0xff] %v7520_v25 }
 0x4f7   : > { %5867 = vmatmul.msk.bf16.gmra.mxu2 %vm1580_vm3, %v6126_v5  ;;  %4038 = vadd.xlane.f32.xlu1 %v4037_v37  ;;  %v6071_v5 = vld [vmem:[%s8174_s5 + $0x1a0] sm:$0xff] }
 0x4f8   : > { %v4040_v0 = vadd.f32 %v3443_v38, %v3442_v22  ;;  %5811 = vmatmul.msk.bf16.gmra.mxu0 %vm1580_vm3, %v6070_v3  ;;  %v2847_v51 = vpop.f32.mrf.mxu1  ;;  %4374 = vadd.xlane.f32.xlu0 %v4373_v28  ;;  %v7523_v22 = vpop.xlane.xlu2 %3978 }
 0x4f9   : > { %v3445_v30 = vmax.f32 %v2847_v51, 0.0  ;;  %v7526_v51 = vpop.xlane.xlu0 %4320 }
 0x4fa   : > { %v2476_v35 = vpop.f32.mrf.mxu2  ;;  %4041 = vadd.xlane.f32.xlu2 %v4040_v0  ;;  %8220 = vst [vmem:[#allocation43_spill] sm:$0xff] %v7526_v51 }
 0x4fb   : > { %v3666_v20 = vmax.f32 %v2476_v35, 0.0 }
 0x4fc   : > { %v3127_v26 = vpop.f32.mrf.mxu3 }
 0x4fd   : > { %v2198_v7 = vpop.f32.mrf.mxu0  ;;  %v4376_v10 = vadd.f32 %v3667_v57, %v3666_v20  ;;  %v3669_v37 = vmax.f32 %v3127_v26, 0.0 }
 0x4fe   : > { %v3444_v53 = vmax.f32 %v2198_v7, 0.0 }
 0x500   : > { %v4043_v55 = vadd.f32 %v3445_v30, %v3444_v53  ;;  %v2850_v3 = vpop.f32.mrf.mxu1 }
 0x501   : > { %5996 = vmatmul.msk.bf16.gmra.mxu3 %vm1580_vm3, %v6127_v40  ;;  %v3447_v13 = vmax.f32 %v2850_v3, 0.0  ;;  %v7531_v3 = vpop.xlane.xlu1 %3993 }
 0x502   : > { %v2478_v14 = vpop.f32.mrf.mxu2  ;;  %4377 = vadd.xlane.f32.xlu2 %v4376_v10  ;;  %4044 = vadd.xlane.f32.xlu0 %v4043_v55 }
 0x503   : > { %v3668_v18 = vmax.f32 %v2478_v14, 0.0  ;;  %5940 = vmatmul.msk.bf16.gmra.mxu1 %vm1580_vm3, %v6071_v5 }
 0x504   : > { %v3130_v46 = vpop.f32.mrf.mxu3 }
 0x505   : > { %v4379_v4 = vadd.f32 %v3669_v37, %v3668_v18  ;;  %v2201_v38 = vpop.f32.mrf.mxu0  ;;  %v3671_v35 = vmax.f32 %v3130_v46, 0.0  ;;  %v7536_v37 = vpop.xlane.xlu0 %3990 }
 0x506   : > { %v3446_v28 = vmax.f32 %v2201_v38, 0.0 }
 0x507   : > { %5868 = vmatmul.msk.bf16.gmra.mxu2 %vm1580_vm3, %v6127_v40  ;;  %4380 = vadd.xlane.f32.xlu1 %v4379_v4  ;;  %v6128_v40 = vld [vmem:[%s8174_s5 + $0x368] sm:$0xff]  ;;  %v7539_v4 = vpop.xlane.xlu2 %3987 }
 0x508   : > { %5812 = vmatmul.msk.bf16.gmra.mxu0 %vm1580_vm3, %v6071_v5  ;;  %v2852_v0 = vpop.f32.mrf.mxu1  ;;  %v4046_v57 = vadd.f32 %v3447_v13, %v3446_v28  ;;  %v6072_v5 = vld [vmem:[%s8174_s5 + $0x1a8] sm:$0xff] }
 0x509   : > { %v3449_v26 = vmax.f32 %v2852_v0, 0.0 }
 0x50a   : > { %v2481_v20 = vpop.f32.mrf.mxu2 }
 0x50b   : > { %v3670_v30 = vmax.f32 %v2481_v20, 0.0 }
 0x50c   : > { %v3132_v7 = vpop.f32.mrf.mxu3 }
 0x50d   : > { %v4382_v53 = vadd.f32 %v3671_v35, %v3670_v30  ;;  %v2203_v10 = vpop.f32.mrf.mxu0  ;;  %v3673_v35 = vmax.f32 %v3132_v7, 0.0 }
 0x50e   : > { %v3448_v55 = vmax.f32 %v2203_v10, 0.0 }
 0x50f   : > { %4047 = vadd.xlane.f32.xlu1 %v4046_v57  ;;  %4383 = vadd.xlane.f32.xlu0 %v4382_v53  ;;  %v7544_v53 = vpop.xlane.xlu1 %4332  ;;  %v7548_v15 = vpop.xlane.xlu2 %4329 }
 0x510   : > { %v4049_v14 = vadd.f32 %v3449_v26, %v3448_v55  ;;  %v2855_v18 = vpop.f32.mrf.mxu1  ;;  %8221 = vst [vmem:[#allocation44_spill] sm:$0xff] %v7544_v53 }
 0x511   : > { %5997 = vmatmul.msk.bf16.gmra.mxu3 %vm1580_vm3, %v6128_v40  ;;  %v3451_v28 = vmax.f32 %v2855_v18, 0.0  ;;  %8223 = vst [vmem:[#allocation46_spill] sm:$0xff] %v7548_v15 }
 0x512   : > { %v2483_v46 = vpop.f32.mrf.mxu2  ;;  %4050 = vadd.xlane.f32.xlu2 %v4049_v14  ;;  %v7546_v14 = vpop.xlane.xlu0 %4326 }
 0x513   : > { %5941 = vmatmul.msk.bf16.gmra.mxu1 %vm1580_vm3, %v6072_v5  ;;  %v3672_v38 = vmax.f32 %v2483_v46, 0.0  ;;  %8222 = vst [vmem:[#allocation45_spill] sm:$0xff] %v7546_v14 }
 0x514   : > { %v3135_v13 = vpop.f32.mrf.mxu3 }
 0x515   : > { %v2206_v0 = vpop.f32.mrf.mxu0  ;;  %v4385_v57 = vadd.f32 %v3673_v35, %v3672_v38  ;;  %v3675_v10 = vmax.f32 %v3135_v13, 0.0 }
 0x516   : > { %v3450_v20 = vmax.f32 %v2206_v0, 0.0 }
 0x517   : > { %5869 = vmatmul.msk.bf16.gmra.mxu2 %vm1580_vm3, %v6128_v40  ;;  %v6129_v40 = vld [vmem:[%s8174_s5 + $0x370] sm:$0xff]  ;;  %v7556_v35 = vpop.xlane.xlu1 %4002 }
 0x518   : > { %v4052_v30 = vadd.f32 %v3451_v28, %v3450_v20  ;;  %5813 = vmatmul.msk.bf16.gmra.mxu0 %vm1580_vm3, %v6072_v5  ;;  %v2857_v26 = vpop.f32.mrf.mxu1  ;;  %v6073_v28 = vld [vmem:[%s8174_s5 + $0x1b0] sm:$0xff] }
 0x519   : > { %v3453_v38 = vmax.f32 %v2857_v26, 0.0 }
 0x51a   : > { %v2486_v55 = vpop.f32.mrf.mxu2  ;;  %4386 = vadd.xlane.f32.xlu2 %v4385_v57  ;;  %4053 = vadd.xlane.f32.xlu0 %v4052_v30  ;;  %v7559_v57 = vpop.xlane.xlu0 %3999 }
 0x51b   : > { %v3674_v18 = vmax.f32 %v2486_v55, 0.0 }
 0x51c   : > { %v3137_v46 = vpop.f32.mrf.mxu3 }
 0x51d   : > { %v4388_v7 = vadd.f32 %v3675_v10, %v3674_v18  ;;  %v2208_v0 = vpop.f32.mrf.mxu0  ;;  %v7562_v18 = vpop.xlane.xlu2 %3996 }
 0x51e   : > { %v3452_v5 = vmax.f32 %v2208_v0, 0.0 }
 0x51f   : > { %4389 = vadd.xlane.f32.xlu1 %v4388_v7  ;;  %v7566_v51 = vpop.xlane.xlu1 %4341 }
 0x520   : > { %v2860_v13 = vpop.f32.mrf.mxu1  ;;  %v4055_v30 = vadd.f32 %v3453_v38, %v3452_v5  ;;  %8224 = vst [vmem:[#allocation47_spill] sm:$0xff] %v7566_v51  ;;  %v3677_v5 = vmax.f32 %v3137_v46, 0.0 }
 0x521   : > { %5998 = vmatmul.msk.bf16.gmra.mxu3 %vm1580_vm3, %v6129_v40  ;;  %v3455_v10 = vmax.f32 %v2860_v13, 0.0 }
 0x522   : > { %v2488_v20 = vpop.f32.mrf.mxu2  ;;  %v7568_v15 = vpop.xlane.xlu0 %4335 }
 0x523   : > { %5942 = vmatmul.msk.bf16.gmra.mxu1 %vm1580_vm3, %v6073_v28  ;;  %v3676_v16 = vmax.f32 %v2488_v20, 0.0  ;;  %8225 = vst [vmem:[#allocation48_spill] sm:$0xff] %v7568_v15  ;;  %v6074_v20 = vld [vmem:[%s8174_s5 + $0x1b8] sm:$0xff] }
 0x524   : > { %v3140_v55 = vpop.f32.mrf.mxu3 }
 0x525   : > { %v2211_v26 = vpop.f32.mrf.mxu0  ;;  %v3679_v13 = vmax.f32 %v3140_v55, 0.0 }
 0x526   : > { %v3454_v0 = vmax.f32 %v2211_v26, 0.0  ;;  %v4391_v26 = vadd.f32 %v3677_v5, %v3676_v16 }
 0x527   : > { %5870 = vmatmul.msk.bf16.gmra.mxu2 %vm1580_vm3, %v6129_v40  ;;  %4056 = vadd.xlane.f32.xlu1 %v4055_v30  ;;  %v6130_v40 = vld [vmem:[%s8174_s5 + $0x378] sm:$0xff]  ;;  %v7573_v30 = vpop.xlane.xlu2 %4338  ;;  %v4012_v16 = vpop.xlane.xlu1 %4011 }
 0x528   : > { %v4058_v7 = vadd.f32 %v3455_v10, %v3454_v0  ;;  %5814 = vmatmul.msk.bf16.gmra.mxu0 %vm1580_vm3, %v6073_v28  ;;  %v2862_v60 = vpop.f32.mrf.mxu1  ;;  %8226 = vst [vmem:[#allocation49_spill] sm:$0xff] %v7573_v30 }
 0x529   : > { %v3457_v25 = vmax.f32 %v2862_v60, 0.0 }
 0x52a   : > { %v2491_v44 = vpop.f32.mrf.mxu2  ;;  %4059 = vadd.xlane.f32.xlu2 %v4058_v7  ;;  %v4009_v7 = vpop.xlane.xlu0 %4008 }
 0x52b   : > { %v3678_v38 = vmax.f32 %v2491_v44, 0.0 }
 0x52c   : > { %v3142_v14 = vpop.f32.mrf.mxu3 }
 0x52d   : > { %v2213_v53 = vpop.f32.mrf.mxu0  ;;  %v4394_v44 = vadd.f32 %v3679_v13, %v3678_v38  ;;  %v3681_v15 = vmax.f32 %v3142_v14, 0.0  ;;  %v6131_v14 = vld [vmem:[%s8174_s5 + $0x380] sm:$0xff] }
 0x52e   : > { %v3456_v28 = vmax.f32 %v2213_v53, 0.0 }
 0x52f   : > { %4392 = vadd.xlane.f32.xlu1 %v4391_v26  ;;  %v4006_v51 = vpop.xlane.xlu2 %4005 }
 0x530   : > { %v4061_v46 = vadd.f32 %v3457_v25, %v3456_v28  ;;  %v2865_v60 = vpop.f32.mrf.mxu1 }
 0x531   : > { %5999 = vmatmul.msk.bf16.gmra.mxu3 %vm1580_vm3, %v6130_v40  ;;  %v3459_v53 = vmax.f32 %v2865_v60, 0.0 }
 0x532   : > { %v2493_v10 = vpop.f32.mrf.mxu2  ;;  %4395 = vadd.xlane.f32.xlu2 %v4394_v44  ;;  %4062 = vadd.xlane.f32.xlu0 %v4061_v46 }
 0x533   : > { %5943 = vmatmul.msk.bf16.gmra.mxu1 %vm1580_vm3, %v6074_v20  ;;  %v3680_v55 = vmax.f32 %v2493_v10, 0.0  ;;  %v7582_v10 = vpop.xlane.xlu1 %4350 }
 0x534   : > { %v3145_v0 = vpop.f32.mrf.mxu3  ;;  %8227 = vst [vmem:[#allocation50_spill] sm:$0xff] %v7582_v10 }
 0x535   : > { %v2216_v5 = vpop.f32.mrf.mxu0  ;;  %v4397_v25 = vadd.f32 %v3681_v15, %v3680_v55  ;;  %v3683_v44 = vmax.f32 %v3145_v0, 0.0  ;;  %v7587_v15 = vpop.xlane.xlu0 %4344 }
 0x536   : > { %v3458_v30 = vmax.f32 %v2216_v5, 0.0  ;;  %8228 = vst [vmem:[#allocation51_spill] sm:$0xff] %v7587_v15 }
 0x537   : > { %5871 = vmatmul.msk.bf16.gmra.mxu2 %vm1580_vm3, %v6130_v40 }
 0x538   : > { %v4064_v38 = vadd.f32 %v3459_v53, %v3458_v30  ;;  %5815 = vmatmul.msk.bf16.gmra.mxu0 %vm1580_vm3, %v6074_v20  ;;  %v2867_v13 = vpop.f32.mrf.mxu1  ;;  %v7589_v53 = vpop.xlane.xlu2 %4347 }
 0x539   : > { %v3461_v46 = vmax.f32 %v2867_v13, 0.0  ;;  %8229 = vst [vmem:[#allocation52_spill] sm:$0xff] %v7589_v53 }
 0x53a   : > { %v2496_v26 = vpop.f32.mrf.mxu2  ;;  %4065 = vadd.xlane.f32.xlu1 %v4064_v38  ;;  %4398 = vadd.xlane.f32.xlu0 %v4397_v25 }
 0x53b   : > { %v3682_v28 = vmax.f32 %v2496_v26, 0.0  ;;  %v4021_v13 = vpop.xlane.xlu1 %4020 }
 0x53c   : > { %v3147_v60 = vpop.f32.mrf.mxu3  ;;  %v4636_v10 = vmul.f32 %v6945_v17, %v4021_v13 }
 0x53d   : > { %v2218_v11 = vpop.f32.mrf.mxu0  ;;  %v4400_v30 = vadd.f32 %v3683_v44, %v3682_v28  ;;  %v3685_v49 = vmax.f32 %v3147_v60, 0.0  ;;  %v4018_v28 = vpop.xlane.xlu0 %4017  ;;  %v4633_v60 = vmul.f32 %v6945_v17, %v4012_v16  ;;  %v4630_v16 = vmul.f32 %v6945_v17, %v7556_v35 }
 0x53e   : > { %v3460_v40 = vmax.f32 %v2218_v11, 0.0  ;;  %v4825_v11 = vld.sshfl [vmem:[#allocation1] sm:$0xff pattern:$0x73625140]  ;;  %v4635_v44 = vmul.f32 %v6945_v17, %v4018_v28 }
 0x540   : > { %v4067_v20 = vadd.f32 %v3461_v46, %v3460_v40  ;;  %v2870_v55 = vpop.f32.mrf.mxu1  ;;  %v4015_v53 = vpop.xlane.xlu2 %4014 }
 0x541   : > { %6000 = vmatmul.msk.bf16.gmra.mxu3 %vm1580_vm3, %v6131_v14  ;;  %v3463_v25 = vmax.f32 %v2870_v55, 0.0  ;;  %v4634_v55 = vmul.f32 %v6945_v17, %v4015_v53  ;;  %v4631_v53 = vmul.f32 %v6945_v17, %v4006_v51  ;;  %v4628_v51 = vmul.f32 %v6945_v17, %v7562_v18 }
 0x542   : > { %4068 = vadd.xlane.f32.xlu2 %v4067_v20  ;;  %v2498_v0 = vpop.f32.mrf.mxu2  ;;  %4401 = vadd.xlane.f32.xlu1 %v4400_v30  ;;  %v4625_v18 = vmul.f32 %v6945_v17, %v7539_v4 }
 0x543   : > { %v3684_v5 = vmax.f32 %v2498_v0, 0.0 }
 0x544   : > { %v3150_v38 = vpop.f32.mrf.mxu3 }
 0x545   : > { %v2221_v26 = vpop.f32.mrf.mxu0  ;;  %v4403_v46 = vadd.f32 %v3685_v49, %v3684_v5  ;;  %v3687_v30 = vmax.f32 %v3150_v38, 0.0  ;;  %v6132_v5 = vld [vmem:[%s8174_s5 + $0x388] sm:$0xff] }
 0x546   : > { %v3462_v15 = vmax.f32 %v2221_v26, 0.0 }
 0x547   : > { %5872 = vmatmul.msk.bf16.gmra.mxu2 %vm1580_vm3, %v6131_v14 }
 0x548   : > { %v4070_v40 = vadd.f32 %v3463_v25, %v3462_v15  ;;  %v2872_v20 = vpop.f32.mrf.mxu1  ;;  %4875 = vmatmul.f32.vlgmr.msra.gmra.mxu0 %v4825_v11  ;;  %v4632_v15 = vmul.f32 %v6945_v17, %v4009_v7  ;;  %v4629_v7 = vmul.f32 %v6945_v17, %v7559_v57 }
 0x549   : > { %4939 = vmatpush.msra.mxu0 %v4636_v10  ;;  %v3465_v26 = vmax.f32 %v2872_v20, 0.0 }
 0x54a   : > { %v2501_v0 = vpop.f32.mrf.mxu2  ;;  %4404 = vadd.xlane.f32.xlu2 %v4403_v46  ;;  %4071 = vadd.xlane.f32.xlu0 %v4070_v40 }
 0x54b   : > { %v3686_v13 = vmax.f32 %v2501_v0, 0.0  ;;  %4940 = vmatpush.msra.mxu0 %v4635_v44 }
 0x54c   : > { %v3152_v14 = vpop.f32.mrf.mxu3 }
 0x54d   : > { %v7597_v2 = vadd.f32 %v3687_v30, %v3686_v13  ;;  %v2223_v49 = vpop.f32.mrf.mxu0  ;;  %4941 = vmatpush.msra.mxu0 %v4634_v55  ;;  %v3689_v44 = vmax.f32 %v3152_v14, 0.0  ;;  %v4627_v55 = vmul.f32 %v6945_v17, %v7531_v3  ;;  %v4626_v13 = vmul.f32 %v6945_v17, %v7536_v37 }
 0x54e   : > { %v3464_v10 = vmax.f32 %v2223_v49, 0.0 }
 0x54f   : > { %8230 = vst [vmem:[#allocation53_spill] sm:$0xff] %v7597_v2  ;;  %4942 = vmatpush.msra.mxu0 %v4633_v60 }
 0x550   : > { %v4073_v25 = vadd.f32 %v3465_v26, %v3464_v10  ;;  %v2875_v38 = vpop.f32.mrf.mxu1  ;;  %v7620_v26 = vpop.xlane.xlu2 %4356  ;;  %v6133_v10 = vld [vmem:[%s8174_s5 + $0x390] sm:$0xff] }
 0x551   : > { %6001 = vmatmul.msk.bf16.gmra.mxu3 %vm1580_vm3, %v6132_v5  ;;  %4943 = vmatpush.msra.mxu0 %v4632_v15  ;;  %v3467_v46 = vmax.f32 %v2875_v38, 0.0  ;;  %8231 = vst [vmem:[#allocation54_spill] sm:$0xff] %v7620_v26 }
 0x552   : > { %v2503_v11 = vpop.f32.mrf.mxu2  ;;  %4074 = vadd.xlane.f32.xlu1 %v4073_v25 }
 0x553   : > { %v3688_v28 = vmax.f32 %v2503_v11, 0.0  ;;  %4944 = vmatpush.msra.mxu0 %v4631_v53  ;;  %v4624_v53 = vmul.f32 %v6945_v17, %v7506_v43 }
 0x554   : > { %v3155_v40 = vpop.f32.mrf.mxu3 }
 0x555   : > { %v7611_v20 = vadd.f32 %v3689_v44, %v3688_v28  ;;  %v2226_v30 = vpop.f32.mrf.mxu0  ;;  %4945 = vmatpush.msra.mxu0 %v4630_v16  ;;  %v3691_v49 = vmax.f32 %v3155_v40, 0.0  ;;  %v4623_v16 = vmul.f32 %v6945_v17, %v7511_v50  ;;  %v4622_v28 = vmul.f32 %v6945_v17, %v7523_v22 }
 0x556   : > { %v3466_v35 = vmax.f32 %v2226_v30, 0.0  ;;  %v4621_v50 = vmul.f32 %v6945_v17, %v7490_v54 }
 0x557   : > { %5873 = vmatmul.msk.bf16.gmra.mxu2 %vm1580_vm3, %v6132_v5  ;;  %4946 = vmatpush.msra.mxu0 %v4629_v7  ;;  %v7630_v7 = vpop.xlane.xlu1 %4362 }
 0x558   : > { %v4076_v57 = vadd.f32 %v3467_v46, %v3466_v35  ;;  %v2877_v0 = vpop.f32.mrf.mxu1  ;;  %8232 = vst [vmem:[#allocation55_spill] sm:$0xff] %v7630_v7  ;;  %v7634_v46 = vpop.xlane.xlu2 %4023 }
 0x559   : > { %4947 = vmatpush.msra.mxu0 %v4628_v51  ;;  %v3469_v3 = vmax.f32 %v2877_v0, 0.0 }
 0x55a   : > { %v2506_v60 = vpop.f32.mrf.mxu2  ;;  %4077 = vadd.xlane.f32.xlu2 %v4076_v57 }
 0x55b   : > { %4948 = vmatpush.msra.mxu0 %v4627_v55  ;;  %v3690_v14 = vmax.f32 %v2506_v60, 0.0 }
 0x55c   : > { %v3157_v15 = vpop.f32.mrf.mxu3 }
 0x55d   : > { %v2228_v5 = vpop.f32.mrf.mxu0  ;;  %4949 = vmatpush.msra.mxu0 %v4626_v13  ;;  %v4412_v25 = vadd.f32 %v3691_v49, %v3690_v14  ;;  %v3693_v43 = vmax.f32 %v3157_v15, 0.0 }
 0x55e   : > { %v3468_v37 = vmax.f32 %v2228_v5, 0.0 }
 0x55f   : > { %4950 = vmatpush.msra.mxu0 %v4625_v18  ;;  %v7639_v13 = vpop.xlane.xlu1 %4029 }
 0x560   : > { %v4079_v4 = vadd.f32 %v3469_v3, %v3468_v37  ;;  %v2880_v38 = vpop.f32.mrf.mxu1  ;;  %v7641_v3 = vpop.xlane.xlu0 %4353 }
 0x561   : > { %6002 = vmatmul.msk.bf16.gmra.mxu3 %vm1580_vm3, %v6133_v10  ;;  %4951 = vmatpush.msra.mxu0 %v4624_v53  ;;  %v3471_v35 = vmax.f32 %v2880_v38, 0.0  ;;  %8233 = vst [vmem:[#allocation56_spill] sm:$0xff] %v7641_v3  ;;  %v7643_v5 = vpop.xlane.xlu2 %4032 }
 0x562   : > { %v2508_v11 = vpop.f32.mrf.mxu2  ;;  %4413 = vadd.xlane.f32.xlu2 %v4412_v25  ;;  %4080 = vadd.xlane.f32.xlu0 %v4079_v4 }
 0x563   : > { %v3692_v44 = vmax.f32 %v2508_v11, 0.0  ;;  %4952 = vmatpush.msra.mxu0 %v4623_v16 }
 0x564   : > { %v3160_v40 = vpop.f32.mrf.mxu3 }
 0x565   : > { %v4415_v51 = vadd.f32 %v3693_v43, %v3692_v44  ;;  %v2231_v30 = vpop.f32.mrf.mxu0  ;;  %4953 = vmatpush.msra.mxu0 %v4622_v28  ;;  %v3695_v22 = vmax.f32 %v3160_v40, 0.0 }
 0x566   : > { %v3470_v55 = vmax.f32 %v2231_v30, 0.0 }
 0x567   : > { %5874 = vmatmul.msk.bf16.gmra.mxu2 %vm1580_vm3, %v6133_v10  ;;  %4954 = vmatpush.msra.mxu0 %v4621_v50  ;;  %v6134_v10 = vld [vmem:[%s8174_s5 + $0x398] sm:$0xff]  ;;  %v7649_v28 = vpop.xlane.xlu1 %4371 }
 0x568   : > { %v2882_v57 = vpop.f32.mrf.mxu1  ;;  %4416 = vadd.xlane.f32.xlu1 %v4415_v51  ;;  %v4082_v18 = vadd.f32 %v3471_v35, %v3470_v55  ;;  %8234 = vst [vmem:[#allocation57_spill] sm:$0xff] %v7649_v28  ;;  %v7651_v43 = vpop.xlane.xlu0 %4026 }
 0x569   : > { %v3473_v14 = vmax.f32 %v2882_v57, 0.0  ;;  %v7654_v51 = vpop.xlane.xlu2 %4368 }
 0x56a   : > { %v2511_v0 = vpop.f32.mrf.mxu2  ;;  %8235 = vst [vmem:[#allocation58_spill] sm:$0xff] %v7654_v51 }
 0x56b   : > { %v3694_v60 = vmax.f32 %v2511_v0, 0.0 }
 0x56c   : > { %v3162_v49 = vpop.f32.mrf.mxu3 }
 0x56d   : > { %v4418_v54 = vadd.f32 %v3695_v22, %v3694_v60  ;;  %v2233_v15 = vpop.f32.mrf.mxu0  ;;  %v3697_v40 = vmax.f32 %v3162_v49, 0.0  ;;  %v6135_v49 = vld [vmem:[%s8174_s5 + $0x3a0] sm:$0xff] }
 0x56e   : > { %v3472_v37 = vmax.f32 %v2233_v15, 0.0 }
 0x56f   : > { %4419 = vadd.xlane.f32.xlu0 %v4418_v54 }
 0x570   : > { %v4085_v53 = vadd.f32 %v3473_v14, %v3472_v37  ;;  %v2885_v25 = vpop.f32.mrf.mxu1  ;;  %4083 = vadd.xlane.f32.xlu1 %v4082_v18  ;;  %v7656_v18 = vpop.xlane.xlu1 %4038 }
 0x571   : > { %6003 = vmatmul.msk.bf16.gmra.mxu3 %vm1580_vm3, %v6134_v10  ;;  %v3475_v16 = vmax.f32 %v2885_v25, 0.0  ;;  %v7661_v15 = vpop.xlane.xlu2 %4041 }
 0x572   : > { %v2513_v4 = vpop.f32.mrf.mxu2  ;;  %4086 = vadd.xlane.f32.xlu2 %v4085_v53 }
 0x573   : > { %v3696_v38 = vmax.f32 %v2513_v4, 0.0 }
 0x574   : > { %v3165_v11 = vpop.f32.mrf.mxu3 }
 0x575   : > { %v2236_v44 = vpop.f32.mrf.mxu0  ;;  %v4421_v30 = vadd.f32 %v3697_v40, %v3696_v38  ;;  %v3699_v57 = vmax.f32 %v3165_v11, 0.0 }
 0x576   : > { %v3474_v50 = vmax.f32 %v2236_v44, 0.0 }
 0x577   : > { %5875 = vmatmul.msk.bf16.gmra.mxu2 %vm1580_vm3, %v6134_v10  ;;  %v7663_v10 = vpop.xlane.xlu0 %4365 }
 0x578   : > { %v4088_v35 = vadd.f32 %v3475_v16, %v3474_v50  ;;  %v2887_v55 = vpop.f32.mrf.mxu1  ;;  %8236 = vst [vmem:[#allocation59_spill] sm:$0xff] %v7663_v10 }
 0x579   : > { %v3477_v37 = vmax.f32 %v2887_v55, 0.0 }
 0x57a   : > { %v2516_v22 = vpop.f32.mrf.mxu2  ;;  %4422 = vadd.xlane.f32.xlu2 %v4421_v30  ;;  %4089 = vadd.xlane.f32.xlu0 %v4088_v35 }
 0x57b   : > { %v3698_v0 = vmax.f32 %v2516_v22, 0.0 }
 0x57c   : > { %v3167_v60 = vpop.f32.mrf.mxu3 }
 0x57d   : > { %v4424_v14 = vadd.f32 %v3699_v57, %v3698_v0  ;;  %v2238_v54 = vpop.f32.mrf.mxu0  ;;  %v3701_v16 = vmax.f32 %v3167_v60, 0.0  ;;  %v7666_v57 = vpop.xlane.xlu1 %4380 }
 0x57e   : > { %v3476_v53 = vmax.f32 %v2238_v54, 0.0  ;;  %8237 = vst [vmem:[#allocation60_spill] sm:$0xff] %v7666_v57 }
 0x57f   : > { %4425 = vadd.xlane.f32.xlu1 %v4424_v14  ;;  %v7669_v22 = vpop.xlane.xlu0 %4035  ;;  %v7671_v14 = vpop.xlane.xlu2 %4377 }
 0x580   : > { %v2890_v25 = vpop.f32.mrf.mxu1  ;;  %v4091_v11 = vadd.f32 %v3477_v37, %v3476_v53  ;;  %8238 = vst [vmem:[#allocation61_spill] sm:$0xff] %v7671_v14 }
 0x581   : > { %6004 = vmatmul.msk.bf16.gmra.mxu3 %vm1580_vm3, %v6135_v49  ;;  %v3479_v44 = vmax.f32 %v2890_v25, 0.0 }
 0x582   : > { %v2518_v4 = vpop.f32.mrf.mxu2 }
 0x583   : > { %v3700_v38 = vmax.f32 %v2518_v4, 0.0 }
 0x584   : > { %v3170_v40 = vpop.f32.mrf.mxu3 }
 0x585   : > { %v4427_v50 = vadd.f32 %v3701_v16, %v3700_v38  ;;  %v2241_v30 = vpop.f32.mrf.mxu0  ;;  %v3703_v37 = vmax.f32 %v3170_v40, 0.0  ;;  %v6136_v38 = vld [vmem:[%s8174_s5 + $0x3a8] sm:$0xff]  ;;  %v7676_v16 = vpop.xlane.xlu1 %4047 }
 0x586   : > { %v3478_v35 = vmax.f32 %v2241_v30, 0.0 }
 0x587   : > { %5876 = vmatmul.msk.bf16.gmra.mxu2 %vm1580_vm3, %v6135_v49  ;;  %4428 = vadd.xlane.f32.xlu0 %v4427_v50 }
 0x588   : > { %v4094_v55 = vadd.f32 %v3479_v44, %v3478_v35  ;;  %v2892_v0 = vpop.f32.mrf.mxu1  ;;  %4092 = vadd.xlane.f32.xlu1 %v4091_v11  ;;  %v7678_v11 = vpop.xlane.xlu2 %4050 }
 0x589   : > { %v3481_v53 = vmax.f32 %v2892_v0, 0.0  ;;  %v7681_v35 = vpop.xlane.xlu0 %4374 }
 0x58a   : > { %v2521_v54 = vpop.f32.mrf.mxu2  ;;  %4095 = vadd.xlane.f32.xlu2 %v4094_v55  ;;  %8239 = vst [vmem:[#allocation62_spill] sm:$0xff] %v7681_v35 }
 0x58b   : > { %v3702_v60 = vmax.f32 %v2521_v54, 0.0 }
 0x58c   : > { %v3172_v25 = vpop.f32.mrf.mxu3 }
 0x58d   : > { %v2243_v4 = vpop.f32.mrf.mxu0  ;;  %v4430_v50 = vadd.f32 %v3703_v37, %v3702_v60  ;;  %v3705_v0 = vmax.f32 %v3172_v25, 0.0 }
 0x58e   : > { %v3480_v49 = vmax.f32 %v2243_v4, 0.0 }
 0x590   : > { %v4097_v44 = vadd.f32 %v3481_v53, %v3480_v49  ;;  %v2895_v30 = vpop.f32.mrf.mxu1  ;;  %v4826_v53 = vld.sshfl [vmem:[#allocation1 + $0x8] sm:$0xff pattern:$0x73625140]  ;;  %v7688_v25 = vpop.xlane.xlu2 %4386 }
 0x591   : > { %6005 = vmatmul.msk.bf16.gmra.mxu3 %vm1580_vm3, %v6136_v38  ;;  %v3483_v4 = vmax.f32 %v2895_v30, 0.0  ;;  %v7686_v51 = vpop.xlane.xlu0 %4044  ;;  %4895 = vmatmul.f32.vlgmr.msra.gmra.mxu1 %v4826_v53  ;;  %8241 = vst [vmem:[#allocation64_spill] sm:$0xff] %v7688_v25 }
 0x592   : > { %v2523_v40 = vpop.f32.mrf.mxu2  ;;  %4431 = vadd.xlane.f32.xlu2 %v4430_v50  ;;  %4098 = vadd.xlane.f32.xlu0 %v4097_v44  ;;  %v7684_v37 = vpop.xlane.xlu1 %4389 }
 0x593   : > { %v3704_v55 = vmax.f32 %v2523_v40, 0.0  ;;  %8240 = vst [vmem:[#allocation63_spill] sm:$0xff] %v7684_v37 }
 0x594   : > { %v3175_v54 = vpop.f32.mrf.mxu3 }
 0x595   : > { %v4433_v2 = vadd.f32 %v3705_v0, %v3704_v55  ;;  %v2246_v7 = vpop.f32.mrf.mxu0  ;;  %v3707_v49 = vmax.f32 %v3175_v54, 0.0 }
 0x596   : > { %v3482_v10 = vmax.f32 %v2246_v7, 0.0 }
 0x597   : > { %5877 = vmatmul.msk.bf16.gmra.mxu2 %vm1580_vm3, %v6136_v38  ;;  %4434 = vadd.xlane.f32.xlu1 %v4433_v2  ;;  %v6137_v2 = vld [vmem:[%s8174_s5 + $0x3b0] sm:$0xff] }
 0x598   : > { %v2897_v60 = vpop.f32.mrf.mxu1  ;;  %v4100_v44 = vadd.f32 %v3483_v4, %v3482_v10 }
 0x599   : > { %v3485_v55 = vmax.f32 %v2897_v60, 0.0 }
 0x59a   : > { %v2526_v50 = vpop.f32.mrf.mxu2  ;;  %v4057_v4 = vpop.xlane.xlu1 %4056 }
 0x59b   : > { %v3706_v40 = vmax.f32 %v2526_v50, 0.0  ;;  %v7694_v50 = vpop.xlane.xlu0 %4383 }
 0x59c   : > { %v3177_v0 = vpop.f32.mrf.mxu3  ;;  %8242 = vst [vmem:[#allocation65_spill] sm:$0xff] %v7694_v50 }
 0x59d   : > { %v4436_v30 = vadd.f32 %v3707_v49, %v3706_v40  ;;  %v2248_v7 = vpop.f32.mrf.mxu0  ;;  %v4060_v53 = vpop.xlane.xlu2 %4059  ;;  %v3709_v14 = vmax.f32 %v3177_v0, 0.0 }
 0x59e   : > { %v3484_v38 = vmax.f32 %v2248_v7, 0.0 }
 0x59f   : > { %4437 = vadd.xlane.f32.xlu0 %v4436_v30  ;;  %4101 = vadd.xlane.f32.xlu1 %v4100_v44 }
 0x5a0   : > { %v4103_v54 = vadd.f32 %v3485_v55, %v3484_v38  ;;  %v2900_v28 = vpop.f32.mrf.mxu1 }
 0x5a1   : > { %6006 = vmatmul.msk.bf16.gmra.mxu3 %vm1580_vm3, %v6137_v2  ;;  %v3487_v49 = vmax.f32 %v2900_v28, 0.0 }
 0x5a2   : > { %4104 = vadd.xlane.f32.xlu2 %v4103_v54  ;;  %v2528_v10 = vpop.f32.mrf.mxu2  ;;  %v7697_v3 = vpop.xlane.xlu1 %4392 }
 0x5a3   : > { %v3708_v60 = vmax.f32 %v2528_v10, 0.0  ;;  %v4054_v38 = vpop.xlane.xlu0 %4053  ;;  %8243 = vst [vmem:[#allocation66_spill] sm:$0xff] %v7697_v3 }
 0x5a4   : > { %v3180_v40 = vpop.f32.mrf.mxu3 }
 0x5a5   : > { %v2251_v35 = vpop.f32.mrf.mxu0  ;;  %v4439_v30 = vadd.f32 %v3709_v14, %v3708_v60  ;;  %v3711_v25 = vmax.f32 %v3180_v40, 0.0  ;;  %v7699_v28 = vpop.xlane.xlu2 %4395 }
 0x5a6   : > { %v3486_v57 = vmax.f32 %v2251_v35, 0.0  ;;  %8244 = vst [vmem:[#allocation67_spill] sm:$0xff] %v7699_v28  ;;  %v6138_v35 = vld [vmem:[%s8174_s5 + $0x3b8] sm:$0xff] }
 0x5a7   : > { %5878 = vmatmul.msk.bf16.gmra.mxu2 %vm1580_vm3, %v6137_v2 }
 0x5a8   : > { %v4106_v44 = vadd.f32 %v3487_v49, %v3486_v57  ;;  %v2902_v55 = vpop.f32.mrf.mxu1 }
 0x5a9   : > { %v3489_v37 = vmax.f32 %v2902_v55, 0.0 }
 0x5aa   : > { %4440 = vadd.xlane.f32.xlu2 %v4439_v30  ;;  %v2531_v7 = vpop.f32.mrf.mxu2  ;;  %4107 = vadd.xlane.f32.xlu0 %v4106_v44 }
 0x5ab   : > { %v3710_v54 = vmax.f32 %v2531_v7, 0.0 }
 0x5ac   : > { %v3182_v10 = vpop.f32.mrf.mxu3 }
 0x5ad   : > { %v2253_v50 = vpop.f32.mrf.mxu0  ;;  %v4442_v57 = vadd.f32 %v3711_v25, %v3710_v54  ;;  %v3713_v40 = vmax.f32 %v3182_v10, 0.0  ;;  %v4066_v44 = vpop.xlane.xlu1 %4065 }
 0x5ae   : > { %v3488_v14 = vmax.f32 %v2253_v50, 0.0  ;;  %v4651_v25 = vmul.f32 %v6945_v17, %v4066_v44  ;;  %v4063_v50 = vpop.xlane.xlu0 %4062 }
 0x5af   : > { %v4650_v10 = vmul.f32 %v6945_v17, %v4063_v50 }
 0x5b0   : > { %v4109_v0 = vadd.f32 %v3489_v37, %v3488_v14  ;;  %v2905_v2 = vpop.f32.mrf.mxu1  ;;  %v4828_v37 = vld.sshfl [vmem:[#allocation1 + $0x18] sm:$0xff pattern:$0x73625140] }
 0x5b1   : > { %6007 = vmatmul.msk.bf16.gmra.mxu3 %vm1580_vm3, %v6138_v35  ;;  %v3491_v30 = vmax.f32 %v2905_v2, 0.0  ;;  %4935 = vmatmul.f32.vlgmr.msrb.gmra.mxu1 %v4828_v37 }
 0x5b2   : > { %4443 = vadd.xlane.f32.xlu2 %v4442_v57  ;;  %v2533_v60 = vpop.f32.mrf.mxu2  ;;  %4110 = vadd.xlane.f32.xlu1 %v4109_v0  ;;  %v4649_v57 = vmul.f32 %v6945_v17, %v4060_v53 }
 0x5b3   : > { %v3712_v49 = vmax.f32 %v2533_v60, 0.0 }
 0x5b4   : > { %v3185_v55 = vpop.f32.mrf.mxu3 }
 0x5b5   : > { %v4445_v7 = vadd.f32 %v3713_v40, %v3712_v49  ;;  %v4069_v3 = vpop.xlane.xlu2 %4068  ;;  %v2256_v28 = vpop.f32.mrf.mxu0  ;;  %v3715_v14 = vmax.f32 %v3185_v55, 0.0 }
 0x5b6   : > { %v4652_v26 = vmul.f32 %v6945_v17, %v4069_v3  ;;  %v3490_v23 = vmax.f32 %v2256_v28, 0.0  ;;  %v4648_v28 = vmul.f32 %v6945_v17, %v4057_v4  ;;  %v4646_v4 = vmul.f32 %v6945_v17, %v7678_v11 }
 0x5b7   : > { %5879 = vmatmul.msk.bf16.gmra.mxu2 %vm1580_vm3, %v6138_v35  ;;  %4446 = vadd.xlane.f32.xlu0 %v4445_v7  ;;  %v4643_v11 = vmul.f32 %v6945_v17, %v7661_v15  ;;  %v4640_v15 = vmul.f32 %v6945_v17, %v7643_v5  ;;  %v4638_v5 = vmul.f32 %v6945_v17, %v7651_v43 }
 0x5b8   : > { %v4112_v54 = vadd.f32 %v3491_v30, %v3490_v23  ;;  %4959 = vmatpush.msra.mxu1 %v4652_v26  ;;  %v2907_v2 = vpop.f32.mrf.mxu1  ;;  %v6139_v23 = vld [vmem:[%s8174_s5 + $0x3c0] sm:$0xff]  ;;  %v4647_v26 = vmul.f32 %v6945_v17, %v4054_v38  ;;  %v4645_v30 = vmul.f32 %v6945_v17, %v7676_v16  ;;  %v4642_v16 = vmul.f32 %v6945_v17, %v7656_v18  ;;  %v6140_v18 = vld [vmem:[%s8174_s5 + $0x3c8] sm:$0xff] }
 0x5b9   : > { %v3493_v40 = vmax.f32 %v2907_v2, 0.0  ;;  %v4637_v2 = vmul.f32 %v6945_v17, %v7634_v46  ;;  %v4682_v46 = vmul.f32 %v6945_v17, %v6939_v58  ;;  %v4679_v58 = vmul.f32 %v6945_v17, %v6915_v8 }
 0x5ba   : > { %4960 = vmatpush.msra.mxu1 %v4651_v25  ;;  %4113 = vadd.xlane.f32.xlu2 %v4112_v54  ;;  %v2536_v0 = vpop.f32.mrf.mxu2  ;;  %v4676_v8 = vmul.f32 %v6945_v17, %v6893_v34  ;;  %v4673_v34 = vmul.f32 %v6945_v17, %v6865_v63  ;;  %v4670_v63 = vmul.f32 %v6945_v17, %v6843_v32 }
 0x5bb   : > { %v3714_v3 = vmax.f32 %v2536_v0, 0.0 }
 0x5bc   : > { %4961 = vmatpush.msra.mxu1 %v4650_v10  ;;  %v3187_v60 = vpop.f32.mrf.mxu3 }
 0x5bd   : > { %v4448_v35 = vadd.f32 %v3715_v14, %v3714_v3  ;;  %v2258_v49 = vpop.f32.mrf.mxu0  ;;  %v3717_v25 = vmax.f32 %v3187_v60, 0.0  ;;  %v4684_v60 = vmul.f32 %v6945_v17, %v6991_v41  ;;  %v7755_v43 = vpop.xlane.xlu2 %4404 }
 0x5be   : > { %4962 = vmatpush.msra.mxu1 %v4649_v57  ;;  %v3492_v53 = vmax.f32 %v2258_v49, 0.0  ;;  %v4639_v57 = vmul.f32 %v6945_v17, %v7639_v13 }
 0x5bf   : > { %4410 = vadd.xlane.f32.xlu0 %v7611_v20  ;;  %4449 = vadd.xlane.f32.xlu1 %v4448_v35  ;;  %v4644_v20 = vmul.f32 %v6945_v17, %v7686_v51  ;;  %v4641_v51 = vmul.f32 %v6945_v17, %v7669_v22  ;;  %v4814_v22 = vld [vmem:[%s8175_s6 + $0x8] sm:$0xff] }
 0x5c0   : > { %4963 = vmatpush.msra.mxu1 %v4648_v28  ;;  %v4115_v38 = vadd.f32 %v3493_v40, %v3492_v53  ;;  %4824 = vst [vmem:[#allocation1 + $0x20] ss:$4 sm:$0xff] %v4814_v22  ;;  %v4681_v40 = vmul.f32 %v6945_v17, %v6941_v1  ;;  %v4671_v22 = vmul.f32 %v6945_v17, %v6857_v48 }
 0x5c1   : > { %6008 = vmatmul.msk.bf16.gmra.mxu3 %vm1580_vm3, %v6139_v23  ;;  %v4716_v48 = vmul.f32 %v6945_v17, %v7316_v52  ;;  %v4713_v52 = vmul.f32 %v6945_v17, %v7267_v9  ;;  %v4711_v9 = vmul.f32 %v6945_v17, %v7243_v33  ;;  %v4708_v33 = vmul.f32 %v6945_v17, %v7218_v62  ;;  %v8245_v62 = vld [vmem:[#allocation21_spill] sm:$0xff] }
 0x5c2   : > { %4964 = vmatpush.msra.mxu1 %v4647_v26  ;;  %4359 = vadd.xlane.f32.xlu2 %v7454_v47  ;;  %v2538_v44 = vpop.f32.mrf.mxu2  ;;  %v7757_v26 = vpop.xlane.xlu0 %4398 }
 0x5c3   : > { %v3716_v55 = vmax.f32 %v2538_v44, 0.0 }
 0x5c4   : > { %4965 = vmatpush.msra.mxu1 %v4646_v4  ;;  %v3190_v7 = vpop.f32.mrf.mxu3 }
 0x5c5   : > { %v4451_v47 = vadd.f32 %v3717_v25, %v3716_v55  ;;  %v3719_v37 = vmax.f32 %v3190_v7, 0.0  ;;  %v4678_v55 = vmul.f32 %v6945_v17, %v6919_v12  ;;  %v4677_v7 = vmul.f32 %v6945_v17, %v6888_v31 }
 0x5c6   : > { %4966 = vmatpush.msra.mxu1 %v4645_v30  ;;  %v4680_v30 = vmul.f32 %v6945_v17, %v6913_v6  ;;  %v4675_v12 = vmul.f32 %v6945_v17, %v6895_v39 }
 0x5c7   : > { %5880 = vmatmul.msk.bf16.gmra.mxu2 %vm1580_vm3, %v6139_v23  ;;  %4116 = vadd.xlane.f32.xlu0 %v4115_v38  ;;  %v4830_v49 = vld.sshfl [vmem:[#allocation1 + $0x28] sm:$0xff pattern:$0x73625140]  ;;  %v4683_v23 = vmul.f32 %v6945_v17, %v6936_v56  ;;  %v6141_v38 = vld [vmem:[%s8174_s5 + $0x3d0] sm:$0xff] }
 0x5c8   : > { %4967 = vmatpush.msra.mxu1 %v4644_v20 }
 0x5ca   : > { %4968 = vmatpush.msra.mxu1 %v4643_v11  ;;  %4452 = vadd.xlane.f32.xlu2 %v4451_v47  ;;  %v2541_v50 = vpop.f32.mrf.mxu2  ;;  %v7774_v1 = vpop.xlane.xlu0 %4071 }
 0x5cb   : > { %v3718_v54 = vmax.f32 %v2541_v50, 0.0 }
 0x5cc   : > { %4969 = vmatpush.msra.mxu1 %v4642_v16  ;;  %v3192_v10 = vpop.f32.mrf.mxu3 }
 0x5cd   : > { %v7733_v14 = vadd.f32 %v3719_v37, %v3718_v54  ;;  %v3721_v28 = vmax.f32 %v3192_v10, 0.0  ;;  %v7772_v20 = vpop.xlane.xlu2 %4077  ;;  %v4674_v37 = vmul.f32 %v6945_v17, %v6863_v61  ;;  %v7796_v10 = vpop.xlane.xlu1 %4401  ;;  %v6142_v61 = vld [vmem:[%s8174_s5 + $0x3d8] sm:$0xff] }
 0x5ce   : > { %4970 = vmatpush.msra.mxu1 %v4641_v51 }
 0x5d0   : > { %4971 = vmatpush.msra.mxu1 %v4640_v15 }
 0x5d1   : > { %6009 = vmatmul.msk.bf16.gmra.mxu3 %vm1580_vm3, %v6140_v18 }
 0x5d2   : > { %4972 = vmatpush.msra.mxu1 %v4639_v57  ;;  %v2543_v0 = vpop.f32.mrf.mxu2 }
 0x5d3   : > { %v3720_v3 = vmax.f32 %v2543_v0, 0.0  ;;  %v4669_v0 = vmul.f32 %v6945_v17, %v6845_v36  ;;  %v4714_v36 = vmul.f32 %v6945_v17, %v7262_v27 }
 0x5d4   : > { %4973 = vmatpush.msra.mxu1 %v4638_v5  ;;  %v3195_v13 = vpop.f32.mrf.mxu3 }
 0x5d5   : > { %v7750_v35 = vadd.f32 %v3721_v28, %v3720_v3  ;;  %v3723_v41 = vmax.f32 %v3195_v13, 0.0  ;;  %v7790_v51 = vpop.xlane.xlu2 %4413  ;;  %v7792_v54 = vpop.xlane.xlu0 %4080 }
 0x5d6   : > { %4974 = vmatpush.msra.mxu1 %v4637_v2  ;;  %v7814_v2 = vpop.xlane.xlu1 %4074 }
 0x5d7   : > { %5881 = vmatmul.msk.bf16.gmra.mxu2 %vm1580_vm3, %v6140_v18  ;;  %4975 = vmatmul.f32.vlgmr.msra.gmra.mxu1 %v4830_v49  ;;  %v4672_v18 = vmul.f32 %v6945_v17, %v6883_v21  ;;  %v4832_v49 = vld.sshfl [vmem:[#allocation1 + $0x38] sm:$0xff pattern:$0x73625140] }
 0x5d8   : > { %4999 = vmatpush.msrb.mxu1 %v4684_v60 }
 0x5da   : > { %5000 = vmatpush.msrb.mxu1 %v4683_v23  ;;  %v2546_v53 = vpop.f32.mrf.mxu2  ;;  %v4715_v23 = vmul.f32 %v6945_v17, %v7264_v29  ;;  %v4712_v29 = vmul.f32 %v6945_v17, %v7245_v59  ;;  %v4709_v59 = vmul.f32 %v6945_v17, %v7220_v19  ;;  %v4706_v19 = vmul.f32 %v6945_v17, %v7195_v42  ;;  %v6144_v42 = vld [vmem:[%s8174_s5 + $0x3e8] sm:$0xff] }
 0x5db   : > { %v3722_v4 = vmax.f32 %v2546_v53, 0.0 }
 0x5dc   : > { %5001 = vmatpush.msrb.mxu1 %v4682_v46  ;;  %v3197_v56 = vpop.f32.mrf.mxu3 }
 0x5dd   : > { %v7765_v44 = vadd.f32 %v3723_v41, %v3722_v4  ;;  %v3725_v25 = vmax.f32 %v3197_v56, 0.0 }
 0x5de   : > { %5002 = vmatpush.msrb.mxu1 %v4681_v40  ;;  %v7833_v27 = vpop.xlane.xlu1 %4416 }
 0x5e0   : > { %5003 = vmatpush.msrb.mxu1 %v4680_v30 }
 0x5e1   : > { %6010 = vmatmul.msk.bf16.gmra.mxu3 %vm1580_vm3, %v6141_v38 }
 0x5e2   : > { %5004 = vmatpush.msrb.mxu1 %v4679_v58  ;;  %v2548_v6 = vpop.f32.mrf.mxu2  ;;  %v7818_v60 = vpop.xlane.xlu0 %4419  ;;  %v4710_v58 = vmul.f32 %v6945_v17, %v7248_v45  ;;  %v4707_v45 = vmul.f32 %v6945_v17, %v7225_v24 }
 0x5e3   : > { %v3724_v11 = vmax.f32 %v2548_v6, 0.0 }
 0x5e4   : > { %5005 = vmatpush.msrb.mxu1 %v4678_v55  ;;  %v3200_v16 = vpop.f32.mrf.mxu3 }
 0x5e5   : > { %v7783_v47 = vadd.f32 %v3725_v25, %v3724_v11  ;;  %v3727_v31 = vmax.f32 %v3200_v16, 0.0  ;;  %v7809_v5 = vpop.xlane.xlu2 %4086 }
 0x5e6   : > { %5006 = vmatpush.msrb.mxu1 %v4677_v7 }
 0x5e7   : > { %5882 = vmatmul.msk.bf16.gmra.mxu2 %vm1580_vm3, %v6141_v38  ;;  %v6143_v38 = vld [vmem:[%s8174_s5 + $0x3e0] sm:$0xff] }
 0x5e8   : > { %5007 = vmatpush.msrb.mxu1 %v4676_v8  ;;  %v7849_v8 = vpop.xlane.xlu1 %4083 }
 0x5ea   : > { %5008 = vmatpush.msrb.mxu1 %v4675_v12  ;;  %v2551_v50 = vpop.f32.mrf.mxu2 }
 0x5eb   : > { %v3726_v15 = vmax.f32 %v2551_v50, 0.0 }
 0x5ec   : > { %5009 = vmatpush.msrb.mxu1 %v4674_v37  ;;  %v3202_v39 = vpop.f32.mrf.mxu3 }
 0x5ed   : > { %v7800_v57 = vadd.f32 %v3727_v31, %v3726_v15  ;;  %v3729_v28 = vmax.f32 %v3202_v39, 0.0  ;;  %v7827_v40 = vpop.xlane.xlu2 %4422  ;;  %v7831_v56 = vpop.xlane.xlu0 %4089  ;;  %v4705_v31 = vmul.f32 %v6945_v17, %v8245_v62  ;;  %v8246_v15 = vld [vmem:[#allocation22_spill] sm:$0xff]  ;;  %v8255_v62 = vld [vmem:[#allocation47_spill] sm:$0xff] }
 0x5ee   : > { %5010 = vmatpush.msrb.mxu1 %v4673_v34  ;;  %v4704_v24 = vmul.f32 %v6945_v17, %v8246_v15  ;;  %v6145_v15 = vld [vmem:[%s8174_s5 + $0x3f0] sm:$0xff] }
 0x5f0   : > { %5011 = vmatpush.msrb.mxu1 %v4672_v18 }
 0x5f1   : > { %6011 = vmatmul.msk.bf16.gmra.mxu3 %vm1580_vm3, %v6142_v61 }
 0x5f2   : > { %5012 = vmatpush.msrb.mxu1 %v4671_v22  ;;  %v2553_v21 = vpop.f32.mrf.mxu2  ;;  %v8247_v22 = vld [vmem:[#allocation19_spill] sm:$0xff] }
 0x5f3   : > { %v3728_v3 = vmax.f32 %v2553_v21, 0.0 }
 0x5f4   : > { %5013 = vmatpush.msrb.mxu1 %v4670_v63  ;;  %v3205_v13 = vpop.f32.mrf.mxu3  ;;  %v4703_v63 = vmul.f32 %v6945_v17, %v8247_v22  ;;  %v8257_v22 = vld [vmem:[#allocation48_spill] sm:$0xff] }
 0x5f5   : > { %v4469_v32 = vadd.f32 %v3729_v28, %v3728_v3  ;;  %v3731_v46 = vmax.f32 %v3205_v13, 0.0  ;;  %v8248_v3 = vld [vmem:[#allocation18_spill] sm:$0xff] }
 0x5f6   : > { %5014 = vmatpush.msrb.mxu1 %v4669_v0  ;;  %v7871_v0 = vpop.xlane.xlu1 %4425  ;;  %v4702_v28 = vmul.f32 %v6945_v17, %v8248_v3 }
 0x5f7   : > { %5883 = vmatmul.msk.bf16.gmra.mxu2 %vm1580_vm3, %v6142_v61  ;;  %5015 = vmatmul.f32.vlgmr.msrb.gmra.mxu1 %v4832_v49  ;;  %v8250_v49 = vld [vmem:[#allocation54_spill] sm:$0xff] }
 0x5f8   : > { %5039 = vmatpush.msra.mxu1 %v4716_v48  ;;  %4470 = vadd.xlane.f32.xlu0 %v4469_v32  ;;  %v8249_v48 = vld [vmem:[#allocation20_spill] sm:$0xff] }
 0x5f9   : > { %v4701_v13 = vmul.f32 %v6945_v17, %v8249_v48  ;;  %v8258_v48 = vld [vmem:[#allocation44_spill] sm:$0xff] }
 0x5fa   : > { %5040 = vmatpush.msra.mxu1 %v4715_v23  ;;  %v2556_v41 = vpop.f32.mrf.mxu2  ;;  %v7853_v12 = vpop.xlane.xlu0 %4428  ;;  %v4748_v23 = vmul.f32 %v6945_v17, %v8250_v49 }
 0x5fb   : > { %v3730_v53 = vmax.f32 %v2556_v41, 0.0  ;;  %v8251_v41 = vld [vmem:[#allocation56_spill] sm:$0xff] }
 0x5fc   : > { %5041 = vmatpush.msra.mxu1 %v4714_v36  ;;  %v3207_v4 = vpop.f32.mrf.mxu3 }
 0x5fd   : > { %v4472_v30 = vadd.f32 %v3731_v46, %v3730_v53  ;;  %v3733_v7 = vmax.f32 %v3207_v4, 0.0  ;;  %v7845_v11 = vpop.xlane.xlu2 %4095  ;;  %v4747_v53 = vmul.f32 %v6945_v17, %v8251_v41 }
 0x5fe   : > { %5042 = vmatpush.msra.mxu1 %v4713_v52 }
 0x5ff   : > { %4473 = vadd.xlane.f32.xlu2 %v4472_v30  ;;  %v8252_v30 = vld [vmem:[#allocation50_spill] sm:$0xff] }
 0x600   : > { %5043 = vmatpush.msra.mxu1 %v4712_v29 }
 0x601   : > { %6012 = vmatmul.msk.bf16.gmra.mxu3 %vm1580_vm3, %v6143_v38 }
 0x602   : > { %5044 = vmatpush.msra.mxu1 %v4711_v9  ;;  %v2558_v55 = vpop.f32.mrf.mxu2  ;;  %v7887_v9 = vpop.xlane.xlu1 %4092 }
 0x603   : > { %v3732_v6 = vmax.f32 %v2558_v55, 0.0  ;;  %v4827_v55 = vld.sshfl [vmem:[#allocation1 + $0x10] sm:$0xff pattern:$0x73625140] }
 0x604   : > { %5045 = vmatpush.msra.mxu1 %v4710_v58  ;;  %v3210_v25 = vpop.f32.mrf.mxu3  ;;  %4915 = vmatmul.f32.vlgmr.msrb.gmra.mxu0 %v4827_v55 }
 0x605   : > { %v4475_v16 = vadd.f32 %v3733_v7, %v3732_v6  ;;  %v3735_v37 = vmax.f32 %v3210_v25, 0.0  ;;  %v7862_v61 = vpop.xlane.xlu2 %4431  ;;  %v7869_v21 = vpop.xlane.xlu0 %4098  ;;  %v8253_v6 = vld [vmem:[#allocation52_spill] sm:$0xff] }
 0x606   : > { %5046 = vmatpush.msra.mxu1 %v4709_v59  ;;  %v4815_v59 = vld [vmem:[%s8175_s6 + $0x10] sm:$0xff]  ;;  %v4745_v7 = vmul.f32 %v6945_v17, %v8253_v6 }
 0x607   : > { %5884 = vmatmul.msk.bf16.gmra.mxu2 %vm1580_vm3, %v6143_v38  ;;  %4476 = vadd.xlane.f32.xlu1 %v4475_v16  ;;  %v4746_v38 = vmul.f32 %v6945_v17, %v8252_v30  ;;  %4833 = vst [vmem:[#allocation1] ss:$4 sm:$0xff] %v4815_v59  ;;  %v8254_v16 = vld [vmem:[#allocation51_spill] sm:$0xff]  ;;  %v8261_v30 = vld [vmem:[#allocation42_spill] sm:$0xff] }
 0x608   : > { %5047 = vmatpush.msra.mxu1 %v4708_v33 }
 0x60a   : > { %5048 = vmatpush.msra.mxu1 %v4707_v45  ;;  %v2561_v50 = vpop.f32.mrf.mxu2  ;;  %v4744_v45 = vmul.f32 %v6945_v17, %v8254_v16  ;;  %v7911_v3 = vpop.xlane.xlu1 %4434 }
 0x60b   : > { %v3734_v34 = vmax.f32 %v2561_v50, 0.0 }
 0x60c   : > { %5049 = vmatpush.msra.mxu1 %v4706_v19  ;;  %v3212_v39 = vpop.f32.mrf.mxu3 }
 0x60d   : > { %v4478_v18 = vadd.f32 %v3735_v37, %v3734_v34  ;;  %v3737_v46 = vmax.f32 %v3212_v39, 0.0 }
 0x60e   : > { %5050 = vmatpush.msra.mxu1 %v4705_v31  ;;  %v4743_v31 = vmul.f32 %v6945_v17, %v8255_v62 }
 0x60f   : > { %4479 = vadd.xlane.f32.xlu0 %v4478_v18 }
 0x610   : > { %5051 = vmatpush.msra.mxu1 %v4704_v24  ;;  %v8256_v24 = vld [vmem:[#allocation49_spill] sm:$0xff] }
 0x611   : > { %6013 = vmatmul.msk.bf16.gmra.mxu3 %vm1580_vm3, %v6144_v42  ;;  %v4742_v39 = vmul.f32 %v6945_v17, %v8256_v24 }
 0x612   : > { %5052 = vmatpush.msra.mxu1 %v4703_v63  ;;  %v2563_v32 = vpop.f32.mrf.mxu2  ;;  %v7889_v58 = vpop.xlane.xlu0 %4437  ;;  %v4741_v63 = vmul.f32 %v6945_v17, %v8257_v22 }
 0x613   : > { %v3736_v36 = vmax.f32 %v2563_v32, 0.0  ;;  %v4102_v55 = vpop.xlane.xlu1 %4101 }
 0x614   : > { %5053 = vmatpush.msra.mxu1 %v4702_v28  ;;  %v3215_v52 = vpop.f32.mrf.mxu3 }
 0x615   : > { %v4481_v29 = vadd.f32 %v3737_v46, %v3736_v36  ;;  %v7882_v4 = vpop.xlane.xlu2 %4104  ;;  %v3739_v33 = vmax.f32 %v3215_v52, 0.0  ;;  %v8259_v36 = vld [vmem:[#allocation46_spill] sm:$0xff] }
 0x616   : > { %5054 = vmatpush.msra.mxu1 %v4701_v13  ;;  %v4740_v13 = vmul.f32 %v6945_v17, %v8258_v48  ;;  %v4739_v46 = vmul.f32 %v6945_v17, %v8259_v36 }
 0x617   : > { %5885 = vmatmul.msk.bf16.gmra.mxu2 %vm1580_vm3, %v6144_v42  ;;  %4482 = vadd.xlane.f32.xlu2 %v4481_v29  ;;  %v4836_v42 = vld.sshfl [vmem:[#allocation1 + $0x8] sm:$0xff pattern:$0x73625140] }
 0x618   : > { %5079 = vmatpush.msrb.mxu1 %v4748_v23 }
 0x619   : > { %5055 = vmatmul.f32.vlgmr.msra.gmra.mxu1 %v4836_v42 }
 0x61a   : > { %5080 = vmatpush.msrb.mxu1 %v4747_v53  ;;  %v2566_v25 = vpop.f32.mrf.mxu2  ;;  %v8260_v53 = vld [vmem:[#allocation45_spill] sm:$0xff] }
 0x61b   : > { %v3738_v19 = vmax.f32 %v2566_v25, 0.0  ;;  %v4738_v29 = vmul.f32 %v6945_v17, %v8260_v53 }
 0x61c   : > { %5081 = vmatpush.msrb.mxu1 %v4746_v38  ;;  %v3217_v37 = vpop.f32.mrf.mxu3  ;;  %v4737_v38 = vmul.f32 %v6945_v17, %v8261_v30 }
 0x61d   : > { %v4484_v50 = vadd.f32 %v3739_v33, %v3738_v19  ;;  %v7900_v34 = vpop.xlane.xlu2 %4440  ;;  %v7907_v18 = vpop.xlane.xlu0 %4107  ;;  %v3741_v49 = vmax.f32 %v3217_v37, 0.0  ;;  %v8262_v33 = vld [vmem:[#allocation43_spill] sm:$0xff] }
 0x61e   : > { %5082 = vmatpush.msrb.mxu1 %v4745_v7  ;;  %v4736_v25 = vmul.f32 %v6945_v17, %v8262_v33  ;;  %v8263_v19 = vld [vmem:[#allocation39_spill] sm:$0xff] }
 0x61f   : > { %4485 = vadd.xlane.f32.xlu1 %v4484_v50  ;;  %v4735_v37 = vmul.f32 %v6945_v17, %v8263_v19  ;;  %v6146_v50 = vld [vmem:[%s8174_s5 + $0x3f8] sm:$0xff]  ;;  %v4665_v19 = vmul.f32 %v6945_v17, %v7907_v18 }
 0x620   : > { %5083 = vmatpush.msrb.mxu1 %v4744_v45 }
 0x621   : > { %6014 = vmatmul.msk.bf16.gmra.mxu3 %vm1580_vm3, %v6145_v15 }
 0x622   : > { %5084 = vmatpush.msrb.mxu1 %v4743_v31  ;;  %v2568_v28 = vpop.f32.mrf.mxu2 }
 0x623   : > { %v3740_v32 = vmax.f32 %v2568_v28, 0.0 }
 0x624   : > { %5085 = vmatpush.msrb.mxu1 %v4742_v39  ;;  %v3220_v23 = vpop.f32.mrf.mxu3  ;;  %v8265_v39 = vld [vmem:[#allocation41_spill] sm:$0xff] }
 0x625   : > { %v4487_v52 = vadd.f32 %v3741_v49, %v3740_v32  ;;  %v7918_v41 = vpop.xlane.xlu2 %4443  ;;  %v3743_v59 = vmax.f32 %v3220_v23, 0.0  ;;  %v4733_v42 = vmul.f32 %v6945_v17, %v8265_v39 }
 0x626   : > { %5086 = vmatpush.msrb.mxu1 %v4741_v63  ;;  %v4777_v18 = vmul.f32 %v6945_v17, %v7918_v41  ;;  %v4660_v41 = vmul.f32 %v6945_v17, %v7887_v9  ;;  %v4658_v9 = vmul.f32 %v6945_v17, %v7809_v5  ;;  %v4770_v5 = vmul.f32 %v6945_v17, %v7827_v40 }
 0x627   : > { %5886 = vmatmul.msk.bf16.gmra.mxu2 %vm1580_vm3, %v6145_v15  ;;  %4488 = vadd.xlane.f32.xlu0 %v4487_v52  ;;  %v8264_v15 = vld [vmem:[#allocation40_spill] sm:$0xff]  ;;  %v4654_v40 = vmul.f32 %v6945_v17, %v7814_v2  ;;  %v8267_v2 = vld [vmem:[#allocation14_spill] sm:$0xff] }
 0x628   : > { %5087 = vmatpush.msrb.mxu1 %v4740_v13  ;;  %v4734_v24 = vmul.f32 %v6945_v17, %v8264_v15  ;;  %v4111_v13 = vpop.xlane.xlu1 %4110  ;;  %v4663_v15 = vmul.f32 %v6945_v17, %v4102_v55  ;;  %v4661_v55 = vmul.f32 %v6945_v17, %v7845_v11 }
 0x62a   : > { %5088 = vmatpush.msrb.mxu1 %v4739_v46  ;;  %v2571_v6 = vpop.f32.mrf.mxu2  ;;  %v4447_v7 = vpop.xlane.xlu0 %4446 }
 0x62b   : > { %v3742_v16 = vmax.f32 %v2571_v6, 0.0 }
 0x62c   : > { %5089 = vmatpush.msrb.mxu1 %v4738_v29  ;;  %v3222_v45 = vpop.f32.mrf.mxu3 }
 0x62d   : > { %v4490_v62 = vadd.f32 %v3743_v59, %v3742_v16  ;;  %v4114_v31 = vpop.xlane.xlu2 %4113  ;;  %v3745_v48 = vmax.f32 %v3222_v45, 0.0  ;;  %v4666_v59 = vmul.f32 %v6945_v17, %v4111_v13  ;;  %v4829_v16 = vld.sshfl [vmem:[#allocation1 + $0x20] sm:$0xff pattern:$0x73625140]  ;;  %v4659_v13 = vmul.f32 %v6945_v17, %v7831_v56 }
 0x62e   : > { %5090 = vmatpush.msrb.mxu1 %v4737_v38  ;;  %v4667_v53 = vmul.f32 %v6945_v17, %v4114_v31  ;;  %4955 = vmatmul.f32.vlgmr.msra.gmra.mxu0 %v4829_v16  ;;  %v4778_v31 = vmul.f32 %v6945_v17, %v4447_v7  ;;  %v4775_v7 = vmul.f32 %v6945_v17, %v7889_v58  ;;  %v4831_v16 = vld.sshfl [vmem:[#allocation1 + $0x30] sm:$0xff pattern:$0x73625140] }
 0x62f   : > { %4491 = vadd.xlane.f32.xlu2 %v4490_v62  ;;  %v4664_v62 = vmul.f32 %v6945_v17, %v7882_v4  ;;  %v4776_v4 = vmul.f32 %v6945_v17, %v7900_v34  ;;  %v4657_v56 = vmul.f32 %v6945_v17, %v7849_v8  ;;  %v4769_v8 = vmul.f32 %v6945_v17, %v7818_v60 }
 0x630   : > { %5091 = vmatpush.msrb.mxu1 %v4736_v25  ;;  %v4653_v60 = vmul.f32 %v6945_v17, %v7774_v1 }
 0x631   : > { %6015 = vmatmul.msk.bf16.gmra.mxu3 %vm1580_vm3, %v6146_v50 }
 0x632   : > { %5092 = vmatpush.msrb.mxu1 %v4735_v37  ;;  %v2573_v22 = vpop.f32.mrf.mxu2  ;;  %v7937_v63 = vpop.xlane.xlu0 %4410 }
 0x633   : > { %v3744_v28 = vmax.f32 %v2573_v22, 0.0  ;;  %v4450_v25 = vpop.xlane.xlu1 %4449  ;;  %v4662_v22 = vmul.f32 %v6945_v17, %v7869_v21 }
 0x634   : > { %5093 = vmatpush.msrb.mxu1 %v4734_v24  ;;  %v3225_v32 = vpop.f32.mrf.mxu3  ;;  %v4779_v37 = vmul.f32 %v6945_v17, %v4450_v25  ;;  %v4699_v25 = vmul.f32 %v6945_v17, %v8267_v2 }
 0x635   : > { %v4493_v49 = vadd.f32 %v3745_v48, %v3744_v28  ;;  %v7939_v23 = vpop.xlane.xlu2 %4359  ;;  %v3747_v36 = vmax.f32 %v3225_v32, 0.0  ;;  %v4774_v48 = vmul.f32 %v6945_v17, %v7911_v3  ;;  %v4773_v32 = vmul.f32 %v6945_v17, %v7862_v61 }
 0x636   : > { %5094 = vmatpush.msrb.mxu1 %v4733_v42  ;;  %v4772_v3 = vmul.f32 %v6945_v17, %v7853_v12  ;;  %v4656_v61 = vmul.f32 %v6945_v17, %v7792_v54  ;;  %v4655_v12 = vmul.f32 %v6945_v17, %v7772_v20  ;;  %v4768_v54 = vmul.f32 %v6945_v17, %v7833_v27 }
 0x637   : > { %5887 = vmatmul.msk.bf16.gmra.mxu2 %vm1580_vm3, %v6146_v50  ;;  %4494 = vadd.xlane.f32.xlu1 %v4493_v49  ;;  %v4767_v20 = vmul.f32 %v6945_v17, %v7790_v51  ;;  %v4766_v27 = vmul.f32 %v6945_v17, %v7937_v63 }
 0x63a   : > { %v2576_v46 = vpop.f32.mrf.mxu2  ;;  %v4117_v52 = vpop.xlane.xlu0 %4116 }
 0x63b   : > { %v3746_v29 = vmax.f32 %v2576_v46, 0.0  ;;  %v4668_v30 = vmul.f32 %v6945_v17, %v4117_v52 }
 0x63c   : > { %v3227_v38 = vpop.f32.mrf.mxu3 }
 0x63d   : > { %v4496_v6 = vadd.f32 %v3747_v36, %v3746_v29  ;;  %v4453_v33 = vpop.xlane.xlu2 %4452  ;;  %4979 = vmatpush.msrb.mxu0 %v4668_v30  ;;  %v3749_v39 = vmax.f32 %v3227_v38, 0.0  ;;  %v4771_v36 = vmul.f32 %v6945_v17, %v7871_v0  ;;  %v8266_v38 = vld [vmem:[#allocation17_spill] sm:$0xff] }
 0x63e   : > { %v4780_v45 = vmul.f32 %v6945_v17, %v4453_v33 }
 0x63f   : > { %4497 = vadd.xlane.f32.xlu0 %v4496_v6  ;;  %4980 = vmatpush.msrb.mxu0 %v4667_v53 }
 0x640   : > { %5119 = vmatpush.msra.mxu1 %v4780_v45  ;;  %v4816_v45 = vld [vmem:[%s8175_s6 + $0x18] sm:$0xff] }
 0x641   : > { %4981 = vmatpush.msrb.mxu0 %v4666_v59  ;;  %v4700_v59 = vmul.f32 %v6945_v17, %v8266_v38  ;;  %4834 = vst [vmem:[#allocation1 + $0x20] ss:$4 sm:$0xff] %v4816_v45  ;;  %v8281_v38 = vld [vmem:[#allocation4_spill] sm:$0xff]  ;;  %v4835_v45 = vld.sshfl [vmem:[#allocation1] sm:$0xff pattern:$0x73625140] }
 0x642   : > { %5120 = vmatpush.msra.mxu1 %v4779_v37  ;;  %v2578_v50 = vpop.f32.mrf.mxu2  ;;  %v8269_v37 = vld [vmem:[#allocation16_spill] sm:$0xff] }
 0x643   : > { %v3748_v24 = vmax.f32 %v2578_v50, 0.0  ;;  %4982 = vmatpush.msrb.mxu0 %v4665_v19  ;;  %v8268_v19 = vld [vmem:[#allocation15_spill] sm:$0xff] }
 0x644   : > { %5121 = vmatpush.msra.mxu1 %v4778_v31  ;;  %v3230_v42 = vpop.f32.mrf.mxu3  ;;  %v4698_v63 = vmul.f32 %v6945_v17, %v8268_v19  ;;  %v8270_v31 = vld [vmem:[#allocation11_spill] sm:$0xff] }
 0x645   : > { %v4499_v28 = vadd.f32 %v3749_v39, %v3748_v24  ;;  %4983 = vmatpush.msrb.mxu0 %v4664_v62  ;;  %v3751_v21 = vmax.f32 %v3230_v42, 0.0  ;;  %v4697_v62 = vmul.f32 %v6945_v17, %v8269_v37  ;;  %v4696_v50 = vmul.f32 %v6945_v17, %v8270_v31  ;;  %v8285_v31 = vld [vmem:[#allocation37_spill] sm:$0xff] }
 0x646   : > { %5122 = vmatpush.msra.mxu1 %v4777_v18  ;;  %v8271_v18 = vld [vmem:[#allocation12_spill] sm:$0xff] }
 0x647   : > { %4500 = vadd.xlane.f32.xlu0 %v4499_v28  ;;  %4984 = vmatpush.msrb.mxu0 %v4663_v15  ;;  %v4695_v42 = vmul.f32 %v6945_v17, %v8271_v18  ;;  %v8287_v18 = vld [vmem:[#allocation33_spill] sm:$0xff] }
 0x648   : > { %5123 = vmatpush.msra.mxu1 %v4776_v4  ;;  %v8272_v4 = vld [vmem:[#allocation13_spill] sm:$0xff] }
 0x649   : > { %4985 = vmatpush.msrb.mxu0 %v4662_v22 }
 0x64a   : > { %5124 = vmatpush.msra.mxu1 %v4775_v7  ;;  %v2581_v34 = vpop.f32.mrf.mxu2  ;;  %v8273_v7 = vld [vmem:[#allocation8_spill] sm:$0xff] }
 0x64b   : > { %v3750_v11 = vmax.f32 %v2581_v34, 0.0  ;;  %4986 = vmatpush.msrb.mxu0 %v4661_v55  ;;  %v4694_v55 = vmul.f32 %v6945_v17, %v8272_v4 }
 0x64c   : > { %5125 = vmatpush.msra.mxu1 %v4774_v48  ;;  %v3232_v58 = vpop.f32.mrf.mxu3  ;;  %v8274_v48 = vld [vmem:[#allocation9_spill] sm:$0xff] }
 0x64d   : > { %v7973_v49 = vadd.f32 %v3751_v21, %v3750_v11  ;;  %4987 = vmatpush.msrb.mxu0 %v4660_v41  ;;  %v3753_v53 = vmax.f32 %v3232_v58, 0.0  ;;  %v4693_v41 = vmul.f32 %v6945_v17, %v8273_v7  ;;  %v4692_v34 = vmul.f32 %v6945_v17, %v8274_v48  ;;  %v8288_v7 = vld [vmem:[#allocation34_spill] sm:$0xff]  ;;  %v8289_v48 = vld [vmem:[#allocation29_spill] sm:$0xff] }
 0x64e   : > { %5126 = vmatpush.msra.mxu1 %v4773_v32  ;;  %v8275_v32 = vld [vmem:[#allocation10_spill] sm:$0xff] }
 0x64f   : > { %4988 = vmatpush.msrb.mxu0 %v4659_v13  ;;  %v4691_v58 = vmul.f32 %v6945_v17, %v8275_v32 }
 0x650   : > { %5127 = vmatpush.msra.mxu1 %v4772_v3 }
 0x651   : > { %4989 = vmatpush.msrb.mxu0 %v4658_v9 }
 0x652   : > { %5128 = vmatpush.msra.mxu1 %v4771_v36  ;;  %v2583_v46 = vpop.f32.mrf.mxu2 }
 0x653   : > { %v3752_v52 = vmax.f32 %v2583_v46, 0.0  ;;  %4990 = vmatpush.msrb.mxu0 %v4657_v56  ;;  %v8276_v56 = vld [vmem:[#allocation5_spill] sm:$0xff]  ;;  %v8278_v46 = vld [vmem:[#allocation7_spill] sm:$0xff] }
 0x654   : > { %5129 = vmatpush.msra.mxu1 %v4770_v5  ;;  %v3235_v0 = vpop.f32.mrf.mxu3  ;;  %v4690_v36 = vmul.f32 %v6945_v17, %v8276_v56 }
 0x655   : > { %v7989_v29 = vadd.f32 %v3753_v53, %v3752_v52  ;;  %4991 = vmatpush.msrb.mxu0 %v4656_v61  ;;  %v3755_v30 = vmax.f32 %v3235_v0, 0.0  ;;  %v8277_v61 = vld [vmem:[#allocation6_spill] sm:$0xff] }
 0x656   : > { %5130 = vmatpush.msra.mxu1 %v4769_v8  ;;  %v4689_v5 = vmul.f32 %v6945_v17, %v8277_v61  ;;  %v8279_v0 = vld [vmem:[#allocation2_spill] sm:$0xff] }
 0x657   : > { %4992 = vmatpush.msrb.mxu0 %v4655_v12  ;;  %v4688_v12 = vmul.f32 %v6945_v17, %v8278_v46 }
 0x658   : > { %5131 = vmatpush.msra.mxu1 %v4768_v54  ;;  %v4687_v54 = vmul.f32 %v6945_v17, %v8279_v0 }
 0x659   : > { %4993 = vmatpush.msrb.mxu0 %v4654_v40 }
 0x65a   : > { %5132 = vmatpush.msra.mxu1 %v4767_v20  ;;  %v2586_v6 = vpop.f32.mrf.mxu2 }
 0x65b   : > { %v3754_v33 = vmax.f32 %v2586_v6, 0.0  ;;  %4994 = vmatpush.msrb.mxu0 %v4653_v60  ;;  %v8280_v60 = vld [vmem:[#allocation3_spill] sm:$0xff] }
 0x65c   : > { %5133 = vmatpush.msra.mxu1 %v4766_v27  ;;  %v3237_v51 = vpop.f32.mrf.mxu3  ;;  %4995 = vmatmul.f32.vlgmr.msrb.gmra.mxu0 %v4831_v16  ;;  %v8282_v27 = vld [vmem:[#allocation38_spill] sm:$0xff] }
 0x65d   : > { %5019 = vmatpush.msra.mxu0 %v4700_v59  ;;  %v8005_v1 = vadd.f32 %v3755_v30, %v3754_v33  ;;  %v3757_v39 = vmax.f32 %v3237_v51, 0.0  ;;  %v4686_v30 = vmul.f32 %v6945_v17, %v8280_v60  ;;  %v4685_v59 = vmul.f32 %v6945_v17, %v8281_v38 }
 0x65e   : > { %v4732_v6 = vmul.f32 %v6945_v17, %v8282_v27  ;;  %v8296_v27 = vld [vmem:[#allocation24_spill] sm:$0xff] }
 0x65f   : > { %5020 = vmatpush.msra.mxu0 %v4699_v25  ;;  %v8283_v25 = vld [vmem:[#allocation35_spill] sm:$0xff] }
 0x660   : > { %v4731_v51 = vmul.f32 %v6945_v17, %v8283_v25 }
 0x661   : > { %5021 = vmatpush.msra.mxu0 %v4698_v63  ;;  %v8284_v63 = vld [vmem:[#allocation36_spill] sm:$0xff] }
 0x662   : > { %v2588_v15 = vpop.f32.mrf.mxu2  ;;  %v4730_v37 = vmul.f32 %v6945_v17, %v8284_v63 }
 0x663   : > { %5022 = vmatpush.msra.mxu0 %v4697_v62  ;;  %v3756_v24 = vmax.f32 %v2588_v15, 0.0  ;;  %v8286_v15 = vld [vmem:[#allocation32_spill] sm:$0xff] }
 0x664   : > { %v3240_v22 = vpop.f32.mrf.mxu3 }
 0x665   : > { %5023 = vmatpush.msra.mxu0 %v4696_v50  ;;  %v8018_v28 = vadd.f32 %v3757_v39, %v3756_v24  ;;  %v3759_v21 = vmax.f32 %v3240_v22, 0.0  ;;  %v4729_v50 = vmul.f32 %v6945_v17, %v8285_v31  ;;  %v4728_v24 = vmul.f32 %v6945_v17, %v8286_v15  ;;  %v4838_v31 = vld.sshfl [vmem:[#allocation1 + $0x18] sm:$0xff pattern:$0x73625140] }
 0x666   : > { %5095 = vmatmul.f32.vlgmr.msrb.gmra.mxu1 %v4838_v31  ;;  %v4839_v31 = vld.sshfl [vmem:[#allocation1 + $0x20] sm:$0xff pattern:$0x73625140] }
 0x667   : > { %5024 = vmatpush.msra.mxu0 %v4695_v42  ;;  %v4727_v42 = vmul.f32 %v6945_v17, %v8287_v18 }
 0x669   : > { %5025 = vmatpush.msra.mxu0 %v4694_v55 }
 0x66a   : > { %v2591_v13 = vpop.f32.mrf.mxu2 }
 0x66b   : > { %5026 = vmatpush.msra.mxu0 %v4693_v41  ;;  %v3758_v11 = vmax.f32 %v2591_v13, 0.0  ;;  %v4726_v41 = vmul.f32 %v6945_v17, %v8288_v7  ;;  %v8290_v13 = vld [vmem:[#allocation30_spill] sm:$0xff] }
 0x66c   : > { %v3242_v9 = vpop.f32.mrf.mxu3 }
 0x66d   : > { %5027 = vmatpush.msra.mxu0 %v4692_v34  ;;  %v8028_v3 = vadd.f32 %v3759_v21, %v3758_v11  ;;  %v3761_v8 = vmax.f32 %v3242_v9, 0.0  ;;  %v4725_v34 = vmul.f32 %v6945_v17, %v8289_v48  ;;  %v4724_v11 = vmul.f32 %v6945_v17, %v8290_v13  ;;  %v8291_v9 = vld [vmem:[#allocation31_spill] sm:$0xff]  ;;  %v8302_v13 = vld [vmem:[#allocation65_spill] sm:$0xff] }
 0x66e   : > { %v4723_v56 = vmul.f32 %v6945_v17, %v8291_v9 }
 0x66f   : > { %5028 = vmatpush.msra.mxu0 %v4691_v58 }
 0x671   : > { %5029 = vmatpush.msra.mxu0 %v4690_v36 }
 0x672   : > { %v2593_v52 = vpop.f32.mrf.mxu2 }
 0x673   : > { %5030 = vmatpush.msra.mxu0 %v4689_v5  ;;  %v3760_v53 = vmax.f32 %v2593_v52, 0.0  ;;  %v8292_v5 = vld [vmem:[#allocation26_spill] sm:$0xff]  ;;  %v8293_v52 = vld [vmem:[#allocation27_spill] sm:$0xff] }
 0x674   : > { %v3245_v40 = vpop.f32.mrf.mxu3  ;;  %v4722_v46 = vmul.f32 %v6945_v17, %v8292_v5 }
 0x675   : > { %5031 = vmatpush.msra.mxu0 %v4688_v12  ;;  %v8038_v20 = vadd.f32 %v3761_v8, %v3760_v53  ;;  %v3763_v33 = vmax.f32 %v3245_v40, 0.0  ;;  %v4721_v53 = vmul.f32 %v6945_v17, %v8293_v52  ;;  %v8294_v8 = vld [vmem:[#allocation28_spill] sm:$0xff]  ;;  %v8295_v40 = vld [vmem:[#allocation23_spill] sm:$0xff] }
 0x676   : > { %v4720_v0 = vmul.f32 %v6945_v17, %v8294_v8  ;;  %v4719_v60 = vmul.f32 %v6945_v17, %v8295_v40 }
 0x677   : > { %5032 = vmatpush.msra.mxu0 %v4687_v54 }
 0x679   : > { %5033 = vmatpush.msra.mxu0 %v4686_v30 }
 0x67a   : > { %v2596_v2 = vpop.f32.mrf.mxu2 }
 0x67b   : > { %5034 = vmatpush.msra.mxu0 %v4685_v59  ;;  %v3762_v16 = vmax.f32 %v2596_v2, 0.0  ;;  %v8297_v2 = vld [vmem:[#allocation25_spill] sm:$0xff] }
 0x67c   : > { %v3247_v19 = vpop.f32.mrf.mxu3  ;;  %5035 = vmatmul.f32.vlgmr.msra.gmra.mxu0 %v4835_v45  ;;  %v4717_v25 = vmul.f32 %v6945_v17, %v8297_v2 }
 0x67d   : > { %5059 = vmatpush.msrb.mxu0 %v4732_v6  ;;  %v4520_v62 = vadd.f32 %v3763_v33, %v3762_v16  ;;  %v3765_v4 = vmax.f32 %v3247_v19, 0.0  ;;  %v4718_v6 = vmul.f32 %v6945_v17, %v8296_v27  ;;  %v4837_v16 = vld.sshfl [vmem:[#allocation1 + $0x10] sm:$0xff pattern:$0x73625140]  ;;  %v4763_v19 = vmul.f32 %v6945_v17, %v7796_v10  ;;  %v8299_v10 = vld [vmem:[#allocation66_spill] sm:$0xff] }
 0x67e   : > { %v4760_v18 = vmul.f32 %v6945_v17, %v8299_v10 }
 0x67f   : > { %5060 = vmatpush.msrb.mxu0 %v4731_v51  ;;  %4521 = vadd.xlane.f32.xlu1 %v4520_v62  ;;  %v4764_v51 = vmul.f32 %v6945_v17, %v7755_v43 }
 0x681   : > { %5061 = vmatpush.msrb.mxu0 %v4730_v37  ;;  %v8080_v37 = vpop.xlane.xlu0 %4470 }
 0x682   : > { %v2598_v39 = vpop.f32.mrf.mxu2 }
 0x683   : > { %5062 = vmatpush.msrb.mxu0 %v4729_v50  ;;  %v3764_v22 = vmax.f32 %v2598_v39, 0.0  ;;  %v4762_v50 = vmul.f32 %v6945_v17, %v7757_v26 }
 0x684   : > { %v3250_v55 = vpop.f32.mrf.mxu3 }
 0x685   : > { %5063 = vmatpush.msrb.mxu0 %v4728_v24  ;;  %v4523_v21 = vadd.f32 %v3765_v4, %v3764_v22  ;;  %v3767_v32 = vmax.f32 %v3250_v55, 0.0  ;;  %v8298_v24 = vld [vmem:[#allocation67_spill] sm:$0xff] }
 0x686   : > { %v4761_v39 = vmul.f32 %v6945_v17, %v8298_v24 }
 0x687   : > { %5064 = vmatpush.msrb.mxu0 %v4727_v42  ;;  %4524 = vadd.xlane.f32.xlu0 %v4523_v21  ;;  %v8300_v42 = vld [vmem:[#allocation63_spill] sm:$0xff] }
 0x688   : > { %v4759_v22 = vmul.f32 %v6945_v17, %v8300_v42 }
 0x689   : > { %5065 = vmatpush.msrb.mxu0 %v4726_v41  ;;  %v8090_v55 = vpop.xlane.xlu0 %4479  ;;  %v8301_v41 = vld [vmem:[#allocation64_spill] sm:$0xff] }
 0x68a   : > { %v2601_v58 = vpop.f32.mrf.mxu2  ;;  %v4758_v21 = vmul.f32 %v6945_v17, %v8301_v41 }
 0x68b   : > { %5066 = vmatpush.msrb.mxu0 %v4725_v34  ;;  %v3766_v36 = vmax.f32 %v2601_v58, 0.0 }
 0x68c   : > { %v3252_v61 = vpop.f32.mrf.mxu3 }
 0x68d   : > { %5067 = vmatpush.msrb.mxu0 %v4724_v11  ;;  %v4526_v12 = vadd.f32 %v3767_v32, %v3766_v36  ;;  %v3769_v38 = vmax.f32 %v3252_v61, 0.0  ;;  %v4757_v11 = vmul.f32 %v6945_v17, %v8302_v13  ;;  %v8303_v32 = vld [vmem:[#allocation60_spill] sm:$0xff] }
 0x68e   : > { %v4756_v58 = vmul.f32 %v6945_v17, %v8303_v32 }
 0x68f   : > { %5068 = vmatpush.msrb.mxu0 %v4723_v56  ;;  %4527 = vadd.xlane.f32.xlu2 %v4526_v12  ;;  %v8304_v56 = vld [vmem:[#allocation61_spill] sm:$0xff]  ;;  %v8305_v12 = vld [vmem:[#allocation62_spill] sm:$0xff] }
 0x690   : > { %v4755_v36 = vmul.f32 %v6945_v17, %v8304_v56  ;;  %v4754_v52 = vmul.f32 %v6945_v17, %v8305_v12  ;;  %v4840_v12 = vld.sshfl [vmem:[#allocation1 + $0x28] sm:$0xff pattern:$0x73625140] }
 0x691   : > { %5069 = vmatpush.msrb.mxu0 %v4722_v46 }
 0x692   : > { %v2603_v54 = vpop.f32.mrf.mxu2 }
 0x693   : > { %5070 = vmatpush.msrb.mxu0 %v4721_v53  ;;  %v3768_v30 = vmax.f32 %v2603_v54, 0.0  ;;  %v8306_v54 = vld [vmem:[#allocation57_spill] sm:$0xff] }
 0x694   : > { %v3255_v59 = vpop.f32.mrf.mxu3  ;;  %v4753_v40 = vmul.f32 %v6945_v17, %v8306_v54 }
 0x695   : > { %5071 = vmatpush.msrb.mxu0 %v4720_v0  ;;  %v4529_v33 = vadd.f32 %v3769_v38, %v3768_v30  ;;  %v3771_v45 = vmax.f32 %v3255_v59, 0.0  ;;  %v4477_v0 = vpop.xlane.xlu1 %4476  ;;  %v8307_v30 = vld [vmem:[#allocation58_spill] sm:$0xff]  ;;  %v8308_v59 = vld [vmem:[#allocation59_spill] sm:$0xff] }
 0x696   : > { %v4752_v38 = vmul.f32 %v6945_v17, %v8307_v30  ;;  %v4751_v27 = vmul.f32 %v6945_v17, %v8308_v59  ;;  %v4788_v56 = vmul.f32 %v6945_v17, %v4477_v0 }
 0x697   : > { %5072 = vmatpush.msrb.mxu0 %v4719_v60  ;;  %4530 = vadd.xlane.f32.xlu1 %v4529_v33  ;;  %v4474_v60 = vpop.xlane.xlu2 %4473 }
 0x699   : > { %5073 = vmatpush.msrb.mxu0 %v4718_v6 }
 0x69a   : > { %v2606_v63 = vpop.f32.mrf.mxu2  ;;  %v4489_v5 = vpop.xlane.xlu0 %4488 }
 0x69b   : > { %5074 = vmatpush.msrb.mxu0 %v4717_v25  ;;  %v3770_v62 = vmax.f32 %v2606_v63, 0.0  ;;  %v4749_v63 = vmul.f32 %v6945_v17, %v7939_v23  ;;  %v8310_v23 = vld [vmem:[#allocation53_spill] sm:$0xff]  ;;  %v4792_v13 = vmul.f32 %v6945_v17, %v4489_v5 }
 0x69c   : > { %5075 = vmatmul.f32.vlgmr.msrb.gmra.mxu0 %v4837_v16  ;;  %v3257_v15 = vpop.f32.mrf.mxu3 }
 0x69d   : > { %5099 = vmatpush.msra.mxu0 %v4764_v51  ;;  %v4532_v43 = vadd.f32 %v3771_v45, %v3770_v62  ;;  %v3773_v7 = vmax.f32 %v3257_v15, 0.0  ;;  %v8309_v51 = vld [vmem:[#allocation55_spill] sm:$0xff] }
 0x69e   : > { %v4750_v16 = vmul.f32 %v6945_v17, %v8309_v51 }
 0x69f   : > { %5100 = vmatpush.msra.mxu0 %v4763_v19  ;;  %4533 = vadd.xlane.f32.xlu0 %v4532_v43  ;;  %v4486_v19 = vpop.xlane.xlu1 %4485 }
 0x6a0   : > { %v4791_v32 = vmul.f32 %v6945_v17, %v4486_v19 }
 0x6a1   : > { %5101 = vmatpush.msra.mxu0 %v4762_v50  ;;  %v4483_v50 = vpop.xlane.xlu2 %4482 }
 0x6a2   : > { %v2608_v4 = vpop.f32.mrf.mxu2 }
 0x6a3   : > { %5102 = vmatpush.msra.mxu0 %v4761_v39  ;;  %v3772_v26 = vmax.f32 %v2608_v4, 0.0 }
 0x6a4   : > { %v3260_v48 = vpop.f32.mrf.mxu3 }
 0x6a5   : > { %5103 = vmatpush.msra.mxu0 %v4760_v18  ;;  %v4535_v34 = vadd.f32 %v3773_v7, %v3772_v26  ;;  %v3775_v9 = vmax.f32 %v3260_v48, 0.0 }
 0x6a7   : > { %5104 = vmatpush.msra.mxu0 %v4759_v22  ;;  %4536 = vadd.xlane.f32.xlu2 %v4535_v34 }
 0x6a9   : > { %5105 = vmatpush.msra.mxu0 %v4758_v21  ;;  %v4492_v4 = vpop.xlane.xlu2 %4491 }
 0x6aa   : > { %v2611_v61 = vpop.f32.mrf.mxu2  ;;  %v4495_v42 = vpop.xlane.xlu1 %4494  ;;  %v4793_v41 = vmul.f32 %v6945_v17, %v4492_v4 }
 0x6ab   : > { %5106 = vmatpush.msra.mxu0 %v4757_v11  ;;  %v3774_v46 = vmax.f32 %v2611_v61, 0.0  ;;  %v4794_v26 = vmul.f32 %v6945_v17, %v4495_v42  ;;  %v4896_v4 = vpop.f32.mrf.mxu1 }
 0x6ac   : > { %v3262_v53 = vpop.f32.mrf.mxu3 }
 0x6ad   : > { %5107 = vmatpush.msra.mxu0 %v4756_v58  ;;  %v4538_v8 = vadd.f32 %v3775_v9, %v3774_v46  ;;  %v3777_v25 = vmax.f32 %v3262_v53, 0.0  ;;  %v4790_v58 = vmul.f32 %v6945_v17, %v4483_v50  ;;  %v4789_v9 = vmul.f32 %v6945_v17, %v8090_v55 }
 0x6af   : > { %5108 = vmatpush.msra.mxu0 %v4755_v36  ;;  %4539 = vadd.xlane.f32.xlu1 %v4538_v8  ;;  %v4787_v36 = vmul.f32 %v6945_v17, %v4474_v60 }
 0x6b1   : > { %5109 = vmatpush.msra.mxu0 %v4754_v52 }
 0x6b2   : > { %v2613_v6 = vpop.f32.mrf.mxu2  ;;  %v4498_v33 = vpop.xlane.xlu0 %4497 }
 0x6b3   : > { %5110 = vmatpush.msra.mxu0 %v4753_v40  ;;  %v3776_v2 = vmax.f32 %v2613_v6, 0.0  ;;  %v4795_v22 = vmul.f32 %v6945_v17, %v4498_v33 }
 0x6b4   : > { %v3265_v62 = vpop.f32.mrf.mxu3 }
 0x6b5   : > { %5111 = vmatpush.msra.mxu0 %v4752_v38  ;;  %v4541_v45 = vadd.f32 %v3777_v25, %v3776_v2  ;;  %v3779_v15 = vmax.f32 %v3265_v62, 0.0 }
 0x6b7   : > { %5112 = vmatpush.msra.mxu0 %v4751_v27  ;;  %4542 = vadd.xlane.f32.xlu0 %v4541_v45 }
 0x6b9   : > { %5113 = vmatpush.msra.mxu0 %v4750_v16 }
 0x6ba   : > { %v2616_v43 = vpop.f32.mrf.mxu2  ;;  %v4501_v24 = vpop.xlane.xlu0 %4500 }
 0x6bb   : > { %5114 = vmatpush.msra.mxu0 %v4749_v63  ;;  %v3778_v39 = vmax.f32 %v2616_v43, 0.0  ;;  %v4796_v10 = vmul.f32 %v6945_v17, %v4501_v24 }
 0x6bc   : > { %5115 = vmatmul.f32.vlgmr.msra.gmra.mxu0 %v4839_v31  ;;  %v3267_v7 = vpop.f32.mrf.mxu3 }
 0x6bd   : > { %v4544_v18 = vadd.f32 %v3779_v15, %v3778_v39  ;;  %5139 = vmatpush.msrb.mxu0 %v4796_v10  ;;  %v3781_v34 = vmax.f32 %v3267_v7, 0.0  ;;  %v4842_v10 = vld.sshfl [vmem:[#allocation1 + $0x38] sm:$0xff pattern:$0x73625140]  ;;  %v4936_v7 = vpop.f32.mrf.mxu1 }
 0x6bf   : > { %4545 = vadd.xlane.f32.xlu2 %v4544_v18  ;;  %4407 = vadd.xlane.f32.xlu0 %v8310_v23  ;;  %v4876_v23 = vpop.f32.mrf.mxu0 }
 0x6c0   : > { %5140 = vmatpush.msrb.mxu0 %v4795_v22  ;;  %v4841_v22 = vld.sshfl [vmem:[#allocation1 + $0x30] sm:$0xff pattern:$0x73625140] }
 0x6c2   : > { %5141 = vmatpush.msrb.mxu0 %v4794_v26  ;;  %v2618_v21 = vpop.f32.mrf.mxu2 }
 0x6c3   : > { %v3780_v48 = vmax.f32 %v2618_v21, 0.0 }
 0x6c4   : > { %5142 = vmatpush.msrb.mxu0 %v4793_v41  ;;  %v4817_v41 = vld [vmem:[%s8176_s7] sm:$0x3] }
 0x6c5   : > { %v4547_v11 = vadd.f32 %v3781_v34, %v3780_v48  ;;  %v4877_v21 = vadd.f32 %v4876_v23, %v4817_v41 }
 0x6c6   : > { %5143 = vmatpush.msrb.mxu0 %v4792_v13  ;;  %v4976_v13 = vpop.f32.mrf.mxu1 }
 0x6c7   : > { %4548 = vadd.xlane.f32.xlu1 %v4547_v11  ;;  %4518 = vadd.xlane.f32.xlu2 %v8038_v20  ;;  %v4786_v20 = vmul.f32 %v6945_v17, %v8080_v37  ;;  %v4916_v26 = vpop.f32.mrf.mxu0  ;;  %v4897_v34 = vadd.f32 %v4896_v4, %v4877_v21 }
 0x6c8   : > { %4461 = vadd.xlane.f32.xlu0 %v7765_v44  ;;  %5144 = vmatpush.msrb.mxu0 %v4791_v32 }
 0x6c9   : > { %v4917_v11 = vadd.f32 %v4916_v26, %v4897_v34 }
 0x6ca   : > { %5145 = vmatpush.msrb.mxu0 %v4790_v58 }
 0x6cb   : > { %v4937_v32 = vadd.f32 %v4936_v7, %v4917_v11 }
 0x6cc   : > { %5146 = vmatpush.msrb.mxu0 %v4789_v9 }
 0x6ce   : > { %5147 = vmatpush.msrb.mxu0 %v4788_v56  ;;  %v5016_v58 = vpop.f32.mrf.mxu1 }
 0x6cf   : > { %4467 = vadd.xlane.f32.xlu1 %v7800_v57  ;;  %4515 = vadd.xlane.f32.xlu2 %v8028_v3  ;;  %v4956_v48 = vpop.f32.mrf.mxu0 }
 0x6d0   : > { %4509 = vadd.xlane.f32.xlu0 %v8005_v1  ;;  %5148 = vmatpush.msrb.mxu0 %v4787_v36  ;;  %v4957_v9 = vadd.f32 %v4956_v48, %v4937_v32 }
 0x6d2   : > { %5149 = vmatpush.msrb.mxu0 %v4786_v20  ;;  %v4977_v56 = vadd.f32 %v4976_v13, %v4957_v9 }
 0x6d7   : > { %4464 = vadd.xlane.f32.xlu1 %v7783_v47  ;;  %4458 = vadd.xlane.f32.xlu2 %v7750_v35 }
 0x6d8   : > { %4503 = vadd.xlane.f32.xlu0 %v7973_v49 }
 0x6df   : > { %4512 = vadd.xlane.f32.xlu1 %v8018_v28  ;;  %4506 = vadd.xlane.f32.xlu2 %v7989_v29 }
 0x6e7   : > { %4455 = vadd.xlane.f32.xlu1 %v7733_v14 }
 0x6f2   : > { %v4522_v57 = vpop.xlane.xlu1 %4521 }
 0x6f3   : > { %v4803_v51 = vmul.f32 %v6945_v17, %v4522_v57 }
 0x6fa   : > { %v4525_v44 = vpop.xlane.xlu0 %4524 }
 0x6fb   : > { %v4804_v33 = vmul.f32 %v6945_v17, %v4525_v44  ;;  %v5056_v44 = vpop.f32.mrf.mxu1 }
 0x702   : > { %v4528_v3 = vpop.xlane.xlu2 %4527 }
 0x703   : > { %v4805_v59 = vmul.f32 %v6945_v17, %v4528_v3 }
 0x70a   : > { %v4531_v55 = vpop.xlane.xlu1 %4530 }
 0x70b   : > { %v4806_v38 = vmul.f32 %v6945_v17, %v4531_v55  ;;  %v5096_v55 = vpop.f32.mrf.mxu1 }
 0x712   : > { %v4534_v37 = vpop.xlane.xlu0 %4533 }
 0x713   : > { %v4807_v30 = vmul.f32 %v6945_v17, %v4534_v37 }
 0x71a   : > { %v4537_v1 = vpop.xlane.xlu2 %4536 }
 0x71b   : > { %v4808_v40 = vmul.f32 %v6945_v17, %v4537_v1 }
 0x722   : > { %v4540_v5 = vpop.xlane.xlu1 %4539 }
 0x723   : > { %v4809_v53 = vmul.f32 %v6945_v17, %v4540_v5 }
 0x72a   : > { %v4543_v61 = vpop.xlane.xlu0 %4542 }
 0x72b   : > { %v4810_v52 = vmul.f32 %v6945_v17, %v4543_v61 }
 0x732   : > { %v4546_v46 = vpop.xlane.xlu2 %4545  ;;  %v4408_v47 = vpop.xlane.xlu0 %4407 }
 0x733   : > { %v4765_v35 = vmul.f32 %v6945_v17, %v4408_v47  ;;  %v4811_v14 = vmul.f32 %v6945_v17, %v4546_v46 }
 0x735   : > { %5134 = vmatpush.msra.mxu1 %v4765_v35 }
 0x736   : > { %5135 = vmatmul.f32.vlgmr.msra.gmra.mxu1 %v4840_v12 }
 0x73a   : > { %v4549_v49 = vpop.xlane.xlu1 %4548  ;;  %v4519_v28 = vpop.xlane.xlu2 %4518 }
 0x73b   : > { %v4812_v29 = vmul.f32 %v6945_v17, %v4549_v49  ;;  %v4462_v8 = vpop.xlane.xlu0 %4461  ;;  %v4802_v45 = vmul.f32 %v6945_v17, %v4519_v28 }
 0x73c   : > { %v4783_v16 = vmul.f32 %v6945_v17, %v4462_v8 }
 0x73d   : > { %5159 = vmatpush.msrb.mxu1 %v4812_v29 }
 0x73f   : > { %5160 = vmatpush.msrb.mxu1 %v4811_v14 }
 0x741   : > { %5161 = vmatpush.msrb.mxu1 %v4810_v52 }
 0x742   : > { %v4468_v0 = vpop.xlane.xlu1 %4467  ;;  %v4516_v54 = vpop.xlane.xlu2 %4515 }
 0x743   : > { %v4785_v60 = vmul.f32 %v6945_v17, %v4468_v0  ;;  %5162 = vmatpush.msrb.mxu1 %v4809_v53  ;;  %v4510_v25 = vpop.xlane.xlu0 %4509  ;;  %v4801_v63 = vmul.f32 %v6945_v17, %v4516_v54 }
 0x744   : > { %v4799_v15 = vmul.f32 %v6945_v17, %v4510_v25 }
 0x745   : > { %5150 = vmatpush.msrb.mxu0 %v4785_v60  ;;  %5163 = vmatpush.msrb.mxu1 %v4808_v40 }
 0x747   : > { %5164 = vmatpush.msrb.mxu1 %v4807_v30 }
 0x749   : > { %5165 = vmatpush.msrb.mxu1 %v4806_v38 }
 0x74a   : > { %v4465_v27 = vpop.xlane.xlu1 %4464  ;;  %v4459_v6 = vpop.xlane.xlu2 %4458 }
 0x74b   : > { %v4784_v2 = vmul.f32 %v6945_v17, %v4465_v27  ;;  %5166 = vmatpush.msrb.mxu1 %v4805_v59  ;;  %v4782_v19 = vmul.f32 %v6945_v17, %v4459_v6  ;;  %v4504_v43 = vpop.xlane.xlu0 %4503 }
 0x74c   : > { %v4797_v39 = vmul.f32 %v6945_v17, %v4504_v43 }
 0x74d   : > { %5151 = vmatpush.msrb.mxu0 %v4784_v2  ;;  %5167 = vmatpush.msrb.mxu1 %v4804_v33 }
 0x74f   : > { %5152 = vmatpush.msrb.mxu0 %v4783_v16  ;;  %5168 = vmatpush.msrb.mxu1 %v4803_v51 }
 0x751   : > { %5153 = vmatpush.msrb.mxu0 %v4782_v19  ;;  %5169 = vmatpush.msrb.mxu1 %v4802_v45 }
 0x752   : > { %v4513_v62 = vpop.xlane.xlu1 %4512  ;;  %v4507_v50 = vpop.xlane.xlu2 %4506 }
 0x753   : > { %v4800_v31 = vmul.f32 %v6945_v17, %v4513_v62  ;;  %5170 = vmatpush.msrb.mxu1 %v4801_v63  ;;  %v4798_v24 = vmul.f32 %v6945_v17, %v4507_v50 }
 0x755   : > { %5171 = vmatpush.msrb.mxu1 %v4800_v31 }
 0x757   : > { %5172 = vmatpush.msrb.mxu1 %v4799_v15 }
 0x759   : > { %5173 = vmatpush.msrb.mxu1 %v4798_v24 }
 0x75a   : > { %v4456_v18 = vpop.xlane.xlu1 %4455 }
 0x75b   : > { %v4781_v42 = vmul.f32 %v6945_v17, %v4456_v18  ;;  %5174 = vmatpush.msrb.mxu1 %v4797_v39  ;;  %v4996_v17 = vpop.f32.mrf.mxu0 }
 0x75c   : > { %5175 = vmatmul.f32.vlgmr.msrb.gmra.mxu1 %v4842_v10  ;;  %v4997_v20 = vadd.f32 %v4996_v17, %v4977_v56 }
 0x75d   : > { %5154 = vmatpush.msrb.mxu0 %v4781_v42 }
 0x75e   : > { %5155 = vmatmul.f32.vlgmr.msrb.gmra.mxu0 %v4841_v22  ;;  %v5017_v57 = vadd.f32 %v5016_v58, %v4997_v20 }
 0x763   : > { %v5036_v36 = vpop.f32.mrf.mxu0 }
 0x764   : > { %v5037_v3 = vadd.f32 %v5036_v36, %v5017_v57 }
 0x766   : > { %v5057_v1 = vadd.f32 %v5056_v44, %v5037_v3 }
 0x76b   : > { %v5076_v37 = vpop.f32.mrf.mxu0 }
 0x76c   : > { %v5077_v61 = vadd.f32 %v5076_v37, %v5057_v1 }
 0x76e   : > { %v5097_v47 = vadd.f32 %v5096_v55, %v5077_v61 }
 0x773   : > { %v5116_v5 = vpop.f32.mrf.mxu0 }
 0x774   : > { %v5117_v35 = vadd.f32 %v5116_v5, %v5097_v47 }
 0x7b3   : > { %v5136_v46 = vpop.f32.mrf.mxu1 }
 0x7b4   : > { %v5137_v12 = vadd.f32 %v5136_v46, %v5117_v35 }
 0x7d9   : > { %v5176_v28 = vpop.f32.mrf.mxu1 }
 0x7db   : > { %v5156_v49 = vpop.f32.mrf.mxu0 }
 0x7dc   : > { %v5157_v29 = vadd.f32 %v5156_v49, %v5137_v12 }
 0x7de   : > { %v5177_v14 = vadd.f32 %v5176_v28, %v5157_v29 }
 0x7e0   : > { %5180 = vst.msk [vmem:[%s303_s10] sm:$0x3] %vm5179_vm5, %v5177_v14 }
 0x7e1 PF: > { %s18_s27 = sadd.s32 1, %s6166_s27  }
 0x7e2   : > { %p15_p4 = scmp.ge.s32.totalorder %s18_s27, 4  }
 0x7e4   :  { %17 = sbr.rel (!%p15_p4) target bundleno = 1 (0x1), region = 83 }

</bundles_post_ra>
